<compile_context>
chip_gen: v7x
topology: tpu7x:2x2x1
jax: 0.10.0
libtpu: 0.0.40
codegen_flags: <defaults>
</compile_context>

<pallas_src>
import jax
import jax.numpy as jnp
from jax.experimental import pallas as pl
from jax.experimental.pallas import tpu as pltpu


def _round_up(x, m):
    return ((x + m - 1) // m) * m


def _make_fp_kernel(num_mid_layers):
    def kernel(x1_ref, x2t_ref, p1_ref, p2_ref, w0a_ref, w0b_ref, b0_ref, *rest):
        mid_refs = rest[: 2 * num_mid_layers]
        out_ref = rest[2 * num_mid_layers]

        x1 = x1_ref[0]    # [TN, 8]      f32 augmented coords
        x2t = x2t_ref[0]  # [8, S_pad]   f32 augmented coords (pre-transposed)
        p1 = p1_ref[0]    # [TN, D1]     bf16
        p2 = p2_ref[0]    # [S_pad, D2]  bf16

        # squared pairwise distances, fused into a single MXU matmul.
        d = jnp.dot(x1, x2t, preferred_element_type=jnp.float32)   # [TN, S_pad]
        d = jnp.maximum(d, 0.0)   # kill small negatives from cancellation

        tn, s_pad = d.shape
        iota_s = jax.lax.broadcasted_iota(jnp.int32, (tn, s_pad), 1)

        # 3-NN inverse-distance weights as a sparse [TN, S_pad] weight matrix
        # (3 iterative masked argmins instead of a full sort).
        w_mat = jnp.zeros((tn, s_pad), jnp.float32)
        norm = jnp.zeros((tn, 1), jnp.float32)
        dd = d
        for _ in range(3):
            mk = jnp.min(dd, axis=-1, keepdims=True)                     # [TN,1]
            idxk = jnp.min(jnp.where(dd == mk, iota_s, s_pad),
                           axis=-1, keepdims=True)                       # first occurrence
            onehot = (iota_s == idxk).astype(jnp.float32)
            recip = pl.reciprocal(mk + 1e-8, approx=True)                # EUP slot
            w_mat = w_mat + onehot * recip
            norm = norm + recip
            dd = jnp.where(onehot > 0, jnp.inf, dd)
        w_mat = w_mat * pl.reciprocal(norm, approx=True)

        # interpolation == matmul (replaces index_points gather)
        interp = jnp.dot(w_mat.astype(jnp.bfloat16), p2,
                         preferred_element_type=jnp.float32)             # [TN, D2]

        # MLP layer 0, concat-free: relu(p1 @ W0a + interp @ W0b + b0)
        h = jnp.dot(p1, w0a_ref[...], preferred_element_type=jnp.float32)
        h = h + jnp.dot(interp.astype(jnp.bfloat16), w0b_ref[...],
                        preferred_element_type=jnp.float32)
        h = jnp.maximum(h + b0_ref[...], 0.0)

        # remaining Conv1d(k=1) + folded BN + ReLU layers
        for i in range(num_mid_layers):
            w = mid_refs[2 * i][...]       # [Cin, Cout_i] bf16 (BN scale folded)
            b = mid_refs[2 * i + 1][...]   # [1, Cout_i]   f32  (BN shift folded)
            h = jnp.maximum(
                jnp.dot(h.astype(jnp.bfloat16), w,
                        preferred_element_type=jnp.float32) + b, 0.0)

        # write channels-major [Cout_pad, TN] (lane-dense stores, no wrapper
        # transpose HBM round trip).
        out_ref[0] = jnp.transpose(h).astype(out_ref.dtype)

    return kernel


def pointnet_fp_forward(xyz1, xyz2, points1, points2, fused_ws, fused_bs):
    """xyz1 [B,3,N], xyz2 [B,3,S], points1 [B,D1,N], points2 [B,D2,S] -> [B, Cout, N]"""
    B, _, N = xyz1.shape
    S = xyz2.shape[2]
    D1 = points1.shape[1]
    D2 = points2.shape[1]
    num_layers = len(fused_ws)
    Cout = fused_ws[-1].shape[1]

    # --- tile / pad sizes (all 128-aligned on lane-relevant axes) ---
    N_pad = _round_up(N, 128)
    TN = 256 if N_pad % 256 == 0 else 128     # kept modest so v7x (64 MiB VMEM) fits
    S_pad = _round_up(S, 128)
    Cout_pad = _round_up(Cout, 128)

    x1 = jnp.transpose(xyz1, (0, 2, 1)).astype(jnp.float32)       # [B, N, 3]
    x2 = jnp.transpose(xyz2, (0, 2, 1)).astype(jnp.float32)       # [B, S, 3]

    # Augmented coordinates so d = x1_aug @ x2_aug^T in one matmul (K padded 5->8).
    x1_aug = jnp.concatenate(
        [x1,
         jnp.sum(x1 * x1, axis=-1, keepdims=True),
         jnp.ones((B, N, 1), jnp.float32),
         jnp.zeros((B, N, 3), jnp.float32)], axis=-1)              # [B, N, 8]
    x1_aug = jnp.pad(x1_aug, ((0, 0), (0, N_pad - N), (0, 0)))

    x2_aug = jnp.concatenate(
        [-2.0 * x2,
         jnp.ones((B, S, 1), jnp.float32),
         jnp.sum(x2 * x2, axis=-1, keepdims=True),
         jnp.zeros((B, S, 3), jnp.float32)], axis=-1)              # [B, S, 8]
    if S_pad > S:
        # padded S columns get distance 1e30 through the matmul -> never picked
        pad_rows = jnp.zeros((B, S_pad - S, 8), jnp.float32).at[:, :, 4].set(1e30)
        x2_aug = jnp.concatenate([x2_aug, pad_rows], axis=1)
    x2_aug_t = jnp.transpose(x2_aug, (0, 2, 1))                    # [B, 8, S_pad]

    p1 = jnp.transpose(points1, (0, 2, 1)).astype(jnp.bfloat16)    # [B, N, D1]
    p1 = jnp.pad(p1, ((0, 0), (0, N_pad - N), (0, 0)))
    p2 = jnp.transpose(points2, (0, 2, 1)).astype(jnp.bfloat16)    # [B, S, D2]
    p2 = jnp.pad(p2, ((0, 0), (0, S_pad - S), (0, 0)))

    # split first-layer weight (concat-free) and pad last layer to Cout_pad.
    w0 = fused_ws[0]
    w0a, w0b, b0 = w0[:D1, :], w0[D1:, :], fused_bs[0]
    mid_ws = list(fused_ws[1:])
    mid_bs = list(fused_bs[1:])
    if num_layers == 1:
        w0a = jnp.pad(w0a, ((0, 0), (0, Cout_pad - Cout)))
        w0b = jnp.pad(w0b, ((0, 0), (0, Cout_pad - Cout)))
        b0 = jnp.pad(b0, ((0, 0), (0, Cout_pad - Cout)))
    else:
        mid_ws[-1] = jnp.pad(mid_ws[-1], ((0, 0), (0, Cout_pad - Cout)))
        mid_bs[-1] = jnp.pad(mid_bs[-1], ((0, 0), (0, Cout_pad - Cout)))

    w0a = w0a.astype(jnp.bfloat16)
    w0b = w0b.astype(jnp.bfloat16)
    b0 = b0.astype(jnp.float32)
    mid_ws = [w.astype(jnp.bfloat16) for w in mid_ws]
    mid_bs = [b.astype(jnp.float32) for b in mid_bs]

    kernel = _make_fp_kernel(len(mid_ws))

    in_specs = [
        pl.BlockSpec((1, TN, 8), lambda b, n: (b, n, 0)),          # x1_aug (tiled)
        pl.BlockSpec((1, 8, S_pad), lambda b, n: (b, 0, 0)),       # x2_aug^T (resident)
        pl.BlockSpec((1, TN, D1), lambda b, n: (b, n, 0)),         # points1 (tiled)
        pl.BlockSpec((1, S_pad, D2), lambda b, n: (b, 0, 0)),      # points2 (resident)
        pl.BlockSpec(w0a.shape, lambda b, n: (0, 0)),
        pl.BlockSpec(w0b.shape, lambda b, n: (0, 0)),
        pl.BlockSpec(b0.shape, lambda b, n: (0, 0)),
    ]
    params = [w0a, w0b, b0]
    for w, bvec in zip(mid_ws, mid_bs):
        in_specs.append(pl.BlockSpec(w.shape, lambda b, n: (0, 0)))
        in_specs.append(pl.BlockSpec(bvec.shape, lambda b, n: (0, 0)))
        params += [w, bvec]

    out = pl.pallas_call(
        kernel,
        out_shape=jax.ShapeDtypeStruct((B, Cout_pad, N_pad), jnp.float32),
        grid_spec=pltpu.PrefetchScalarGridSpec(
            num_scalar_prefetch=0,
            grid=(B, N_pad // TN),
            in_specs=in_specs,
            out_specs=pl.BlockSpec((1, Cout_pad, TN), lambda b, n: (b, 0, n)),
        ),
        compiler_params=pltpu.CompilerParams(
            dimension_semantics=("parallel", "parallel"),
            vmem_limit_bytes=48 * 1024 * 1024),
    )(x1_aug, x2_aug_t, p1, p2, *params)

    # output is already channel-major; just un-pad.
    return out[:, :Cout, :N]


def init_params(in_channel, mlp, key):
    """Deterministic Conv1d(k=1) + BatchNorm1d params, folded for eval-mode BN."""
    ws, bs = [], []
    last = in_channel
    for out_ch in mlp:
        key, kw, kb, kg, kbt, km, kv = jax.random.split(key, 7)
        conv_w = 0.1 * jax.random.normal(kw, (out_ch, last), jnp.float32)
        conv_b = 0.1 * jax.random.normal(kb, (out_ch,), jnp.float32)
        gamma = 1.0 + 0.1 * jax.random.normal(kg, (out_ch,), jnp.float32)
        beta = 0.05 * jax.random.normal(kbt, (out_ch,), jnp.float32)
        running_mean = 0.1 * jax.random.normal(km, (out_ch,), jnp.float32)
        running_var = 1.0 + 0.1 * jnp.abs(jax.random.normal(kv, (out_ch,), jnp.float32))

        scale = gamma / jnp.sqrt(running_var + 1e-5)
        w_fused = conv_w.T * scale[None, :]                     # [in, out]
        b_fused = (conv_b - running_mean) * scale + beta        # [out]
        ws.append(w_fused)
        bs.append(b_fused.reshape(1, out_ch))
        last = out_ch
    return ws, bs


if __name__ == "__main__":
    key = jax.random.PRNGKey(0)
    B, N, S = 2, 16, 8
    D1, D2 = 8, 8
    mlp = [32, 16]
    in_channel = D1 + D2

    k1, k2, k3, k4, kp = jax.random.split(key, 5)
    xyz1 = jax.random.normal(k1, (B, 3, N), jnp.float32)
    xyz2 = jax.random.normal(k2, (B, 3, S), jnp.float32)
    points1 = jax.random.normal(k3, (B, D1, N), jnp.float32)
    points2 = jax.random.normal(k4, (B, D2, S), jnp.float32)

    fused_ws, fused_bs = init_params(in_channel, mlp, kp)

    out = pointnet_fp_forward(xyz1, xyz2, points1, points2, fused_ws, fused_bs)
    jax.block_until_ready(out)
    assert out.shape == (B, mlp[-1], N)
    assert bool(jnp.all(jnp.isfinite(out)))
    print("KERNEL_OK")
</pallas_src>

<mosaic_0001>
module attributes {stable_mosaic.version = 11 : i64} {
  func.func @kernel(%arg0: i32, %arg1: i32, %arg2: memref<1x128x8xf32, #tpu.memory_space<vmem>>, %arg3: memref<1x8x128xf32, #tpu.memory_space<vmem>>, %arg4: memref<1x128x8xbf16, #tpu.memory_space<vmem>>, %arg5: memref<1x128x8xbf16, #tpu.memory_space<vmem>>, %arg6: memref<8x32xbf16, #tpu.memory_space<vmem>>, %arg7: memref<8x32xbf16, #tpu.memory_space<vmem>>, %arg8: memref<1x32xf32, #tpu.memory_space<vmem>>, %arg9: memref<32x128xbf16, #tpu.memory_space<vmem>>, %arg10: memref<1x128xf32, #tpu.memory_space<vmem>>, %arg11: memref<1x128x128xf32, #tpu.memory_space<vmem>>) attributes {dimension_semantics = [#tpu.dimension_semantics<parallel>, #tpu.dimension_semantics<parallel>], iteration_bounds = array<i64: 2, 1>, scalar_prefetch = 0 : i64, scratch_operands = 0 : i64, tpu.core_type = #tpu.core_type<tc>, window_params = [{transform_indices = @transform_0, window_bounds = array<i64: 1, 128, 8>}, {transform_indices = @transform_1, window_bounds = array<i64: 1, 8, 128>}, {transform_indices = @transform_2, window_bounds = array<i64: 1, 128, 8>}, {transform_indices = @transform_3, window_bounds = array<i64: 1, 128, 8>}, {pipeline_mode = #tpu.pipeline_mode<synchronous>, transform_indices = @transform_4, window_bounds = array<i64: 8, 32>}, {pipeline_mode = #tpu.pipeline_mode<synchronous>, transform_indices = @transform_5, window_bounds = array<i64: 8, 32>}, {pipeline_mode = #tpu.pipeline_mode<synchronous>, transform_indices = @transform_6, window_bounds = array<i64: 1, 32>}, {pipeline_mode = #tpu.pipeline_mode<synchronous>, transform_indices = @transform_7, window_bounds = array<i64: 32, 128>}, {pipeline_mode = #tpu.pipeline_mode<synchronous>, transform_indices = @transform_8, window_bounds = array<i64: 1, 128>}, {transform_indices = @transform_9, window_bounds = array<i64: 1, 128, 128>}]} {
    %c0 = arith.constant 0 : index
    %c0_0 = arith.constant 0 : index
    %c0_1 = arith.constant 0 : index
    %0 = vector.load %arg2[%c0, %c0_0, %c0_1] : memref<1x128x8xf32, #tpu.memory_space<vmem>>, vector<1x128x8xf32>
    %1 = vector.shape_cast %0 : vector<1x128x8xf32> to vector<128x8xf32>
    %c0_2 = arith.constant 0 : index
    %c0_3 = arith.constant 0 : index
    %c0_4 = arith.constant 0 : index
    %2 = vector.load %arg3[%c0_2, %c0_3, %c0_4] : memref<1x8x128xf32, #tpu.memory_space<vmem>>, vector<1x8x128xf32>
    %3 = vector.shape_cast %2 : vector<1x8x128xf32> to vector<8x128xf32>
    %c0_5 = arith.constant 0 : index
    %c0_6 = arith.constant 0 : index
    %c0_7 = arith.constant 0 : index
    %4 = vector.load %arg4[%c0_5, %c0_6, %c0_7] : memref<1x128x8xbf16, #tpu.memory_space<vmem>>, vector<1x128x8xbf16>
    %5 = vector.shape_cast %4 : vector<1x128x8xbf16> to vector<128x8xbf16>
    %c0_8 = arith.constant 0 : index
    %c0_9 = arith.constant 0 : index
    %c0_10 = arith.constant 0 : index
    %6 = vector.load %arg5[%c0_8, %c0_9, %c0_10] : memref<1x128x8xbf16, #tpu.memory_space<vmem>>, vector<1x128x8xbf16>
    %7 = vector.shape_cast %6 : vector<1x128x8xbf16> to vector<128x8xbf16>
    %cst = arith.constant dense<0.000000e+00> : vector<128x128xf32>
    %8 = tpu.matmul %1, %3, %cst {dimension_numbers = #tpu.dot_dimension_numbers<[1], [0], [0], [1], [0, 0, 1, 1], [], []>} : vector<128x8xf32>, vector<8x128xf32>, vector<128x128xf32> -> vector<128x128xf32>
    %cst_11 = arith.constant 0.000000e+00 : f32
    %9 = vector.broadcast %cst_11 : f32 to vector<128x128xf32>
    %10 = arith.maximumf %8, %9 : vector<128x128xf32>
    %11 = tpu.iota {dimensions = array<i32: 1>} : vector<128x128xi32>
    %cst_12 = arith.constant 0.000000e+00 : f32
    %12 = vector.broadcast %cst_12 : f32 to vector<128x128xf32>
    %cst_13 = arith.constant 0.000000e+00 : f32
    %13 = vector.broadcast %cst_13 : f32 to vector<128x1xf32>
    %cst_14 = arith.constant dense<0x7F800000> : vector<128xf32>
    %14 = vector.multi_reduction <minimumf>, %10, %cst_14 [1] : vector<128x128xf32> to vector<128xf32>
    %15 = vector.shape_cast %14 : vector<128xf32> to vector<128x1xf32>
    %16 = vector.broadcast %15 : vector<128x1xf32> to vector<128x128xf32>
    %17 = arith.cmpf oeq, %10, %16 : vector<128x128xf32>
    %c128_i32 = arith.constant 128 : i32
    %18 = vector.broadcast %c128_i32 : i32 to vector<128x128xi32>
    %19 = arith.select %17, %11, %18 : vector<128x128xi1>, vector<128x128xi32>
    %cst_15 = arith.constant dense<2147483647> : vector<128xi32>
    %20 = vector.multi_reduction <minsi>, %19, %cst_15 [1] : vector<128x128xi32> to vector<128xi32>
    %21 = vector.shape_cast %20 : vector<128xi32> to vector<128x1xi32>
    %22 = vector.broadcast %21 : vector<128x1xi32> to vector<128x128xi32>
    %23 = arith.cmpi eq, %11, %22 : vector<128x128xi32>
    %24 = arith.extui %23 : vector<128x128xi1> to vector<128x128xi32>
    %25 = arith.sitofp %24 : vector<128x128xi32> to vector<128x128xf32>
    %cst_16 = arith.constant 9.99999993E-9 : f32
    %26 = vector.broadcast %cst_16 : f32 to vector<128x1xf32>
    %27 = arith.addf %15, %26 : vector<128x1xf32>
    %28 = tpu.reciprocal %27 {approx = true} : vector<128x1xf32> -> vector<128x1xf32>
    %29 = vector.broadcast %28 : vector<128x1xf32> to vector<128x128xf32>
    %30 = arith.mulf %25, %29 : vector<128x128xf32>
    %31 = arith.addf %12, %30 : vector<128x128xf32>
    %32 = arith.addf %13, %28 : vector<128x1xf32>
    %cst_17 = arith.constant 0.000000e+00 : f32
    %33 = vector.broadcast %cst_17 : f32 to vector<128x128xf32>
    %34 = arith.cmpf ogt, %25, %33 : vector<128x128xf32>
    %cst_18 = arith.constant 0x7F800000 : f32
    %35 = vector.broadcast %cst_18 : f32 to vector<128x128xf32>
    %36 = arith.select %34, %35, %10 : vector<128x128xi1>, vector<128x128xf32>
    %cst_19 = arith.constant dense<0x7F800000> : vector<128xf32>
    %37 = vector.multi_reduction <minimumf>, %36, %cst_19 [1] : vector<128x128xf32> to vector<128xf32>
    %38 = vector.shape_cast %37 : vector<128xf32> to vector<128x1xf32>
    %39 = vector.broadcast %38 : vector<128x1xf32> to vector<128x128xf32>
    %40 = arith.cmpf oeq, %36, %39 : vector<128x128xf32>
    %c128_i32_20 = arith.constant 128 : i32
    %41 = vector.broadcast %c128_i32_20 : i32 to vector<128x128xi32>
    %42 = arith.select %40, %11, %41 : vector<128x128xi1>, vector<128x128xi32>
    %cst_21 = arith.constant dense<2147483647> : vector<128xi32>
    %43 = vector.multi_reduction <minsi>, %42, %cst_21 [1] : vector<128x128xi32> to vector<128xi32>
    %44 = vector.shape_cast %43 : vector<128xi32> to vector<128x1xi32>
    %45 = vector.broadcast %44 : vector<128x1xi32> to vector<128x128xi32>
    %46 = arith.cmpi eq, %11, %45 : vector<128x128xi32>
    %47 = arith.extui %46 : vector<128x128xi1> to vector<128x128xi32>
    %48 = arith.sitofp %47 : vector<128x128xi32> to vector<128x128xf32>
    %cst_22 = arith.constant 9.99999993E-9 : f32
    %49 = vector.broadcast %cst_22 : f32 to vector<128x1xf32>
    %50 = arith.addf %38, %49 : vector<128x1xf32>
    %51 = tpu.reciprocal %50 {approx = true} : vector<128x1xf32> -> vector<128x1xf32>
    %52 = vector.broadcast %51 : vector<128x1xf32> to vector<128x128xf32>
    %53 = arith.mulf %48, %52 : vector<128x128xf32>
    %54 = arith.addf %31, %53 : vector<128x128xf32>
    %55 = arith.addf %32, %51 : vector<128x1xf32>
    %cst_23 = arith.constant 0.000000e+00 : f32
    %56 = vector.broadcast %cst_23 : f32 to vector<128x128xf32>
    %57 = arith.cmpf ogt, %48, %56 : vector<128x128xf32>
    %cst_24 = arith.constant 0x7F800000 : f32
    %58 = vector.broadcast %cst_24 : f32 to vector<128x128xf32>
    %59 = arith.select %57, %58, %36 : vector<128x128xi1>, vector<128x128xf32>
    %cst_25 = arith.constant dense<0x7F800000> : vector<128xf32>
    %60 = vector.multi_reduction <minimumf>, %59, %cst_25 [1] : vector<128x128xf32> to vector<128xf32>
    %61 = vector.shape_cast %60 : vector<128xf32> to vector<128x1xf32>
    %62 = vector.broadcast %61 : vector<128x1xf32> to vector<128x128xf32>
    %63 = arith.cmpf oeq, %59, %62 : vector<128x128xf32>
    %c128_i32_26 = arith.constant 128 : i32
    %64 = vector.broadcast %c128_i32_26 : i32 to vector<128x128xi32>
    %65 = arith.select %63, %11, %64 : vector<128x128xi1>, vector<128x128xi32>
    %cst_27 = arith.constant dense<2147483647> : vector<128xi32>
    %66 = vector.multi_reduction <minsi>, %65, %cst_27 [1] : vector<128x128xi32> to vector<128xi32>
    %67 = vector.shape_cast %66 : vector<128xi32> to vector<128x1xi32>
    %68 = vector.broadcast %67 : vector<128x1xi32> to vector<128x128xi32>
    %69 = arith.cmpi eq, %11, %68 : vector<128x128xi32>
    %70 = arith.extui %69 : vector<128x128xi1> to vector<128x128xi32>
    %71 = arith.sitofp %70 : vector<128x128xi32> to vector<128x128xf32>
    %cst_28 = arith.constant 9.99999993E-9 : f32
    %72 = vector.broadcast %cst_28 : f32 to vector<128x1xf32>
    %73 = arith.addf %61, %72 : vector<128x1xf32>
    %74 = tpu.reciprocal %73 {approx = true} : vector<128x1xf32> -> vector<128x1xf32>
    %75 = vector.broadcast %74 : vector<128x1xf32> to vector<128x128xf32>
    %76 = arith.mulf %71, %75 : vector<128x128xf32>
    %77 = arith.addf %54, %76 : vector<128x128xf32>
    %78 = arith.addf %55, %74 : vector<128x1xf32>
    %79 = tpu.reciprocal %78 {approx = true} : vector<128x1xf32> -> vector<128x1xf32>
    %80 = vector.broadcast %79 : vector<128x1xf32> to vector<128x128xf32>
    %81 = arith.mulf %77, %80 : vector<128x128xf32>
    %82 = arith.truncf %81 : vector<128x128xf32> to vector<128x128xbf16>
    %cst_29 = arith.constant dense<0.000000e+00> : vector<128x8xf32>
    %83 = tpu.matmul %82, %7, %cst_29 {dimension_numbers = #tpu.dot_dimension_numbers<[1], [0], [0], [1], [0, 0, 1, 1], [], []>} : vector<128x128xbf16>, vector<128x8xbf16>, vector<128x8xf32> -> vector<128x8xf32>
    %c0_30 = arith.constant 0 : index
    %c0_31 = arith.constant 0 : index
    %84 = vector.load %arg6[%c0_30, %c0_31] : memref<8x32xbf16, #tpu.memory_space<vmem>>, vector<8x32xbf16>
    %cst_32 = arith.constant dense<0.000000e+00> : vector<128x32xf32>
    %85 = tpu.matmul %5, %84, %cst_32 {dimension_numbers = #tpu.dot_dimension_numbers<[1], [0], [0], [1], [0, 0, 1, 1], [], []>} : vector<128x8xbf16>, vector<8x32xbf16>, vector<128x32xf32> -> vector<128x32xf32>
    %86 = arith.truncf %83 : vector<128x8xf32> to vector<128x8xbf16>
    %c0_33 = arith.constant 0 : index
    %c0_34 = arith.constant 0 : index
    %87 = vector.load %arg7[%c0_33, %c0_34] : memref<8x32xbf16, #tpu.memory_space<vmem>>, vector<8x32xbf16>
    %cst_35 = arith.constant dense<0.000000e+00> : vector<128x32xf32>
    %88 = tpu.matmul %86, %87, %cst_35 {dimension_numbers = #tpu.dot_dimension_numbers<[1], [0], [0], [1], [0, 0, 1, 1], [], []>} : vector<128x8xbf16>, vector<8x32xbf16>, vector<128x32xf32> -> vector<128x32xf32>
    %89 = arith.addf %85, %88 : vector<128x32xf32>
    %c0_36 = arith.constant 0 : index
    %c0_37 = arith.constant 0 : index
    %90 = vector.load %arg8[%c0_36, %c0_37] : memref<1x32xf32, #tpu.memory_space<vmem>>, vector<1x32xf32>
    %91 = vector.broadcast %90 : vector<1x32xf32> to vector<128x32xf32>
    %92 = arith.addf %89, %91 : vector<128x32xf32>
    %cst_38 = arith.constant 0.000000e+00 : f32
    %93 = vector.broadcast %cst_38 : f32 to vector<128x32xf32>
    %94 = arith.maximumf %92, %93 : vector<128x32xf32>
    %c0_39 = arith.constant 0 : index
    %c0_40 = arith.constant 0 : index
    %95 = vector.load %arg9[%c0_39, %c0_40] : memref<32x128xbf16, #tpu.memory_space<vmem>>, vector<32x128xbf16>
    %c0_41 = arith.constant 0 : index
    %c0_42 = arith.constant 0 : index
    %96 = vector.load %arg10[%c0_41, %c0_42] : memref<1x128xf32, #tpu.memory_space<vmem>>, vector<1x128xf32>
    %97 = arith.truncf %94 : vector<128x32xf32> to vector<128x32xbf16>
    %cst_43 = arith.constant dense<0.000000e+00> : vector<128x128xf32>
    %98 = tpu.matmul %97, %95, %cst_43 {dimension_numbers = #tpu.dot_dimension_numbers<[1], [0], [0], [1], [0, 0, 1, 1], [], []>} : vector<128x32xbf16>, vector<32x128xbf16>, vector<128x128xf32> -> vector<128x128xf32>
    %99 = vector.broadcast %96 : vector<1x128xf32> to vector<128x128xf32>
    %100 = arith.addf %98, %99 : vector<128x128xf32>
    %cst_44 = arith.constant 0.000000e+00 : f32
    %101 = vector.broadcast %cst_44 : f32 to vector<128x128xf32>
    %102 = arith.maximumf %100, %101 : vector<128x128xf32>
    %103 = tpu.transpose %102, [1, 0] : vector<128x128xf32> -> vector<128x128xf32>
    %c0_45 = arith.constant 0 : index
    %c0_46 = arith.constant 0 : index
    %c0_47 = arith.constant 0 : index
    %104 = vector.load %arg11[%c0_45, %c0_46, %c0_47] : memref<1x128x128xf32, #tpu.memory_space<vmem>>, vector<1x128x128xf32>
    %105 = vector.shape_cast %104 : vector<1x128x128xf32> to vector<128x128xf32>
    %106 = vector.shape_cast %103 : vector<128x128xf32> to vector<1x128x128xf32>
    tpu.vector_store %arg11[%c0_45, %c0_46, %c0_47], %106 {strides = array<i32>} : memref<1x128x128xf32, #tpu.memory_space<vmem>>, vector<1x128x128xf32>,
    return
  }
  func.func @transform_0(%arg0: i32, %arg1: i32) -> (i32, i32, i32) {
    %c0_i32 = arith.constant 0 : i32
    %c0_i32_0 = arith.constant 0 : i32
    return %arg0, %arg1, %c0_i32 : i32, i32, i32
  }
  func.func @transform_1(%arg0: i32, %arg1: i32) -> (i32, i32, i32) {
    %c0_i32 = arith.constant 0 : i32
    %c0_i32_0 = arith.constant 0 : i32
    %c0_i32_1 = arith.constant 0 : i32
    return %arg0, %c0_i32, %c0_i32_0 : i32, i32, i32
  }
  func.func @transform_2(%arg0: i32, %arg1: i32) -> (i32, i32, i32) {
    %c0_i32 = arith.constant 0 : i32
    %c0_i32_0 = arith.constant 0 : i32
    return %arg0, %arg1, %c0_i32 : i32, i32, i32
  }
  func.func @transform_3(%arg0: i32, %arg1: i32) -> (i32, i32, i32) {
    %c0_i32 = arith.constant 0 : i32
    %c0_i32_0 = arith.constant 0 : i32
    %c0_i32_1 = arith.constant 0 : i32
    return %arg0, %c0_i32, %c0_i32_0 : i32, i32, i32
  }
  func.func @transform_4(%arg0: i32, %arg1: i32) -> (i32, i32) {
    %c0_i32 = arith.constant 0 : i32
    %c0_i32_0 = arith.constant 0 : i32
    %c0_i32_1 = arith.constant 0 : i32
    return %c0_i32, %c0_i32_0 : i32, i32
  }
  func.func @transform_5(%arg0: i32, %arg1: i32) -> (i32, i32) {
    %c0_i32 = arith.constant 0 : i32
    %c0_i32_0 = arith.constant 0 : i32
    %c0_i32_1 = arith.constant 0 : i32
    return %c0_i32, %c0_i32_0 : i32, i32
  }
  func.func @transform_6(%arg0: i32, %arg1: i32) -> (i32, i32) {
    %c0_i32 = arith.constant 0 : i32
    %c0_i32_0 = arith.constant 0 : i32
    %c0_i32_1 = arith.constant 0 : i32
    return %c0_i32, %c0_i32_0 : i32, i32
  }
  func.func @transform_7(%arg0: i32, %arg1: i32) -> (i32, i32) {
    %c0_i32 = arith.constant 0 : i32
    %c0_i32_0 = arith.constant 0 : i32
    %c0_i32_1 = arith.constant 0 : i32
    return %c0_i32, %c0_i32_0 : i32, i32
  }
  func.func @transform_8(%arg0: i32, %arg1: i32) -> (i32, i32) {
    %c0_i32 = arith.constant 0 : i32
    %c0_i32_0 = arith.constant 0 : i32
    %c0_i32_1 = arith.constant 0 : i32
    return %c0_i32, %c0_i32_0 : i32, i32
  }
  func.func @transform_9(%arg0: i32, %arg1: i32) -> (i32, i32, i32) {
    %c0_i32 = arith.constant 0 : i32
    %c0_i32_0 = arith.constant 0 : i32
    return %arg0, %c0_i32, %arg1 : i32, i32, i32
  }
}

</mosaic_0001>

<bundles_post_ra>
// kernel: tpu_custom_call.1
= control target key start
LH: loop header
LB: loop body
LE: loop exit
PB: predicated region body
PF: predicated region fallthrough
CT: control target
= control target key end

     0   :  { %14 = vsyncpa [#allocation3], 0  ;;  %s5300_s0 = inlined_call_operand.vmem [shape: f32[2,128,8], index: 0, kind: input, shape index: {}]   ;;  %s5301_s1 = inlined_call_operand.vmem [shape: f32[2,8,128], index: 1, kind: input, shape index: {}]   ;;  %s5302_s2 = inlined_call_operand.vmem [shape: bf16[2,128,8], index: 2, kind: input, shape index: {}]   ;;  %s5303_s3 = inlined_call_operand.vmem [shape: bf16[2,128,8], index: 3, kind: input, shape index: {}]   ;;  %s5304_s4 = inlined_call_operand.vmem [shape: bf16[8,32], index: 4, kind: input, shape index: {}]   ;;  %s5305_s5 = inlined_call_operand.vmem [shape: bf16[8,32], index: 5, kind: input, shape index: {}]   ;;  %s5306_s6 = inlined_call_operand.vmem [shape: f32[1,32], index: 6, kind: input, shape index: {}]   ;;  %s5307_s7 = inlined_call_operand.vmem [shape: bf16[32,128], index: 7, kind: input, shape index: {}]   ;;  %s5308_s8 = inlined_call_operand.vmem [shape: f32[1,128], index: 8, kind: input, shape index: {}]   ;;  %s5309_s9 = inlined_call_operand.hbm [shape: f32[2,128,128], index: 9, kind: output, shape index: {}]  }
   0x1   :  { %16 = vsyncpa [#allocation3 + $0x1], 0  ;;  %s3544_s30 = smov 0   ;;  %s3546_s10 = smov 0  }
   0x2   :  { %s3548_s11 = smov 0   ;;  %s3550_s12 = smov 0  }
   0x3   :  { %s3552_s13 = smov 0   ;;  %s3554_s14 = smov 0  }
   0x4 LB: > { %s2883_s15 = sadd.s32 4294967295, %s3488_s14   ;;  %s2884_s16 = sadd.s32 4294967294, %s3488_s14   ;;  %s3488_s14 = sphi %s3554_s14, %s22_s14   ;;  %s3484_s13 = sphi %s3552_s13, %s5556_s13   ;;  %s3480_s12 = sphi %s3550_s12, %s5555_s12   ;;  %s3476_s11 = sphi %s3548_s11, %s5554_s11   ;;  %s3472_s10 = sphi %s3546_s10, %s5553_s10   ;;  %s3468_s30 = sphi %s3544_s30, %s5552_s30  }
   0x5   : > { %s34_s17 = sadd.s32 1, %s3484_s13  ;;  %s256_s18 = sadd.s32 1, %s3476_s11 }
   0x6   : > { %p36_p0 = scmp.ge.s32.totalorder %s34_s17, 2  ;;  %p266_p1 = scmp.ne.s32.totalorder %s3476_s11, %s3472_s10 }
   0x7   : > { %p267_p2 = scmp.eq.s32.totalorder %s2883_s15, 1  ;;  %p272_p3 = scmp.ne.s32.totalorder %s3472_s10, %s3468_s30 }
   0x8   : > { %s5558_s17 = smov (%p36_p0, %s34_s17), 0  ;;  %p273_p5 = scmp.eq.s32.totalorder %s2884_s16, 1 }
   0x9   : > { %p3584_p4 = por %p267_p2, %p266_p1  ;;  %s251_s20 = ssub.s32 %s3484_s13, %s5558_s17 }
   0xa   : > { %p2887_p6 = scmp.ge.s32.totalorder %s3488_s14, 1  ;;  %p254_p7 = scmp.eq.s32.totalorder %s251_s20, 0 }
   0xb   : > { %p3591_p8 = por %p273_p5, %p272_p3  ;;  %p347_p9 = scmp.lt.s32.totalorder %s3488_s14, 3 }
   0xc   : > { %s3597_s22 = scalar_select %p254_p7, %s3476_s11, %s256_s18  }
   0xd   : > { %p348_p10 = pnand %p2887_p6, %p347_p9 }
   0xf   : > { %351 = sbr.rel (%p348_p10) target bundleno = 2484 (0x9b4), region = 56 }
  0x16   : > { %p406_p11 = scmp.lt.s32.totalorder %s3480_s12, 1  ;;  %vm484_vm0 = vcmask 64512   ;;  %v694_v49 = vlaneseq  ;;  %s402_s29 = sand.u32 1, %s3472_s10  }
  0x17   : > { %s2888_s15 = sshll.u32 %s402_s29, 7 }
  0x18   : > { %s407_s23 = scalar_select %p406_p11, %s3480_s12, 1  ;;  %v3699_v50 = vand.u32 127, %v694_v49 }
  0x1a   : > { %s3009_s24 = sshll.u32 %s407_s23, 7  ;;  %s2891_s25 = sshll.u32 %s407_s23, 3  ;;  %5383 = vst [vmem:[#allocation5_spill] sm:$0xff] %v3699_v50 }
  0x1b   : > { %s3604_s28 = scalar_lea.vmem %s5300_s0, %s3009_s24  ;;  %s418_s16 = scalar_lea.vmem %s5301_s1, %s2891_s25 }
  0x1c   : > { %v451_v0 = vld [vmem:[%s418_s16] sm:$0xff]  ;;  %v436_v2 = vld [vmem:[%s3604_s28 + $0x8] sm:$0xff]  ;;  %s3010_s18 = sshll.u32 %s407_s23, 6  ;;  %v437_v3 = vld [vmem:[%s3604_s28 + $0x10] sm:$0xff]  ;;  %s5225_s16 = scalar_lea.vmem [#allocation2], %s2888_s15 }
  0x1d   : > { %v435_v1 = vld [vmem:[%s3604_s28] sm:$0xff]  ;;  %3074 = vmatprep.subr.mxu0 %v451_v0  ;;  %s3617_s26 = scalar_lea.vmem %s5303_s3, %s3010_s18  ;;  %v438_v4 = vld [vmem:[%s3604_s28 + $0x18] sm:$0xff]  ;;  %v440_v6 = vld [vmem:[%s3604_s28 + $0x28] sm:$0xff]  ;;  %s3629_s27 = scalar_lea.vmem %s5302_s2, %s3010_s18 }
  0x1e   : > { %3076 = vmatprep.mubr.msk.f32.mxu0 %vm484_vm0, %v435_v1  ;;  %3075 = vmatpush3.msra.mxu0 %v451_v0  ;;  %v439_v5 = vld [vmem:[%s3604_s28 + $0x20] sm:$0xff]  ;;  %v441_v7 = vld [vmem:[%s3604_s28 + $0x30] sm:$0xff]  ;;  %v442_v8 = vld [vmem:[%s3604_s28 + $0x38] sm:$0xff]  ;;  %s3012_s18 = sshll.u32 %s3480_s12, 11  ;;  %s2763_s20 = sshll.u32 %s5225_s16, 4  ;;  %s5249_s20 = int_to_ptr.vmem [resolvable:$true] %s2763_s20 }
  0x1f   : > { %3077 = vmatmul.mubr.msk.f32.vlgmr.msra.gmra.mrb[0].mxu0 %vm484_vm0, %v436_v2  ;;  %v443_v9 = vld [vmem:[%s3604_s28 + $0x40] sm:$0xff]  ;;  %v444_v10 = vld [vmem:[%s3604_s28 + $0x48] sm:$0xff]  ;;  %v445_v11 = vld [vmem:[%s3604_s28 + $0x50] sm:$0xff]  ;;  %s5247_s23 = scalar_lea.hbm %s5309_s9, %s3012_s18  ;;  %s5254_s25 = scalar_lea.sflag [#allocation3], %s402_s29 }
  0x20   : > { %3079 = vmatprep.mubr.msk.f32.mxu0 %vm484_vm0, %v437_v3  ;;  %v446_v12 = vld [vmem:[%s3604_s28 + $0x58] sm:$0xff]  ;;  %v447_v13 = vld [vmem:[%s3604_s28 + $0x60] sm:$0xff]  ;;  %v448_v14 = vld [vmem:[%s3604_s28 + $0x68] sm:$0xff]  ;;  %s3491_s12 = smov [#allocation2]  }
  0x21   : > { %v449_v15 = vld [vmem:[%s3604_s28 + $0x70] sm:$0xff]  ;;  %v450_v16 = vld [vmem:[%s3604_s28 + $0x78] sm:$0xff]  ;;  %s3414_s28 = sshll.u32 %s3491_s12, 4  ;;  %s3415_s28 = int_to_ptr.vmem [resolvable:$false] %s3414_s28 }
  0x22   : > { %s3416_s15 = scalar_lea.vmem %s3415_s28, 4096  ;;  %p3417_p1 = scmp.lt.s32.totalorder %s5249_s20, %s3415_s28 }
  0x23   : > { %3080 = vmatmul.mubr.msk.f32.gmra.mrb[2].mxu0 %vm484_vm0, %v438_v4 }
  0x24   : > { %3082 = vmatprep.mubr.msk.f32.mxu0 %vm484_vm0, %v439_v5 }
  0x27   : > { %3083 = vmatmul.mubr.msk.f32.gmra.mrb[4].mxu0 %vm484_vm0, %v440_v6 }
  0x28   : > { %3085 = vmatprep.mubr.msk.f32.mxu0 %vm484_vm0, %v441_v7 }
  0x2b   : > { %3086 = vmatmul.mubr.msk.f32.gmra.mrb[6].mxu0 %vm484_vm0, %v442_v8 }
  0x2c   : > { %3088 = vmatprep.mubr.msk.f32.mxu0 %vm484_vm0, %v443_v9 }
  0x2f   : > { %3089 = vmatmul.mubr.msk.f32.gmra.mrb[8].mxu0 %vm484_vm0, %v444_v10 }
  0x30   : > { %3091 = vmatprep.mubr.msk.f32.mxu0 %vm484_vm0, %v445_v11 }
  0x33   : > { %3092 = vmatmul.mubr.msk.f32.gmra.mrb[10].mxu0 %vm484_vm0, %v446_v12 }
  0x34   : > { %3094 = vmatprep.mubr.msk.f32.mxu0 %vm484_vm0, %v447_v13 }
  0x37   : > { %3095 = vmatmul.mubr.msk.f32.gmra.mrb[12].mxu0 %vm484_vm0, %v448_v14 }
  0x38   : > { %3097 = vmatprep.mubr.msk.f32.mxu0 %vm484_vm0, %v449_v15 }
  0x3b   : > { %3098 = vmatmul.mubr.msk.f32.gmra.mrb[14].mxu0 %vm484_vm0, %v450_v16 }
  0xf2   : > { %v3078_v17 = vpop.f32.mrb[0].mxu0 }
  0xf3   : > { %v599_v18 = vpop.f32.mrb[1].mxu0  ;;  %v3656_v23 = vmax.f32 %v3078_v17, 0.0 }
  0xf4   : > { %v3651_v19 = vmax.f32 %v599_v18, 0.0 }
  0xf6   : > { %696 = vmin.xlane.f32.xlu0 %v3651_v19  ;;  %v3081_v20 = vpop.f32.mrb[2].mxu0 }
  0xf7   : > { %v3654_v21 = vmax.f32 %v3081_v20, 0.0  ;;  %v609_v22 = vpop.f32.mrb[3].mxu0 }
  0xf8   : > { %v3660_v25 = vmax.f32 %v609_v22, 0.0 }
  0xf9   : > { %702 = vmin.xlane.f32.xlu1 %v3654_v21 }
  0xfa   : > { %698 = vmin.xlane.f32.xlu0 %v3656_v23  ;;  %v3084_v24 = vpop.f32.mrb[4].mxu0 }
  0xfb   : > { %v619_v26 = vpop.f32.mrb[5].mxu0  ;;  %v3664_v28 = vmax.f32 %v3084_v24, 0.0 }
  0xfc   : > { %v3662_v27 = vmax.f32 %v619_v26, 0.0 }
  0xfd   : > { %700 = vmin.xlane.f32.xlu1 %v3660_v25 }
  0xfe   : > { %704 = vmin.xlane.f32.xlu0 %v3662_v27  ;;  %v3087_v29 = vpop.f32.mrb[6].mxu0 }
  0xff   : > { %v629_v30 = vpop.f32.mrb[7].mxu0  ;;  %v3670_v32 = vmax.f32 %v3087_v29, 0.0 }
 0x100   : > { %v3668_v31 = vmax.f32 %v629_v30, 0.0 }
 0x101   : > { %706 = vmin.xlane.f32.xlu1 %v3664_v28 }
 0x102   : > { %708 = vmin.xlane.f32.xlu0 %v3668_v31  ;;  %v3090_v33 = vpop.f32.mrb[8].mxu0 }
 0x103   : > { %v639_v34 = vpop.f32.mrb[9].mxu0  ;;  %v3676_v36 = vmax.f32 %v3090_v33, 0.0 }
 0x104   : > { %v3674_v35 = vmax.f32 %v639_v34, 0.0 }
 0x105   : > { %710 = vmin.xlane.f32.xlu1 %v3670_v32 }
 0x106   : > { %712 = vmin.xlane.f32.xlu0 %v3674_v35  ;;  %v3093_v37 = vpop.f32.mrb[10].mxu0 }
 0x107   : > { %v649_v38 = vpop.f32.mrb[11].mxu0  ;;  %v3682_v40 = vmax.f32 %v3093_v37, 0.0 }
 0x108   : > { %v3680_v39 = vmax.f32 %v649_v38, 0.0 }
 0x109   : > { %714 = vmin.xlane.f32.xlu1 %v3676_v36 }
 0x10a   : > { %716 = vmin.xlane.f32.xlu0 %v3680_v39  ;;  %v3096_v41 = vpop.f32.mrb[12].mxu0 }
 0x10b   : > { %v659_v42 = vpop.f32.mrb[13].mxu0  ;;  %v3688_v44 = vmax.f32 %v3096_v41, 0.0 }
 0x10c   : > { %v3686_v43 = vmax.f32 %v659_v42, 0.0 }
 0x10d   : > { %718 = vmin.xlane.f32.xlu1 %v3682_v40 }
 0x10e   : > { %720 = vmin.xlane.f32.xlu0 %v3686_v43  ;;  %v3099_v45 = vpop.f32.mrb[14].mxu0 }
 0x10f   : > { %v669_v46 = vpop.f32.mrb[15].mxu0  ;;  %v3694_v48 = vmax.f32 %v3099_v45, 0.0 }
 0x110   : > { %v3692_v47 = vmax.f32 %v669_v46, 0.0 }
 0x111   : > { %722 = vmin.xlane.f32.xlu1 %v3688_v44 }
 0x112   : > { %724 = vmin.xlane.f32.xlu0 %v3692_v47 }
 0x115   : > { %726 = vmin.xlane.f32.xlu1 %v3694_v48 }
 0x183   : > { %v3701_v51 = vpop.xlane.xlu0 %696 }
 0x184   : > { %vm728_vm1 = vcmp.eq.f32.partialorder %v3651_v19, %v3701_v51 }
 0x185   : > { %v3706_v52 = vsel %vm728_vm1, %v3699_v50, 128 }
 0x186   : > { %v3708_v53 = vpop.xlane.xlu1 %702  ;;  %v761_v54 = vshra.s32 %v3706_v52, 16 }
 0x187   : > { %vm731_vm2 = vcmp.eq.f32.partialorder %v3654_v21, %v3708_v53  ;;  %v3713_v55 = vpop.xlane.xlu0 %698 }
 0x188   : > { %vm729_vm3 = vcmp.eq.f32.partialorder %v3656_v23, %v3713_v55  ;;  %v3717_v56 = vcvt.s32.f32 %v761_v54  ;;  %v3723_v58 = vsel %vm731_vm2, %v3699_v50, 128 }
 0x189   : > { %v3720_v57 = vsel %vm729_vm3, %v3699_v50, 128  ;;  %v803_v0 = vshra.s32 %v3723_v58, 16 }
 0x18a   : > { %v3725_v59 = vpop.xlane.xlu1 %700  ;;  %764 = vmin.xlane.f32.xlu0 %v3717_v56  ;;  %v775_v60 = vshra.s32 %v3720_v57, 16 }
 0x18b   : > { %vm730_vm4 = vcmp.eq.f32.partialorder %v3660_v25, %v3725_v59  ;;  %v3731_v61 = vpop.xlane.xlu0 %704  ;;  %v3757_v7 = vcvt.s32.f32 %v803_v0 }
 0x18c   : > { %vm732_vm5 = vcmp.eq.f32.partialorder %v3662_v27, %v3731_v61  ;;  %v3735_v62 = vcvt.s32.f32 %v775_v60  ;;  %v3738_v63 = vsel %vm730_vm4, %v3699_v50, 128 }
 0x18d   : > { %v789_v1 = vshra.s32 %v3738_v63, 16  ;;  %v3743_v2 = vsel %vm732_vm5, %v3699_v50, 128 }
 0x18e   : > { %v3745_v3 = vpop.xlane.xlu1 %706  ;;  %778 = vmin.xlane.f32.xlu1 %v3735_v62  ;;  %v817_v6 = vshra.s32 %v3743_v2, 16 }
 0x18f   : > { %5384 = vst [vmem:[#allocation6_spill] sm:$0xff] %v3745_v3  ;;  %vm733_vm6 = vcmp.eq.f32.partialorder %v3664_v28, %v3745_v3  ;;  %v3750_v4 = vpop.xlane.xlu0 %708  ;;  %v3752_v5 = vcvt.s32.f32 %v789_v1  ;;  %v816_v3 = vand.u32 65535, %v3743_v2 }
 0x190   : > { %5385 = vst [vmem:[#allocation7_spill] sm:$0xff] %v3750_v4  ;;  %vm734_vm7 = vcmp.eq.f32.partialorder %v3668_v31, %v3750_v4  ;;  %v3760_v8 = vsel %vm733_vm6, %v3699_v50, 128  ;;  %v3774_v13 = vcvt.s32.f32 %v817_v6  ;;  %v802_v4 = vand.u32 65535, %v3723_v58 }
 0x191   : > { %792 = vmin.xlane.f32.xlu0 %v3752_v5  ;;  %v831_v9 = vshra.s32 %v3760_v8, 16  ;;  %v3765_v10 = vsel %vm734_vm7, %v3699_v50, 128 }
 0x192   : > { %v3767_v11 = vpop.xlane.xlu1 %710  ;;  %806 = vmin.xlane.f32.xlu1 %v3757_v7  ;;  %v845_v15 = vshra.s32 %v3765_v10, 16  ;;  %v844_v2 = vand.u32 65535, %v3765_v10 }
 0x193   : > { %5386 = vst [vmem:[#allocation8_spill] sm:$0xff] %v3767_v11  ;;  %vm735_vm8 = vcmp.eq.f32.partialorder %v3670_v32, %v3767_v11  ;;  %v3772_v12 = vpop.xlane.xlu0 %712  ;;  %v3776_v14 = vcvt.s32.f32 %v831_v9 }
 0x194   : > { %5387 = vst [vmem:[#allocation9_spill] sm:$0xff] %v3772_v12  ;;  %vm736_vm9 = vcmp.eq.f32.partialorder %v3674_v35, %v3772_v12  ;;  %v3782_v16 = vsel %vm735_vm8, %v3699_v50, 128  ;;  %v3796_v24 = vcvt.s32.f32 %v845_v15 }
 0x195   : > { %820 = vmin.xlane.f32.xlu0 %v3774_v13  ;;  %v859_v17 = vshra.s32 %v3782_v16, 16  ;;  %v3787_v18 = vsel %vm736_vm9, %v3699_v50, 128 }
 0x196   : > { %v3789_v20 = vpop.xlane.xlu1 %714  ;;  %834 = vmin.xlane.f32.xlu1 %v3776_v14  ;;  %v873_v29 = vshra.s32 %v3787_v18, 16  ;;  %v872_v10 = vand.u32 65535, %v3787_v18 }
 0x197   : > { %5388 = vst [vmem:[#allocation10_spill] sm:$0xff] %v3789_v20  ;;  %vm737_vm10 = vcmp.eq.f32.partialorder %v3676_v36, %v3789_v20  ;;  %v3794_v22 = vpop.xlane.xlu0 %716  ;;  %v3798_v26 = vcvt.s32.f32 %v859_v17  ;;  %v774_v20 = vand.u32 65535, %v3720_v57 }
 0x198   : > { %5389 = vst [vmem:[#allocation11_spill] sm:$0xff] %v3794_v22  ;;  %vm738_vm11 = vcmp.eq.f32.partialorder %v3680_v39, %v3794_v22  ;;  %v3804_v30 = vsel %vm737_vm10, %v3699_v50, 128  ;;  %v3818_v41 = vcvt.s32.f32 %v873_v29 }
 0x199   : > { %848 = vmin.xlane.f32.xlu0 %v3796_v24  ;;  %v887_v33 = vshra.s32 %v3804_v30, 16  ;;  %v3809_v34 = vsel %vm738_vm11, %v3699_v50, 128  ;;  %v776_v11 = vcvt.s32.f32 %v774_v20 }
 0x19a   : > { %v3811_v37 = vpop.xlane.xlu1 %718  ;;  %862 = vmin.xlane.f32.xlu1 %v3798_v26  ;;  %v901_v45 = vshra.s32 %v3809_v34, 16  ;;  %v900_v18 = vand.u32 65535, %v3809_v34 }
 0x19b   : > { %5390 = vst [vmem:[#allocation12_spill] sm:$0xff] %v3811_v37  ;;  %vm739_vm12 = vcmp.eq.f32.partialorder %v3682_v40, %v3811_v37  ;;  %v3816_v38 = vpop.xlane.xlu0 %720  ;;  %v3820_v42 = vcvt.s32.f32 %v887_v33 }
 0x19c   : > { %5391 = vst [vmem:[#allocation13_spill] sm:$0xff] %v3816_v38  ;;  %vm740_vm13 = vcmp.eq.f32.partialorder %v3686_v43, %v3816_v38  ;;  %v3826_v46 = vsel %vm739_vm12, %v3699_v50, 128  ;;  %v3840_v1 = vcvt.s32.f32 %v901_v45 }
 0x19d   : > { %876 = vmin.xlane.f32.xlu0 %v3818_v41  ;;  %v915_v49 = vshra.s32 %v3826_v46, 16  ;;  %v3831_v54 = vsel %vm740_vm13, %v3699_v50, 128 }
 0x19e   : > { %v3833_v60 = vpop.xlane.xlu1 %722  ;;  %890 = vmin.xlane.f32.xlu1 %v3820_v42  ;;  %v929_v9 = vshra.s32 %v3831_v54, 16  ;;  %v928_v34 = vand.u32 65535, %v3831_v54 }
 0x19f   : > { %5392 = vst [vmem:[#allocation14_spill] sm:$0xff] %v3833_v60  ;;  %vm741_vm14 = vcmp.eq.f32.partialorder %v3688_v44, %v3833_v60  ;;  %v3838_v0 = vpop.xlane.xlu0 %724  ;;  %v3842_v6 = vcvt.s32.f32 %v915_v49 }
 0x1a0   : > { %5393 = vst [vmem:[#allocation15_spill] sm:$0xff] %v3838_v0  ;;  %vm742_vm15 = vcmp.eq.f32.partialorder %v3692_v47, %v3838_v0  ;;  %v3848_v15 = vsel %vm741_vm14, %v3699_v50, 128  ;;  %v3860_v45 = vcvt.s32.f32 %v929_v9  ;;  %v760_v9 = vand.u32 65535, %v3706_v52 }
 0x1a1   : > { %904 = vmin.xlane.f32.xlu0 %v3840_v1  ;;  %v943_v17 = vshra.s32 %v3848_v15, 16  ;;  %v3853_v29 = vsel %vm742_vm15, %v3699_v50, 128 }
 0x1a2   : > { %918 = vmin.xlane.f32.xlu1 %v3842_v6  ;;  %v3856_v33 = vpop.xlane.xlu1 %726  ;;  %v957_v0 = vshra.s32 %v3853_v29, 16  ;;  %v956_v54 = vand.u32 65535, %v3853_v29 }
 0x1a3   : > { %5394 = vst [vmem:[#allocation16_spill] sm:$0xff] %v3856_v33  ;;  %vm743_vm1 = vcmp.eq.f32.partialorder %v3694_v48, %v3856_v33  ;;  %v3862_v49 = vcvt.s32.f32 %v943_v17  ;;  %v762_v33 = vcvt.s32.f32 %v760_v9 }
 0x1a4   : > { %v3866_v60 = vsel %vm743_vm1, %v3699_v50, 128  ;;  %v3871_v37 = vcvt.s32.f32 %v957_v0  ;;  %v788_v0 = vand.u32 65535, %v3738_v63  ;;  %v804_v63 = vcvt.s32.f32 %v802_v4 }
 0x1a5   : > { %932 = vmin.xlane.f32.xlu0 %v3860_v45  ;;  %v971_v38 = vshra.s32 %v3866_v60, 16 }
 0x1a6   : > { %946 = vmin.xlane.f32.xlu1 %v3862_v49  ;;  %v790_v57 = vcvt.s32.f32 %v788_v0 }
 0x1a7   : > { %v3873_v22 = vcvt.s32.f32 %v971_v38 }
 0x1a9   : > { %960 = vmin.xlane.f32.xlu0 %v3871_v37 }
 0x1aa   : > { %974 = vmin.xlane.f32.xlu1 %v3873_v22 }
 0x217   : > { %v3878_v17 = vpop.xlane.xlu0 %764 }
 0x218   : > { %vm766_vm2 = vcmp.eq.f32.partialorder %v3717_v56, %v3878_v17 }
 0x219   : > { %v767_v12 = vsel %vm766_vm2, %v762_v33, inf }
 0x21a   : > { %768 = vmin.xlane.f32.xlu0 %v767_v12  ;;  %v830_v12 = vand.u32 65535, %v3760_v8 }
 0x21b   : > { %v3884_v38 = vpop.xlane.xlu1 %778 }
 0x21c   : > { %vm780_vm3 = vcmp.eq.f32.partialorder %v3735_v62, %v3884_v38  ;;  %v832_v4 = vcvt.s32.f32 %v830_v12  ;;  %v874_v12 = vcvt.s32.f32 %v872_v10 }
 0x21d   : > { %v781_v52 = vsel %vm780_vm3, %v776_v11, inf  ;;  %v818_v11 = vcvt.s32.f32 %v816_v3  ;;  %v846_v3 = vcvt.s32.f32 %v844_v2  ;;  %v902_v2 = vcvt.s32.f32 %v900_v18 }
 0x21e   : > { %782 = vmin.xlane.f32.xlu1 %v781_v52  ;;  %v3889_v9 = vpop.xlane.xlu0 %792  ;;  %v785_v18 = vcvt.f32.s32 %v3884_v38 }
 0x21f   : > { %v3892_v56 = vpop.xlane.xlu1 %806  ;;  %vm794_vm4 = vcmp.eq.f32.partialorder %v3752_v5, %v3889_v9  ;;  %v858_v5 = vand.u32 65535, %v3782_v16  ;;  %v886_v16 = vand.u32 65535, %v3804_v30  ;;  %v914_v30 = vand.u32 65535, %v3826_v46 }
 0x220   : > { %v795_v20 = vsel %vm794_vm4, %v790_v57, inf  ;;  %vm808_vm5 = vcmp.eq.f32.partialorder %v3757_v7, %v3892_v56  ;;  %v942_v46 = vand.u32 65535, %v3848_v15  ;;  %v970_v15 = vand.u32 65535, %v3866_v60 }
 0x221   : > { %796 = vmin.xlane.f32.xlu0 %v795_v20  ;;  %v809_v58 = vsel %vm808_vm5, %v804_v63, inf }
 0x222   : > { %810 = vmin.xlane.f32.xlu1 %v809_v58  ;;  %v3899_v62 = vpop.xlane.xlu0 %820  ;;  %v972_v29 = vcvt.s32.f32 %v970_v15 }
 0x223   : > { %v3902_v33 = vpop.xlane.xlu1 %834  ;;  %vm822_vm6 = vcmp.eq.f32.partialorder %v3774_v13, %v3899_v62  ;;  %v860_v13 = vcvt.s32.f32 %v858_v5 }
 0x224   : > { %v823_v8 = vsel %vm822_vm6, %v818_v11, inf  ;;  %vm836_vm7 = vcmp.eq.f32.partialorder %v3776_v14, %v3902_v33 }
 0x225   : > { %824 = vmin.xlane.f32.xlu0 %v823_v8  ;;  %v837_v7 = vsel %vm836_vm7, %v832_v4, inf }
 0x226   : > { %838 = vmin.xlane.f32.xlu1 %v837_v7  ;;  %v3909_v0 = vpop.xlane.xlu0 %848  ;;  %v930_v7 = vcvt.s32.f32 %v928_v34 }
 0x227   : > { %v3912_v52 = vpop.xlane.xlu1 %862  ;;  %vm850_vm8 = vcmp.eq.f32.partialorder %v3796_v24, %v3909_v0  ;;  %v888_v24 = vcvt.s32.f32 %v886_v16  ;;  %v958_v16 = vcvt.s32.f32 %v956_v54 }
 0x228   : > { %v851_v57 = vsel %vm850_vm8, %v846_v3, inf  ;;  %vm864_vm9 = vcmp.eq.f32.partialorder %v3798_v26, %v3912_v52 }
 0x229   : > { %852 = vmin.xlane.f32.xlu0 %v851_v57  ;;  %v865_v14 = vsel %vm864_vm9, %v860_v13, inf }
 0x22a   : > { %866 = vmin.xlane.f32.xlu1 %v865_v14  ;;  %v3919_v63 = vpop.xlane.xlu0 %876 }
 0x22b   : > { %v3922_v20 = vpop.xlane.xlu1 %890  ;;  %vm878_vm10 = vcmp.eq.f32.partialorder %v3818_v41, %v3919_v63  ;;  %v916_v41 = vcvt.s32.f32 %v914_v30 }
 0x22c   : > { %v879_v58 = vsel %vm878_vm10, %v874_v12, inf  ;;  %vm892_vm11 = vcmp.eq.f32.partialorder %v3820_v42, %v3922_v20 }
 0x22d   : > { %880 = vmin.xlane.f32.xlu0 %v879_v58  ;;  %v893_v26 = vsel %vm892_vm11, %v888_v24, inf  ;;  %v799_v58 = vcvt.f32.s32 %v3889_v9 }
 0x22e   : > { %894 = vmin.xlane.f32.xlu1 %v893_v26  ;;  %v3929_v11 = vpop.xlane.xlu0 %904 }
 0x22f   : > { %v3932_v4 = vpop.xlane.xlu1 %918  ;;  %vm906_vm12 = vcmp.eq.f32.partialorder %v3840_v1, %v3929_v11  ;;  %v944_v1 = vcvt.s32.f32 %v942_v46  ;;  %v841_v46 = vcvt.f32.s32 %v3902_v33  ;;  %v800_v9 = vshll.u32 %v799_v58, 16 }
 0x230   : > { %v907_v5 = vsel %vm906_vm12, %v902_v2, inf  ;;  %vm920_vm13 = vcmp.eq.f32.partialorder %v3842_v6, %v3932_v4  ;;  %v813_v2 = vcvt.f32.s32 %v3892_v56 }
 0x231   : > { %908 = vmin.xlane.f32.xlu0 %v907_v5  ;;  %v921_v42 = vsel %vm920_vm13, %v916_v41, inf }
 0x232   : > { %922 = vmin.xlane.f32.xlu1 %v921_v42  ;;  %v3939_v8 = vpop.xlane.xlu0 %932  ;;  %v814_v54 = vshll.u32 %v813_v2, 16 }
 0x233   : > { %v3942_v3 = vpop.xlane.xlu1 %946  ;;  %vm934_vm14 = vcmp.eq.f32.partialorder %v3860_v45, %v3939_v8 }
 0x234   : > { %v935_v10 = vsel %vm934_vm14, %v930_v7, inf  ;;  %vm948_vm15 = vcmp.eq.f32.partialorder %v3862_v49, %v3942_v3  ;;  %v771_v49 = vcvt.f32.s32 %v3878_v17  ;;  %v827_v17 = vcvt.f32.s32 %v3899_v62 }
 0x235   : > { %936 = vmin.xlane.f32.xlu0 %v935_v10  ;;  %v949_v6 = vsel %vm948_vm15, %v944_v1, inf  ;;  %v842_v10 = vshll.u32 %v841_v46, 16 }
 0x236   : > { %950 = vmin.xlane.f32.xlu1 %v949_v6  ;;  %v3949_v13 = vpop.xlane.xlu0 %960  ;;  %v772_v12 = vshll.u32 %v771_v49, 16  ;;  %v828_v33 = vshll.u32 %v827_v17, 16  ;;  %v869_v49 = vcvt.f32.s32 %v3912_v52 }
 0x237   : > { %v3951_v57 = vpop.xlane.xlu1 %974  ;;  %vm962_vm1 = vcmp.eq.f32.partialorder %v3871_v37, %v3949_v13  ;;  %v786_v37 = vshll.u32 %v785_v18, 16  ;;  %v883_v18 = vcvt.f32.s32 %v3919_v63 }
 0x238   : > { %v963_v45 = vsel %vm962_vm1, %v958_v16, inf  ;;  %vm976_vm2 = vcmp.eq.f32.partialorder %v3873_v22, %v3951_v57  ;;  %v5321_v22 = vmov 0.0  }
 0x239   : > { %964 = vmin.xlane.f32.xlu0 %v963_v45  ;;  %v977_v60 = vsel %vm976_vm2, %v972_v29, inf  ;;  %v855_v29 = vcvt.f32.s32 %v3909_v0 }
 0x23a   : > { %978 = vmin.xlane.f32.xlu1 %v977_v60 }
 0x2a7   : > { %v769_v14 = vpop.xlane.xlu0 %768 }
 0x2a8   : > { %v770_v24 = vcvt.f32.s32 %v769_v14 }
 0x2aa   : > { %v773_v30 = vadd.s32 %v772_v12, %v770_v24  ;;  %v897_v24 = vcvt.f32.s32 %v3922_v20 }
 0x2ab   : > { %v783_v26 = vpop.xlane.xlu1 %782 }
 0x2ac   : > { %v784_v34 = vcvt.f32.s32 %v783_v26  ;;  %vm984_vm3 = vcmp.eq.s32.totalorder %v3699_v50, %v773_v30  ;;  %v856_v26 = vshll.u32 %v855_v29, 16 }
 0x2ad   : > { %v3963_v41 = vsel %vm984_vm3, 1.0, %v5321_v22 }
 0x2ae   : > { %v787_v38 = vadd.s32 %v786_v37, %v784_v34  ;;  %v797_v5 = vpop.xlane.xlu0 %796  ;;  %vm1112_vm4 = vcmp.gt.f32.partialorder %v3963_v41, 0.0  ;;  %v870_v34 = vshll.u32 %v869_v49, 16 }
 0x2af   : > { %v798_v42 = vcvt.f32.s32 %v797_v5  ;;  %v811_v7 = vpop.xlane.xlu1 %810  ;;  %v3969_v56 = vsel %vm1112_vm4, inf, %v3651_v19 }
 0x2b0   : > { %5395 = vst [vmem:[#allocation17_spill] sm:$0xff] %v3969_v56  ;;  %v812_v1 = vcvt.f32.s32 %v811_v7  ;;  %1144 = vmin.xlane.f32.xlu0 %v3969_v56  ;;  %vm985_vm5 = vcmp.eq.s32.totalorder %v3699_v50, %v787_v38  ;;  %v911_v7 = vcvt.f32.s32 %v3929_v11  ;;  %v939_v11 = vcvt.f32.s32 %v3939_v8 }
 0x2b1   : > { %v801_v15 = vadd.s32 %v800_v9, %v798_v42  ;;  %v3974_v62 = vsel %vm985_vm5, 1.0, %v5321_v22 }
 0x2b2   : > { %v815_v6 = vadd.s32 %v814_v54, %v812_v1  ;;  %v825_v16 = vpop.xlane.xlu0 %824  ;;  %vm1113_vm6 = vcmp.gt.f32.partialorder %v3974_v62, 0.0 }
 0x2b3   : > { %v826_v19 = vcvt.f32.s32 %v825_v16  ;;  %v839_v45 = vpop.xlane.xlu1 %838  ;;  %v3979_v60 = vsel %vm1113_vm6, inf, %v3656_v23  ;;  %vm986_vm7 = vcmp.eq.s32.totalorder %v3699_v50, %v801_v15  ;;  %v953_v16 = vcvt.f32.s32 %v3942_v3 }
 0x2b4   : > { %5396 = vst [vmem:[#allocation18_spill] sm:$0xff] %v3979_v60  ;;  %v840_v14 = vcvt.f32.s32 %v839_v45  ;;  %1146 = vmin.xlane.f32.xlu1 %v3979_v60  ;;  %v3985_v12 = vsel %vm986_vm7, 1.0, %v5321_v22  ;;  %vm987_vm8 = vcmp.eq.s32.totalorder %v3699_v50, %v815_v6  ;;  %v912_v45 = vshll.u32 %v911_v7, 16 }
 0x2b5   : > { %v829_v0 = vadd.s32 %v828_v33, %v826_v19  ;;  %vm1114_vm9 = vcmp.gt.f32.partialorder %v3985_v12, 0.0  ;;  %v3991_v23 = vsel %vm987_vm8, 1.0, %v5321_v22  ;;  %v925_v33 = vcvt.f32.s32 %v3932_v4 }
 0x2b6   : > { %v843_v30 = vadd.s32 %v842_v10, %v840_v14  ;;  %v853_v52 = vpop.xlane.xlu0 %852  ;;  %v3995_v58 = vsel %vm1114_vm9, inf, %v3660_v25  ;;  %vm1115_vm10 = vcmp.gt.f32.partialorder %v3991_v23, 0.0  ;;  %v884_v25 = vshll.u32 %v883_v18, 16 }
 0x2b7   : > { %5397 = vst [vmem:[#allocation19_spill] sm:$0xff] %v3995_v58  ;;  %v854_v37 = vcvt.f32.s32 %v853_v52  ;;  %v867_v2 = vpop.xlane.xlu1 %866  ;;  %1148 = vmin.xlane.f32.xlu0 %v3995_v58  ;;  %v4000_v63 = vsel %vm1115_vm10, inf, %v3654_v21  ;;  %vm988_vm11 = vcmp.eq.s32.totalorder %v3699_v50, %v829_v0  ;;  %v898_v21 = vshll.u32 %v897_v24, 16 }
 0x2b8   : > { %5398 = vst [vmem:[#allocation20_spill] sm:$0xff] %v4000_v63  ;;  %v868_v17 = vcvt.f32.s32 %v867_v2  ;;  %1150 = vmin.xlane.f32.xlu1 %v4000_v63  ;;  %v4005_v20 = vsel %vm988_vm11, 1.0, %v5321_v22  ;;  %vm989_vm12 = vcmp.eq.s32.totalorder %v3699_v50, %v843_v30  ;;  %v926_v18 = vshll.u32 %v925_v33, 16 }
 0x2b9   : > { %v857_v46 = vadd.s32 %v856_v26, %v854_v37  ;;  %vm1116_vm13 = vcmp.gt.f32.partialorder %v4005_v20, 0.0  ;;  %v4010_v38 = vsel %vm989_vm12, 1.0, %v5321_v22  ;;  %v967_v2 = vcvt.f32.s32 %v3949_v13 }
 0x2ba   : > { %5399 = vst [vmem:[#allocation21_spill] sm:$0xff] %v4010_v38  ;;  %v871_v5 = vadd.s32 %v870_v34, %v868_v17  ;;  %v881_v9 = vpop.xlane.xlu0 %880  ;;  %v4013_v42 = vsel %vm1116_vm13, inf, %v3662_v27  ;;  %vm1117_vm14 = vcmp.gt.f32.partialorder %v4010_v38, 0.0 }
 0x2bb   : > { %5400 = vst [vmem:[#allocation22_spill] sm:$0xff] %v4013_v42  ;;  %v882_v54 = vcvt.f32.s32 %v881_v9  ;;  %v895_v1 = vpop.xlane.xlu1 %894  ;;  %1152 = vmin.xlane.f32.xlu0 %v4013_v42  ;;  %v4019_v15 = vsel %vm1117_vm14, inf, %v3664_v28  ;;  %vm990_vm15 = vcmp.eq.s32.totalorder %v3699_v50, %v857_v46  ;;  %v981_v46 = vcvt.f32.s32 %v3951_v57 }
 0x2bc   : > { %5401 = vst [vmem:[#allocation23_spill] sm:$0xff] %v4019_v15  ;;  %v896_v10 = vcvt.f32.s32 %v895_v1  ;;  %1154 = vmin.xlane.f32.xlu1 %v4019_v15  ;;  %v4025_v27 = vsel %vm990_vm15, 1.0, %v5321_v22  ;;  %vm991_vm1 = vcmp.eq.s32.totalorder %v3699_v50, %v871_v5  ;;  %v968_v57 = vshll.u32 %v967_v2, 16 }
 0x2bd   : > { %5402 = vst [vmem:[#allocation24_spill] sm:$0xff] %v4025_v27  ;;  %v885_v6 = vadd.s32 %v884_v25, %v882_v54  ;;  %vm1118_vm2 = vcmp.gt.f32.partialorder %v4025_v27, 0.0  ;;  %v4031_v28 = vsel %vm991_vm1, 1.0, %v5321_v22 }
 0x2be   : > { %5403 = vst [vmem:[#allocation25_spill] sm:$0xff] %v4031_v28  ;;  %v899_v29 = vadd.s32 %v898_v21, %v896_v10  ;;  %v909_v4 = vpop.xlane.xlu0 %908  ;;  %v4035_v19 = vsel %vm1118_vm2, inf, %v3668_v31  ;;  %vm1119_vm3 = vcmp.gt.f32.partialorder %v4031_v28, 0.0  ;;  %v940_v31 = vshll.u32 %v939_v11, 16 }
 0x2bf   : > { %5404 = vst [vmem:[#allocation26_spill] sm:$0xff] %v4035_v19  ;;  %v910_v49 = vcvt.f32.s32 %v909_v4  ;;  %v923_v14 = vpop.xlane.xlu1 %922  ;;  %1156 = vmin.xlane.f32.xlu0 %v4035_v19  ;;  %v4040_v8 = vsel %vm1119_vm3, inf, %v3670_v32  ;;  %vm992_vm4 = vcmp.eq.s32.totalorder %v3699_v50, %v885_v6  ;;  %v954_v32 = vshll.u32 %v953_v16, 16 }
 0x2c0   : > { %5405 = vst [vmem:[#allocation27_spill] sm:$0xff] %v4040_v8  ;;  %v924_v0 = vcvt.f32.s32 %v923_v14  ;;  %1158 = vmin.xlane.f32.xlu1 %v4040_v8  ;;  %v4045_v3 = vsel %vm992_vm4, 1.0, %v5321_v22  ;;  %vm993_vm5 = vcmp.eq.s32.totalorder %v3699_v50, %v899_v29  ;;  %v982_v10 = vshll.u32 %v981_v46, 16 }
 0x2c1   : > { %5406 = vst [vmem:[#allocation28_spill] sm:$0xff] %v4045_v3  ;;  %v913_v24 = vadd.s32 %v912_v45, %v910_v49  ;;  %vm1120_vm6 = vcmp.gt.f32.partialorder %v4045_v3, 0.0  ;;  %v4050_v30 = vsel %vm993_vm5, 1.0, %v5321_v22 }
 0x2c2   : > { %5407 = vst [vmem:[#allocation29_spill] sm:$0xff] %v4050_v30  ;;  %v927_v52 = vadd.s32 %v926_v18, %v924_v0  ;;  %v937_v26 = vpop.xlane.xlu0 %936  ;;  %v4053_v37 = vsel %vm1120_vm6, inf, %v3674_v35  ;;  %vm1121_vm7 = vcmp.gt.f32.partialorder %v4050_v30, 0.0 }
 0x2c3   : > { %5408 = vst [vmem:[#allocation30_spill] sm:$0xff] %v4053_v37  ;;  %v938_v34 = vcvt.f32.s32 %v937_v26  ;;  %v951_v17 = vpop.xlane.xlu1 %950  ;;  %1160 = vmin.xlane.f32.xlu0 %v4053_v37  ;;  %v4059_v25 = vsel %vm1121_vm7, inf, %v3676_v36  ;;  %vm994_vm8 = vcmp.eq.s32.totalorder %v3699_v50, %v913_v24 }
 0x2c4   : > { %5409 = vst [vmem:[#allocation31_spill] sm:$0xff] %v4059_v25  ;;  %v952_v21 = vcvt.f32.s32 %v951_v17  ;;  %1162 = vmin.xlane.f32.xlu1 %v4059_v25  ;;  %v4065_v35 = vsel %vm994_vm8, 1.0, %v5321_v22  ;;  %vm995_vm9 = vcmp.eq.s32.totalorder %v3699_v50, %v927_v52 }
 0x2c5   : > { %5410 = vst [vmem:[#allocation32_spill] sm:$0xff] %v4065_v35  ;;  %v941_v13 = vadd.s32 %v940_v31, %v938_v34  ;;  %vm1122_vm10 = vcmp.gt.f32.partialorder %v4065_v35, 0.0  ;;  %v4070_v5 = vsel %vm995_vm9, 1.0, %v5321_v22 }
 0x2c6   : > { %5411 = vst [vmem:[#allocation33_spill] sm:$0xff] %v4070_v5  ;;  %v955_v36 = vadd.s32 %v954_v32, %v952_v21  ;;  %v965_v9 = vpop.xlane.xlu0 %964  ;;  %v4073_v7 = vsel %vm1122_vm10, inf, %v3680_v39  ;;  %vm1123_vm11 = vcmp.gt.f32.partialorder %v4070_v5, 0.0 }
 0x2c7   : > { %5412 = vst [vmem:[#allocation34_spill] sm:$0xff] %v4073_v7  ;;  %v966_v54 = vcvt.f32.s32 %v965_v9  ;;  %v979_v1 = vpop.xlane.xlu1 %978  ;;  %1164 = vmin.xlane.f32.xlu0 %v4073_v7  ;;  %v4078_v33 = vsel %vm1123_vm11, inf, %v3682_v40  ;;  %vm996_vm12 = vcmp.eq.s32.totalorder %v3699_v50, %v941_v13 }
 0x2c8   : > { %5413 = vst [vmem:[#allocation35_spill] sm:$0xff] %v4078_v33  ;;  %v980_v11 = vcvt.f32.s32 %v979_v1  ;;  %1166 = vmin.xlane.f32.xlu1 %v4078_v33  ;;  %v4083_v6 = vsel %vm996_vm12, 1.0, %v5321_v22  ;;  %vm997_vm13 = vcmp.eq.s32.totalorder %v3699_v50, %v955_v36 }
 0x2c9   : > { %5414 = vst [vmem:[#allocation36_spill] sm:$0xff] %v4083_v6  ;;  %v969_v39 = vadd.s32 %v968_v57, %v966_v54  ;;  %vm1124_vm14 = vcmp.gt.f32.partialorder %v4083_v6, 0.0  ;;  %v4088_v16 = vsel %vm997_vm13, 1.0, %v5321_v22 }
 0x2ca   : > { %5415 = vst [vmem:[#allocation37_spill] sm:$0xff] %v4088_v16  ;;  %v983_v29 = vadd.s32 %v982_v10, %v980_v11  ;;  %v4091_v40 = vsel %vm1124_vm14, inf, %v3686_v43  ;;  %vm1125_vm15 = vcmp.gt.f32.partialorder %v4088_v16, 0.0 }
 0x2cb   : > { %5416 = vst [vmem:[#allocation38_spill] sm:$0xff] %v4091_v40  ;;  %vm998_vm1 = vcmp.eq.s32.totalorder %v3699_v50, %v969_v39  ;;  %1168 = vmin.xlane.f32.xlu0 %v4091_v40  ;;  %v4097_v4 = vsel %vm1125_vm15, inf, %v3688_v44 }
 0x2cc   : > { %5417 = vst [vmem:[#allocation39_spill] sm:$0xff] %v4097_v4  ;;  %vm999_vm2 = vcmp.eq.s32.totalorder %v3699_v50, %v983_v29  ;;  %1170 = vmin.xlane.f32.xlu1 %v4097_v4  ;;  %v4102_v45 = vsel %vm998_vm1, 1.0, %v5321_v22 }
 0x2cd   : > { %5418 = vst [vmem:[#allocation40_spill] sm:$0xff] %v4102_v45  ;;  %vm1126_vm3 = vcmp.gt.f32.partialorder %v4102_v45, 0.0  ;;  %v4106_v43 = vsel %vm999_vm2, 1.0, %v5321_v22 }
 0x2ce   : > { %5419 = vst [vmem:[#allocation41_spill] sm:$0xff] %v4106_v43  ;;  %v4109_v49 = vsel %vm1126_vm3, inf, %v3692_v47  ;;  %vm1127_vm4 = vcmp.gt.f32.partialorder %v4106_v43, 0.0 }
 0x2cf   : > { %5420 = vst [vmem:[#allocation42_spill] sm:$0xff] %v4109_v49  ;;  %1172 = vmin.xlane.f32.xlu0 %v4109_v49  ;;  %v4114_v44 = vsel %vm1127_vm4, inf, %v3694_v48 }
 0x2d0   : > { %5421 = vst [vmem:[#allocation43_spill] sm:$0xff] %v4114_v44  ;;  %1174 = vmin.xlane.f32.xlu1 %v4114_v44 }
 0x33d   : > { %v4117_v14 = vpop.xlane.xlu0 %1144 }
 0x33e   : > { %vm1176_vm5 = vcmp.eq.f32.partialorder %v3969_v56, %v4117_v14 }
 0x33f   : > { %v4122_v18 = vsel %vm1176_vm5, %v3699_v50, 128 }
 0x340   : > { %v1209_v47 = vshra.s32 %v4122_v18, 16 }
 0x341   : > { %v4125_v0 = vpop.xlane.xlu1 %1146 }
 0x342   : > { %vm1177_vm6 = vcmp.eq.f32.partialorder %v3979_v60, %v4125_v0  ;;  %v4129_v31 = vcvt.s32.f32 %v1209_v47 }
 0x343   : > { %v4132_v48 = vsel %vm1177_vm6, %v3699_v50, 128 }
 0x344   : > { %1212 = vmin.xlane.f32.xlu0 %v4129_v31  ;;  %v4135_v24 = vpop.xlane.xlu0 %1148  ;;  %v1223_v32 = vshra.s32 %v4132_v48, 16 }
 0x345   : > { %vm1178_vm7 = vcmp.eq.f32.partialorder %v3995_v58, %v4135_v24  ;;  %v4140_v52 = vpop.xlane.xlu1 %1150 }
 0x346   : > { %v4143_v26 = vsel %vm1178_vm7, %v3699_v50, 128  ;;  %vm1179_vm8 = vcmp.eq.f32.partialorder %v4000_v63, %v4140_v52  ;;  %v4147_v2 = vcvt.s32.f32 %v1223_v32 }
 0x347   : > { %v4150_v34 = vsel %vm1179_vm8, %v3699_v50, 128  ;;  %v1237_v17 = vshra.s32 %v4143_v26, 16 }
 0x348   : > { %1226 = vmin.xlane.f32.xlu1 %v4147_v2  ;;  %v4154_v46 = vpop.xlane.xlu0 %1152  ;;  %v1251_v21 = vshra.s32 %v4150_v34, 16  ;;  %v1250_v38 = vand.u32 65535, %v4150_v34 }
 0x349   : > { %vm1180_vm9 = vcmp.eq.f32.partialorder %v4013_v42, %v4154_v46  ;;  %v4159_v13 = vpop.xlane.xlu1 %1154  ;;  %v4161_v36 = vcvt.s32.f32 %v1237_v17 }
 0x34a   : > { %v4164_v9 = vsel %vm1180_vm9, %v3699_v50, 128  ;;  %vm1181_vm10 = vcmp.eq.f32.partialorder %v4019_v15, %v4159_v13  ;;  %v4168_v57 = vcvt.s32.f32 %v1251_v21 }
 0x34b   : > { %v4171_v54 = vsel %vm1181_vm10, %v3699_v50, 128  ;;  %1240 = vmin.xlane.f32.xlu0 %v4161_v36  ;;  %v1265_v1 = vshra.s32 %v4164_v9, 16 }
 0x34c   : > { %1254 = vmin.xlane.f32.xlu1 %v4168_v57  ;;  %v4176_v10 = vpop.xlane.xlu0 %1156  ;;  %v1279_v11 = vshra.s32 %v4171_v54, 16 }
 0x34d   : > { %vm1182_vm11 = vcmp.eq.f32.partialorder %v4035_v19, %v4176_v10  ;;  %v4181_v39 = vpop.xlane.xlu1 %1158  ;;  %v4183_v29 = vcvt.s32.f32 %v1265_v1 }
 0x34e   : > { %v4186_v47 = vsel %vm1182_vm11, %v3699_v50, 128  ;;  %vm1183_vm12 = vcmp.eq.f32.partialorder %v4040_v8, %v4181_v39  ;;  %v4190_v32 = vcvt.s32.f32 %v1279_v11 }
 0x34f   : > { %v4193_v17 = vsel %vm1183_vm12, %v3699_v50, 128  ;;  %1268 = vmin.xlane.f32.xlu0 %v4183_v29  ;;  %v1293_v21 = vshra.s32 %v4186_v47, 16  ;;  %v1292_v34 = vand.u32 65535, %v4186_v47 }
 0x350   : > { %1282 = vmin.xlane.f32.xlu1 %v4190_v32  ;;  %v4198_v22 = vpop.xlane.xlu0 %1160  ;;  %v1307_v1 = vshra.s32 %v4193_v17, 16 }
 0x351   : > { %vm1184_vm13 = vcmp.eq.f32.partialorder %v4053_v37, %v4198_v22  ;;  %v4203_v43 = vpop.xlane.xlu1 %1162  ;;  %v4205_v11 = vcvt.s32.f32 %v1293_v21 }
 0x352   : > { %v4208_v45 = vsel %vm1184_vm13, %v3699_v50, 128  ;;  %vm1185_vm14 = vcmp.eq.f32.partialorder %v4059_v25, %v4203_v43  ;;  %v4216_v19 = vcvt.s32.f32 %v1307_v1 }
 0x353   : > { %v4213_v8 = vsel %vm1185_vm14, %v3699_v50, 128  ;;  %1296 = vmin.xlane.f32.xlu0 %v4205_v11  ;;  %v1321_v37 = vshra.s32 %v4208_v45, 16 }
 0x354   : > { %v4218_v15 = vpop.xlane.xlu0 %1164  ;;  %v1335_v21 = vshra.s32 %v4213_v8, 16  ;;  %1310 = vmin.xlane.f32.xlu1 %v4216_v19 }
 0x355   : > { %vm1186_vm15 = vcmp.eq.f32.partialorder %v4073_v7, %v4218_v15  ;;  %v4225_v42 = vpop.xlane.xlu1 %1166  ;;  %v4235_v63 = vcvt.s32.f32 %v1321_v37 }
 0x356   : > { %v4228_v25 = vsel %vm1186_vm15, %v3699_v50, 128  ;;  %vm1187_vm1 = vcmp.eq.f32.partialorder %v4078_v33, %v4225_v42  ;;  %v4237_v58 = vcvt.s32.f32 %v1335_v21 }
 0x357   : > { %v4233_v1 = vsel %vm1187_vm1, %v3699_v50, 128  ;;  %v1349_v56 = vshra.s32 %v4228_v25, 16  ;;  %1324 = vmin.xlane.f32.xlu0 %v4235_v63 }
 0x358   : > { %v4239_v60 = vpop.xlane.xlu0 %1168  ;;  %v1363_v7 = vshra.s32 %v4233_v1, 16  ;;  %1338 = vmin.xlane.f32.xlu1 %v4237_v58 }
 0x359   : > { %5422 = vst [vmem:[#allocation44_spill] sm:$0xff] %v4239_v60  ;;  %vm1188_vm2 = vcmp.eq.f32.partialorder %v4091_v40, %v4239_v60  ;;  %v4246_v16 = vpop.xlane.xlu1 %1170  ;;  %v4257_v33 = vcvt.s32.f32 %v1349_v56  ;;  %v1264_v60 = vand.u32 65535, %v4164_v9 }
 0x35a   : > { %5423 = vst [vmem:[#allocation45_spill] sm:$0xff] %v4246_v16  ;;  %v4250_v37 = vsel %vm1188_vm2, %v3699_v50, 128  ;;  %vm1189_vm3 = vcmp.eq.f32.partialorder %v4097_v4, %v4246_v16  ;;  %v4259_v6 = vcvt.s32.f32 %v1363_v7 }
 0x35b   : > { %v4255_v21 = vsel %vm1189_vm3, %v3699_v50, 128  ;;  %v1377_v40 = vshra.s32 %v4250_v37, 16  ;;  %1352 = vmin.xlane.f32.xlu0 %v4257_v33 }
 0x35c   : > { %v4261_v5 = vpop.xlane.xlu0 %1172  ;;  %v1391_v35 = vshra.s32 %v4255_v21, 16  ;;  %1366 = vmin.xlane.f32.xlu1 %v4259_v6 }
 0x35d   : > { %5424 = vst [vmem:[#allocation46_spill] sm:$0xff] %v4261_v5  ;;  %vm1190_vm4 = vcmp.eq.f32.partialorder %v4109_v49, %v4261_v5  ;;  %v4268_v30 = vpop.xlane.xlu1 %1174  ;;  %v4279_v4 = vcvt.s32.f32 %v1377_v40  ;;  %v1208_v40 = vand.u32 65535, %v4122_v18 }
 0x35e   : > { %5425 = vst [vmem:[#allocation47_spill] sm:$0xff] %v4268_v30  ;;  %v4272_v56 = vsel %vm1190_vm4, %v3699_v50, 128  ;;  %vm1191_vm5 = vcmp.eq.f32.partialorder %v4114_v44, %v4268_v30  ;;  %v4281_v3 = vcvt.s32.f32 %v1391_v35 }
 0x35f   : > { %v4277_v7 = vsel %vm1191_vm5, %v3699_v50, 128  ;;  %v1405_v28 = vshra.s32 %v4272_v56, 16  ;;  %1380 = vmin.xlane.f32.xlu0 %v4279_v4  ;;  %v1210_v44 = vcvt.s32.f32 %v1208_v40  ;;  %v1222_v50 = vand.u32 65535, %v4132_v48 }
 0x360   : > { %v1419_v49 = vshra.s32 %v4277_v7, 16  ;;  %1394 = vmin.xlane.f32.xlu1 %v4281_v3 }
 0x361   : > { %v4287_v5 = vcvt.s32.f32 %v1405_v28  ;;  %v1236_v28 = vand.u32 65535, %v4143_v26  ;;  %v1224_v16 = vcvt.s32.f32 %v1222_v50  ;;  %v1278_v50 = vand.u32 65535, %v4171_v54 }
 0x362   : > { %v4289_v27 = vcvt.s32.f32 %v1419_v49 }
 0x363   : > { %1408 = vmin.xlane.f32.xlu0 %v4287_v5  ;;  %v1238_v48 = vcvt.s32.f32 %v1236_v28 }
 0x364   : > { %1422 = vmin.xlane.f32.xlu1 %v4289_v27 }
 0x3d1   : > { %v4294_v35 = vpop.xlane.xlu0 %1212 }
 0x3d2   : > { %vm1214_vm6 = vcmp.eq.f32.partialorder %v4129_v31, %v4294_v35 }
 0x3d3   : > { %v1215_v30 = vsel %vm1214_vm6, %v1210_v44, inf }
 0x3d4   : > { %1216 = vmin.xlane.f32.xlu0 %v1215_v30  ;;  %v1252_v30 = vcvt.s32.f32 %v1250_v38  ;;  %v1280_v38 = vcvt.s32.f32 %v1278_v50 }
 0x3d5   : > { %v4300_v49 = vpop.xlane.xlu1 %1226 }
 0x3d6   : > { %vm1228_vm7 = vcmp.eq.f32.partialorder %v4147_v2, %v4300_v49  ;;  %v1266_v2 = vcvt.s32.f32 %v1264_v60  ;;  %v1294_v60 = vcvt.s32.f32 %v1292_v34 }
 0x3d7   : > { %v1229_v18 = vsel %vm1228_vm7, %v1224_v16, inf }
 0x3d8   : > { %1230 = vmin.xlane.f32.xlu1 %v1229_v18  ;;  %v4305_v40 = vpop.xlane.xlu0 %1240 }
 0x3d9   : > { %v4308_v31 = vpop.xlane.xlu1 %1254  ;;  %vm1242_vm8 = vcmp.eq.f32.partialorder %v4161_v36, %v4305_v40 }
 0x3da   : > { %v1243_v44 = vsel %vm1242_vm8, %v1238_v48, inf  ;;  %vm1256_vm9 = vcmp.eq.f32.partialorder %v4168_v57, %v4308_v31  ;;  %v1306_v57 = vand.u32 65535, %v4193_v17  ;;  %v1320_v48 = vand.u32 65535, %v4208_v45 }
 0x3db   : > { %1244 = vmin.xlane.f32.xlu0 %v1243_v44  ;;  %v1257_v16 = vsel %vm1256_vm9, %v1252_v30, inf  ;;  %v1348_v44 = vand.u32 65535, %v4228_v25  ;;  %v1362_v45 = vand.u32 65535, %v4233_v1  ;;  %v1376_v25 = vand.u32 65535, %v4250_v37 }
 0x3dc   : > { %1258 = vmin.xlane.f32.xlu1 %v1257_v16  ;;  %v4315_v26 = vpop.xlane.xlu0 %1268  ;;  %v1322_v50 = vcvt.s32.f32 %v1320_v48  ;;  %v1390_v1 = vand.u32 65535, %v4255_v21  ;;  %v1404_v37 = vand.u32 65535, %v4272_v56  ;;  %v1418_v21 = vand.u32 65535, %v4277_v7 }
 0x3dd   : > { %v4318_v9 = vpop.xlane.xlu1 %1282  ;;  %vm1270_vm10 = vcmp.eq.f32.partialorder %v4183_v29, %v4315_v26  ;;  %v1308_v29 = vcvt.s32.f32 %v1306_v57  ;;  %v1350_v34 = vcvt.s32.f32 %v1348_v44  ;;  %v1034_v44 = vadd.f32 1e-08, %v3725_v59  ;;  %v5431_v59 = vld [vmem:[#allocation11_spill] sm:$0xff] }
 0x3de   : > { %v1271_v36 = vsel %vm1270_vm10, %v1266_v2, inf  ;;  %vm1284_vm11 = vcmp.eq.f32.partialorder %v4190_v32, %v4318_v9  ;;  %v1334_v32 = vand.u32 65535, %v4213_v8  ;;  %v1406_v48 = vcvt.s32.f32 %v1404_v37 }
 0x3df   : > { %1272 = vmin.xlane.f32.xlu0 %v1271_v36  ;;  %v1285_v54 = vsel %vm1284_vm11, %v1280_v38, inf  ;;  %v1420_v56 = vcvt.s32.f32 %v1418_v21  ;;  %v5435_v21 = vld [vmem:[#allocation15_spill] sm:$0xff] }
 0x3e0   : > { %1286 = vmin.xlane.f32.xlu1 %v1285_v54  ;;  %v4325_v28 = vpop.xlane.xlu0 %1296  ;;  %v1336_v16 = vcvt.s32.f32 %v1334_v32  ;;  %v1378_v54 = vcvt.s32.f32 %v1376_v25 }
 0x3e1   : > { %vm1298_vm12 = vcmp.eq.f32.partialorder %v4205_v11, %v4325_v28  ;;  %v4329_v47 = vpop.xlane.xlu1 %1310 }
 0x3e2   : > { %v1299_v18 = vsel %vm1298_vm12, %v1294_v60, inf  ;;  %vm1312_vm13 = vcmp.eq.f32.partialorder %v4216_v19, %v4329_v47 }
 0x3e3   : > { %1300 = vmin.xlane.f32.xlu0 %v1299_v18  ;;  %v1313_v17 = vsel %vm1312_vm13, %v1308_v29, inf }
 0x3e4   : > { %1314 = vmin.xlane.f32.xlu1 %v1313_v17  ;;  %v4335_v30 = vpop.xlane.xlu0 %1324  ;;  %v1035_v17 = vadd.f32 1e-08, %v3708_v53  ;;  %v5430_v53 = vld [vmem:[#allocation10_spill] sm:$0xff] }
 0x3e5   : > { %v4338_v11 = vpop.xlane.xlu1 %1338  ;;  %vm1326_vm14 = vcmp.eq.f32.partialorder %v4235_v63, %v4335_v30  ;;  %v1364_v63 = vcvt.s32.f32 %v1362_v45 }
 0x3e6   : > { %v1327_v2 = vsel %vm1326_vm14, %v1322_v50, inf  ;;  %vm1340_vm15 = vcmp.eq.f32.partialorder %v4237_v58, %v4338_v11  ;;  %v1033_v50 = vadd.f32 1e-08, %v3713_v55  ;;  %v1041_v55 = vadd.f32 1e-08, %v5430_v53 }
 0x3e7   : > { %1328 = vmin.xlane.f32.xlu0 %v1327_v2  ;;  %v1341_v19 = vsel %vm1340_vm15, %v1336_v16, inf  ;;  %v1036_v16 = vadd.f32 1e-08, %v3731_v61  ;;  %v5427_v2 = vld [vmem:[#allocation7_spill] sm:$0xff]  ;;  %v5432_v61 = vld [vmem:[#allocation12_spill] sm:$0xff] }
 0x3e8   : > { %1342 = vmin.xlane.f32.xlu1 %v1341_v19  ;;  %v4345_v8 = vpop.xlane.xlu0 %1352  ;;  %v5428_v19 = vld [vmem:[#allocation8_spill] sm:$0xff]  ;;  %v1490_v53 = vadd.f32 1e-08, %v4218_v15 }
 0x3e9   : > { %v4348_v38 = vpop.xlane.xlu1 %1366  ;;  %vm1354_vm1 = vcmp.eq.f32.partialorder %v4257_v33, %v4345_v8  ;;  %v1392_v33 = vcvt.s32.f32 %v1390_v1  ;;  %v1043_v1 = vadd.f32 1e-08, %v5432_v61 }
 0x3ea   : > { %v1355_v36 = vsel %vm1354_vm1, %v1350_v34, inf  ;;  %vm1368_vm2 = vcmp.eq.f32.partialorder %v4259_v6, %v4348_v38  ;;  %v1039_v34 = vadd.f32 1e-08, %v5428_v19 }
 0x3eb   : > { %1356 = vmin.xlane.f32.xlu0 %v1355_v36  ;;  %v1369_v58 = vsel %vm1368_vm2, %v1364_v63, inf  ;;  %v1042_v63 = vadd.f32 1e-08, %v5431_v59  ;;  %v5433_v36 = vld [vmem:[#allocation13_spill] sm:$0xff] }
 0x3ec   : > { %1370 = vmin.xlane.f32.xlu1 %v1369_v58  ;;  %v4355_v57 = vpop.xlane.xlu0 %1380  ;;  %v1044_v58 = vadd.f32 1e-08, %v5433_v36 }
 0x3ed   : > { %v4358_v60 = vpop.xlane.xlu1 %1394  ;;  %vm1382_vm3 = vcmp.eq.f32.partialorder %v4279_v4, %v4355_v57 }
 0x3ee   : > { %v1383_v18 = vsel %vm1382_vm3, %v1378_v54, inf  ;;  %vm1396_vm4 = vcmp.eq.f32.partialorder %v4281_v3, %v4358_v60  ;;  %v1032_v3 = vadd.f32 1e-08, %v3701_v51  ;;  %v5429_v51 = vld [vmem:[#allocation9_spill] sm:$0xff]  ;;  %v5434_v54 = vld [vmem:[#allocation14_spill] sm:$0xff] }
 0x3ef   : > { %1384 = vmin.xlane.f32.xlu0 %v1383_v18  ;;  %v1397_v6 = vsel %vm1396_vm4, %v1392_v33, inf  ;;  %v1040_v25 = vadd.f32 1e-08, %v5429_v51  ;;  %v1045_v37 = vadd.f32 1e-08, %v5434_v54  ;;  %v5452_v54 = vld [vmem:[#allocation24_spill] sm:$0xff] }
 0x3f0   : > { %1398 = vmin.xlane.f32.xlu1 %v1397_v6  ;;  %v4365_v29 = vpop.xlane.xlu0 %1408  ;;  %3282 = vrcp.f32 %v1032_v3  ;;  %v1046_v18 = vadd.f32 1e-08, %v5435_v21 }
 0x3f1   : > { %v4367_v32 = vpop.xlane.xlu1 %1422  ;;  %vm1410_vm5 = vcmp.eq.f32.partialorder %v4287_v5, %v4365_v29  ;;  %3284 = vrcp.f32 %v1035_v17  ;;  %v5426_v5 = vld [vmem:[#allocation6_spill] sm:$0xff]  ;;  %v1481_v17 = vadd.f32 1e-08, %v4125_v0  ;;  %v1485_v0 = vadd.f32 1e-08, %v4159_v13 }
 0x3f2   : > { %v1411_v4 = vsel %vm1410_vm5, %v1406_v48, inf  ;;  %vm1424_vm6 = vcmp.eq.f32.partialorder %v4289_v27, %v4367_v32  ;;  %v1037_v45 = vadd.f32 1e-08, %v5426_v5  ;;  %3286 = vrcp.f32 %v1033_v50  ;;  %v5437_v48 = vld [vmem:[#allocation16_spill] sm:$0xff] }
 0x3f3   : > { %1412 = vmin.xlane.f32.xlu0 %v1411_v4  ;;  %v1425_v7 = vsel %vm1424_vm6, %v1420_v56, inf  ;;  %v1038_v27 = vadd.f32 1e-08, %v5427_v2  ;;  %3288 = vrcp.f32 %v1034_v44  ;;  %v1047_v56 = vadd.f32 1e-08, %v5437_v48 }
 0x3f4   : > { %1426 = vmin.xlane.f32.xlu1 %v1425_v7  ;;  %3290 = vrcp.f32 %v1036_v16  ;;  %v1480_v7 = vadd.f32 1e-08, %v4117_v14  ;;  %v1482_v44 = vadd.f32 1e-08, %v4135_v24  ;;  %v1483_v5 = vadd.f32 1e-08, %v4140_v52 }
 0x3f5   : > { %3292 = vrcp.f32 %v1037_v45  ;;  %v1484_v14 = vadd.f32 1e-08, %v4154_v46  ;;  %v1486_v24 = vadd.f32 1e-08, %v4176_v10  ;;  %v1487_v52 = vadd.f32 1e-08, %v4181_v39 }
 0x3f6   : > { %3294 = vrcp.f32 %v1038_v27  ;;  %v1488_v46 = vadd.f32 1e-08, %v4198_v22  ;;  %v1489_v13 = vadd.f32 1e-08, %v4203_v43  ;;  %v1491_v43 = vadd.f32 1e-08, %v4225_v42 }
 0x3f7   : > { %3296 = vrcp.f32 %v1039_v34  ;;  %v5451_v42 = vld [vmem:[#allocation45_spill] sm:$0xff] }
 0x3f8   : > { %3298 = vrcp.f32 %v1040_v25  ;;  %v1493_v36 = vadd.f32 1e-08, %v5451_v42 }
 0x3f9   : > { %3300 = vrcp.f32 %v1041_v55 }
 0x3fa   : > { %v4387_v33 = vpop.eup %3282  ;;  %3302 = vrcp.f32 %v1042_v63 }
 0x3fb   : > { %v4390_v6 = vpop.eup %3284  ;;  %3304 = vrcp.f32 %v1043_v1  ;;  %v4427_v10 = vmul.f32 %v4387_v33, %v3963_v41 }
 0x3fc   : > { %5436 = vst [vmem:[#allocation6_spill] sm:$0xff] %v4390_v6  ;;  %v4393_v4 = vpop.eup %3286  ;;  %3306 = vrcp.f32 %v1044_v58  ;;  %v4445_v41 = vmul.f32 %v4390_v6, %v3991_v23  ;;  %v1219_v58 = vcvt.f32.s32 %v4294_v35  ;;  %v5456_v35 = vld [vmem:[#allocation29_spill] sm:$0xff] }
 0x3fd   : > { %v4396_v3 = vpop.eup %3288  ;;  %3308 = vrcp.f32 %v1045_v37  ;;  %v4434_v55 = vmul.f32 %v4393_v4, %v3974_v62  ;;  %v5448_v62 = vld [vmem:[#allocation44_spill] sm:$0xff]  ;;  %v5453_v37 = vld [vmem:[#allocation25_spill] sm:$0xff] }
 0x3fe   : > { %v4399_v50 = vpop.eup %3290  ;;  %3310 = vrcp.f32 %v1046_v18  ;;  %v4438_v22 = vmul.f32 %v4396_v3, %v3985_v12  ;;  %v1492_v63 = vadd.f32 1e-08, %v5448_v62  ;;  %v5450_v12 = vld [vmem:[#allocation21_spill] sm:$0xff]  ;;  %v5454_v18 = vld [vmem:[#allocation46_spill] sm:$0xff]  ;;  %v1220_v62 = vshll.u32 %v1219_v58, 16 }
 0x3ff   : > { %5438 = vst [vmem:[#allocation7_spill] sm:$0xff] %v4399_v50  ;;  %v4402_v16 = vpop.eup %3292  ;;  %3312 = vrcp.f32 %v1047_v56  ;;  %v4449_v15 = vmul.f32 %v4399_v50, %v4005_v20  ;;  %v1494_v48 = vadd.f32 1e-08, %v5454_v18  ;;  %v5469_v50 = vld [vmem:[#allocation19_spill] sm:$0xff] }
 0x400   : > { %5439 = vst [vmem:[#allocation8_spill] sm:$0xff] %v4402_v16  ;;  %v4405_v45 = vpop.eup %3294  ;;  %3314 = vrcp.f32 %v1480_v7  ;;  %v4456_v1 = vmul.f32 %v4402_v16, %v5450_v12  ;;  %v5455_v7 = vld [vmem:[#allocation28_spill] sm:$0xff]  ;;  %v1275_v12 = vcvt.f32.s32 %v4315_v26  ;;  %v5461_v26 = vld [vmem:[#allocation37_spill] sm:$0xff] }
 0x401   : > { %5440 = vst [vmem:[#allocation9_spill] sm:$0xff] %v4405_v45  ;;  %v4408_v2 = vpop.eup %3296  ;;  %3316 = vrcp.f32 %v1481_v17  ;;  %v4464_v20 = vmul.f32 %v4405_v45, %v5452_v54  ;;  %v5458_v54 = vld [vmem:[#allocation32_spill] sm:$0xff] }
 0x402   : > { %5441 = vst [vmem:[#allocation10_spill] sm:$0xff] %v4408_v2  ;;  %v4411_v27 = vpop.eup %3298  ;;  %3318 = vrcp.f32 %v1482_v44  ;;  %v4468_v21 = vmul.f32 %v4408_v2, %v5453_v37 }
 0x403   : > { %5442 = vst [vmem:[#allocation11_spill] sm:$0xff] %v4411_v27  ;;  %v4414_v19 = vpop.eup %3300  ;;  %3320 = vrcp.f32 %v1483_v5  ;;  %v4475_v17 = vmul.f32 %v4411_v27, %v5455_v7  ;;  %v5457_v5 = vld [vmem:[#allocation47_spill] sm:$0xff]  ;;  %v5464_v27 = vld [vmem:[#allocation17_spill] sm:$0xff] }
 0x404   : > { %5443 = vst [vmem:[#allocation12_spill] sm:$0xff] %v4414_v19  ;;  %v4417_v34 = vpop.eup %3302  ;;  %3322 = vrcp.f32 %v1484_v14  ;;  %v4479_v44 = vmul.f32 %v4414_v19, %v5456_v35  ;;  %v1495_v14 = vadd.f32 1e-08, %v5457_v5 }
 0x405   : > { %5444 = vst [vmem:[#allocation13_spill] sm:$0xff] %v4417_v34  ;;  %v4420_v51 = vpop.eup %3304  ;;  %3324 = vrcp.f32 %v1485_v0  ;;  %v4494_v37 = vmul.f32 %v4417_v34, %v5458_v54  ;;  %v5462_v34 = vld [vmem:[#allocation5_spill] sm:$0xff] }
 0x406   : > { %5445 = vst [vmem:[#allocation14_spill] sm:$0xff] %v4420_v51  ;;  %v4423_v25 = vpop.eup %3306  ;;  %3326 = vrcp.f32 %v1486_v24  ;;  %v1233_v24 = vcvt.f32.s32 %v4300_v49 }
 0x407   : > { %5446 = vst [vmem:[#allocation15_spill] sm:$0xff] %v4423_v25  ;;  %v4430_v39 = vpop.eup %3308  ;;  %3328 = vrcp.f32 %v1487_v52  ;;  %v1247_v52 = vcvt.f32.s32 %v4305_v40  ;;  %v1289_v40 = vcvt.f32.s32 %v4318_v9 }
 0x408   : > { %5447 = vst [vmem:[#allocation16_spill] sm:$0xff] %v4430_v39  ;;  %v4441_v59 = vpop.eup %3310  ;;  %3330 = vrcp.f32 %v1488_v46  ;;  %v1261_v46 = vcvt.f32.s32 %v4308_v31  ;;  %v4509_v18 = vmul.f32 %v4430_v39, %v5461_v26  ;;  %v1234_v5 = vshll.u32 %v1233_v24, 16 }
 0x409   : > { %v4452_v61 = vpop.eup %3312  ;;  %3332 = vrcp.f32 %v1489_v13  ;;  %v1345_v24 = vcvt.f32.s32 %v4338_v11 }
 0x40a   : > { %5449 = vst [vmem:[#allocation44_spill] sm:$0xff] %v4452_v61  ;;  %v4460_v23 = vpop.eup %3314  ;;  %3334 = vrcp.f32 %v1490_v53  ;;  %v1262_v54 = vshll.u32 %v1261_v46, 16 }
 0x40b   : > { %v4471_v56 = vpop.eup %3316  ;;  %3336 = vrcp.f32 %v1491_v43 }
 0x40c   : > { %v4482_v0 = vpop.eup %3318  ;;  %3338 = vrcp.f32 %v1492_v63  ;;  %v5459_v63 = vld [vmem:[#allocation33_spill] sm:$0xff] }
 0x40d   : > { %v4487_v53 = vpop.eup %3320  ;;  %3340 = vrcp.f32 %v1493_v36  ;;  %v4498_v49 = vmul.f32 %v4420_v51, %v5459_v63  ;;  %v5460_v36 = vld [vmem:[#allocation36_spill] sm:$0xff]  ;;  %v1276_v51 = vshll.u32 %v1275_v12, 16 }
 0x40e   : > { %v4490_v43 = vpop.eup %3322  ;;  %3342 = vrcp.f32 %v1494_v48  ;;  %v4505_v58 = vmul.f32 %v4423_v25, %v5460_v36  ;;  %v1303_v48 = vcvt.f32.s32 %v4325_v28  ;;  %v1317_v36 = vcvt.f32.s32 %v4329_v47 }
 0x40f   : > { %v4501_v31 = vpop.eup %3324  ;;  %3344 = vrcp.f32 %v1495_v14  ;;  %v1290_v14 = vshll.u32 %v1289_v40, 16  ;;  %v1359_v28 = vcvt.f32.s32 %v4345_v8  ;;  %v1373_v40 = vcvt.f32.s32 %v4348_v38 }
 0x410   : > { %v4511_v35 = vpop.eup %3326  ;;  %v1318_v45 = vshll.u32 %v1317_v36, 16  ;;  %v4544_v38 = vshll.u32 %v1345_v24, 16 }
 0x411   : > { %v4514_v63 = vpop.eup %3328  ;;  %v4549_v36 = vshll.u32 %v1359_v28, 16 }
 0x412   : > { %v4518_v26 = vpop.eup %3330 }
 0x461   : > { %v1217_v13 = vpop.xlane.xlu0 %1216 }
 0x462   : > { %v1218_v42 = vcvt.f32.s32 %v1217_v13  ;;  %v1248_v13 = vshll.u32 %v1247_v52, 16  ;;  %v5463_v52 = vmov 0.0  }
 0x464   : > { %v1221_v7 = vadd.s32 %v1220_v62, %v1218_v42  ;;  %v1331_v62 = vcvt.f32.s32 %v4335_v30  ;;  %v4523_v42 = vpop.eup %3332 }
 0x465   : > { %v1231_v9 = vpop.xlane.xlu1 %1230 }
 0x466   : > { %v1232_v25 = vcvt.f32.s32 %v1231_v9  ;;  %vm1432_vm7 = vcmp.eq.s32.totalorder %v5462_v34, %v1221_v7  ;;  %v4527_v9 = vpop.eup %3334  ;;  %v1304_v7 = vshll.u32 %v1303_v48, 16 }
 0x467   : > { %v2928_v46 = vsel %vm1432_vm7, 1.0, %v5463_v52  ;;  %v4533_v2 = vpop.eup %3336 }
 0x468   : > { %v1235_v39 = vadd.s32 %v1234_v5, %v1232_v25  ;;  %v1245_v12 = vpop.xlane.xlu0 %1244  ;;  %vm1560_vm8 = vcmp.gt.f32.partialorder %v2928_v46, 0.0  ;;  %v1512_v47 = vmul.f32 %v4460_v23, %v2928_v46  ;;  %v4540_v25 = vpop.eup %3338  ;;  %v4542_v5 = vshll.u32 %v1331_v62, 16 }
 0x469   : > { %v1246_v19 = vcvt.f32.s32 %v1245_v12  ;;  %v1259_v30 = vpop.xlane.xlu1 %1258  ;;  %v4531_v11 = vsel %vm1560_vm8, inf, %v5464_v27  ;;  %v4547_v46 = vpop.eup %3340 }
 0x46a   : > { %v1260_v16 = vcvt.f32.s32 %v1259_v30  ;;  %1592 = vmin.xlane.f32.xlu0 %v4531_v11  ;;  %v4537_v8 = vadd.f32 %v1512_v47, %v4427_v10  ;;  %vm1433_vm9 = vcmp.eq.s32.totalorder %v5462_v34, %v1235_v39  ;;  %v4552_v47 = vpop.eup %3342  ;;  %v4554_v39 = vshll.u32 %v1373_v40, 16 }
 0x46b   : > { %v1249_v48 = vadd.s32 %v1248_v13, %v1246_v19  ;;  %v2929_v27 = vsel %vm1433_vm9, 1.0, %v5463_v52  ;;  %v5466_v19 = vld [vmem:[#allocation18_spill] sm:$0xff] }
 0x46c   : > { %5465 = vst [vmem:[#allocation21_spill] sm:$0xff] %v4537_v8  ;;  %v1263_v12 = vadd.s32 %v1262_v54, %v1260_v16  ;;  %v1273_v30 = vpop.xlane.xlu0 %1272  ;;  %vm1561_vm10 = vcmp.gt.f32.partialorder %v2929_v27, 0.0  ;;  %v1513_v10 = vmul.f32 %v4471_v56, %v2929_v27  ;;  %v4560_v8 = vpop.eup %3344 }
 0x46d   : > { %vm1434_vm11 = vcmp.eq.s32.totalorder %v5462_v34, %v1249_v48  ;;  %v1274_v62 = vcvt.f32.s32 %v1273_v30  ;;  %v1287_v24 = vpop.xlane.xlu1 %1286  ;;  %v4558_v13 = vsel %vm1561_vm10, inf, %v5466_v19  ;;  %5467 = vst [vmem:[#allocation45_spill] sm:$0xff] %v4560_v8 }
 0x46e   : > { %vm1435_vm12 = vcmp.eq.s32.totalorder %v5462_v34, %v1263_v12  ;;  %v1288_v16 = vcvt.f32.s32 %v1287_v24  ;;  %1594 = vmin.xlane.f32.xlu1 %v4558_v13  ;;  %v4565_v54 = vadd.f32 %v1513_v10, %v4434_v55  ;;  %v2930_v28 = vsel %vm1434_vm11, 1.0, %v5463_v52  ;;  %v5471_v10 = vld [vmem:[#allocation20_spill] sm:$0xff] }
 0x46f   : > { %v1277_v40 = vadd.s32 %v1276_v51, %v1274_v62  ;;  %vm1562_vm13 = vcmp.gt.f32.partialorder %v2930_v28, 0.0  ;;  %v1514_v48 = vmul.f32 %v4482_v0, %v2930_v28  ;;  %v2931_v27 = vsel %vm1435_vm12, 1.0, %v5463_v52 }
 0x470   : > { %5468 = vst [vmem:[#allocation24_spill] sm:$0xff] %v4565_v54  ;;  %v1291_v30 = vadd.s32 %v1290_v14, %v1288_v16  ;;  %v1301_v19 = vpop.xlane.xlu0 %1300  ;;  %v4571_v6 = vsel %vm1562_vm13, inf, %v5469_v50  ;;  %vm1563_vm14 = vcmp.gt.f32.partialorder %v2931_v27, 0.0  ;;  %v1515_v12 = vmul.f32 %v4487_v53, %v2931_v27 }
 0x471   : > { %vm1436_vm15 = vcmp.eq.s32.totalorder %v5462_v34, %v1277_v40  ;;  %v1302_v55 = vcvt.f32.s32 %v1301_v19  ;;  %1596 = vmin.xlane.f32.xlu0 %v4571_v6  ;;  %v4577_v51 = vadd.f32 %v1514_v48, %v4438_v22  ;;  %v4580_v62 = vsel %vm1563_vm14, inf, %v5471_v10  ;;  %v1315_v50 = vpop.xlane.xlu1 %1314 }
 0x472   : > { %v1387_v14 = vcvt.f32.s32 %v4355_v57  ;;  %vm1437_vm1 = vcmp.eq.s32.totalorder %v5462_v34, %v1291_v30  ;;  %1598 = vmin.xlane.f32.xlu1 %v4580_v62  ;;  %v4586_v24 = vadd.f32 %v1515_v12, %v4445_v41  ;;  %v2932_v16 = vsel %vm1436_vm15, 1.0, %v5463_v52  ;;  %v5473_v57 = vld [vmem:[#allocation22_spill] sm:$0xff] }
 0x473   : > { %5470 = vst [vmem:[#allocation25_spill] sm:$0xff] %v4577_v51  ;;  %v1305_v28 = vadd.s32 %v1304_v7, %v1302_v55  ;;  %v1316_v40 = vcvt.f32.s32 %v1315_v50  ;;  %vm1564_vm2 = vcmp.gt.f32.partialorder %v2932_v16, 0.0  ;;  %v1516_v22 = vmul.f32 %v4490_v43, %v2932_v16 }
 0x474   : > { %5472 = vst [vmem:[#allocation46_spill] sm:$0xff] %v4586_v24  ;;  %v1401_v48 = vcvt.f32.s32 %v4358_v60  ;;  %v1415_v27 = vcvt.f32.s32 %v4365_v29  ;;  %v4593_v19 = vsel %vm1564_vm2, inf, %v5473_v57  ;;  %v2933_v30 = vsel %vm1437_vm1, 1.0, %v5463_v52  ;;  %v1329_v55 = vpop.xlane.xlu0 %1328  ;;  %v5475_v60 = vld [vmem:[#allocation23_spill] sm:$0xff] }
 0x475   : > { %vm1438_vm3 = vcmp.eq.s32.totalorder %v5462_v34, %v1305_v28  ;;  %v1319_v41 = vadd.s32 %v1318_v45, %v1316_v40  ;;  %1600 = vmin.xlane.f32.xlu0 %v4593_v19  ;;  %v4599_v7 = vadd.f32 %v1516_v22, %v4449_v15  ;;  %vm1565_vm4 = vcmp.gt.f32.partialorder %v2933_v30, 0.0  ;;  %v1343_v45 = vpop.xlane.xlu1 %1342  ;;  %v5477_v40 = vld [vmem:[#allocation26_spill] sm:$0xff] }
 0x476   : > { %v1429_v12 = vcvt.f32.s32 %v4367_v32  ;;  %v4603_v10 = vsel %vm1565_vm4, inf, %v5475_v60  ;;  %v1517_v29 = vmul.f32 %v4501_v31, %v2933_v30  ;;  %v2934_v50 = vsel %vm1438_vm3, 1.0, %v5463_v52 }
 0x477   : > { %5474 = vst [vmem:[#allocation28_spill] sm:$0xff] %v4599_v7  ;;  %vm1439_vm5 = vcmp.eq.s32.totalorder %v5462_v34, %v1319_v41  ;;  %v1330_v16 = vcvt.f32.s32 %v1329_v55  ;;  %1602 = vmin.xlane.f32.xlu1 %v4603_v10  ;;  %vm1566_vm6 = vcmp.gt.f32.partialorder %v2934_v50, 0.0  ;;  %v1518_v15 = vmul.f32 %v4511_v35, %v2934_v50 }
 0x478   : > { %v1344_v28 = vcvt.f32.s32 %v1343_v45  ;;  %v4611_v32 = vadd.f32 %v1517_v29, %v4456_v1  ;;  %v4614_v22 = vsel %vm1566_vm6, inf, %v5477_v40  ;;  %v2935_v57 = vsel %vm1439_vm5, 1.0, %v5463_v52  ;;  %v1357_v29 = vpop.xlane.xlu0 %1356  ;;  %v5479_v45 = vld [vmem:[#allocation27_spill] sm:$0xff] }
 0x479   : > { %v1333_v30 = vadd.s32 %v4542_v5, %v1330_v16  ;;  %1604 = vmin.xlane.f32.xlu0 %v4614_v22  ;;  %v4620_v41 = vadd.f32 %v1518_v15, %v4464_v20  ;;  %vm1567_vm7 = vcmp.gt.f32.partialorder %v2935_v57, 0.0  ;;  %v1519_v55 = vmul.f32 %v4514_v63, %v2935_v57  ;;  %v1371_v16 = vpop.xlane.xlu1 %1370 }
 0x47a   : > { %5476 = vst [vmem:[#allocation29_spill] sm:$0xff] %v4611_v32  ;;  %v1388_v60 = vshll.u32 %v1387_v14, 16  ;;  %v1402_v50 = vshll.u32 %v1401_v48, 16  ;;  %v1347_v1 = vadd.s32 %v4544_v38, %v1344_v28  ;;  %v4625_v40 = vsel %vm1567_vm7, inf, %v5479_v45 }
 0x47b   : > { %5478 = vst [vmem:[#allocation47_spill] sm:$0xff] %v4620_v41  ;;  %v1416_v32 = vshll.u32 %v1415_v27, 16  ;;  %vm1440_vm8 = vcmp.eq.s32.totalorder %v5462_v34, %v1333_v30  ;;  %v1358_v5 = vcvt.f32.s32 %v1357_v29  ;;  %1606 = vmin.xlane.f32.xlu1 %v4625_v40  ;;  %v4630_v20 = vadd.f32 %v1519_v55, %v4468_v21  ;;  %v5481_v29 = vld [vmem:[#allocation30_spill] sm:$0xff] }
 0x47c   : > { %v1430_v15 = vshll.u32 %v1429_v12, 16  ;;  %vm1441_vm9 = vcmp.eq.s32.totalorder %v5462_v34, %v1347_v1  ;;  %v1372_v14 = vcvt.f32.s32 %v1371_v16  ;;  %v2936_v38 = vsel %vm1440_vm8, 1.0, %v5463_v52  ;;  %v1385_v30 = vpop.xlane.xlu0 %1384  ;;  %v5483_v1 = vld [vmem:[#allocation31_spill] sm:$0xff] }
 0x47d   : > { %5480 = vst [vmem:[#allocation32_spill] sm:$0xff] %v4630_v20  ;;  %v1361_v48 = vadd.s32 %v4549_v36, %v1358_v5  ;;  %vm1568_vm10 = vcmp.gt.f32.partialorder %v2936_v38, 0.0  ;;  %v1520_v27 = vmul.f32 %v4518_v26, %v2936_v38  ;;  %v2937_v28 = vsel %vm1441_vm9, 1.0, %v5463_v52  ;;  %v1399_v55 = vpop.xlane.xlu1 %1398 }
 0x47e   : > { %v1375_v57 = vadd.s32 %v4554_v39, %v1372_v14  ;;  %v4639_v45 = vsel %vm1568_vm10, inf, %v5481_v29  ;;  %vm1569_vm11 = vcmp.gt.f32.partialorder %v2937_v28, 0.0  ;;  %v1521_v21 = vmul.f32 %v4523_v42, %v2937_v28 }
 0x47f   : > { %vm1442_vm12 = vcmp.eq.s32.totalorder %v5462_v34, %v1361_v48  ;;  %v1386_v12 = vcvt.f32.s32 %v1385_v30  ;;  %1608 = vmin.xlane.f32.xlu0 %v4639_v45  ;;  %v4645_v36 = vadd.f32 %v1520_v27, %v4475_v17  ;;  %v4648_v5 = vsel %vm1569_vm11, inf, %v5483_v1  ;;  %v5485_v30 = vld [vmem:[#allocation34_spill] sm:$0xff] }
 0x480   : > { %vm1443_vm13 = vcmp.eq.s32.totalorder %v5462_v34, %v1375_v57  ;;  %v1400_v39 = vcvt.f32.s32 %v1399_v55  ;;  %1610 = vmin.xlane.f32.xlu1 %v4648_v5  ;;  %v4653_v16 = vadd.f32 %v1521_v21, %v4479_v44  ;;  %v2938_v14 = vsel %vm1442_vm12, 1.0, %v5463_v52  ;;  %v1413_v28 = vpop.xlane.xlu0 %1412 }
 0x481   : > { %5482 = vst [vmem:[#allocation33_spill] sm:$0xff] %v4645_v36  ;;  %v1389_v38 = vadd.s32 %v1388_v60, %v1386_v12  ;;  %vm1570_vm14 = vcmp.gt.f32.partialorder %v2938_v14, 0.0  ;;  %v1522_v48 = vmul.f32 %v4527_v9, %v2938_v14  ;;  %v2939_v17 = vsel %vm1443_vm13, 1.0, %v5463_v52  ;;  %v1427_v21 = vpop.xlane.xlu1 %1426  ;;  %v5487_v12 = vld [vmem:[#allocation35_spill] sm:$0xff] }
 0x482   : > { %5484 = vst [vmem:[#allocation36_spill] sm:$0xff] %v4653_v16  ;;  %v1403_v27 = vadd.s32 %v1402_v50, %v1400_v39  ;;  %v4659_v29 = vsel %vm1570_vm14, inf, %v5485_v30  ;;  %vm1571_vm15 = vcmp.gt.f32.partialorder %v2939_v17, 0.0  ;;  %v1523_v57 = vmul.f32 %v4533_v2, %v2939_v17  ;;  %v5489_v17 = vld [vmem:[#allocation38_spill] sm:$0xff] }
 0x483   : > { %vm1444_vm1 = vcmp.eq.s32.totalorder %v5462_v34, %v1389_v38  ;;  %v1414_v44 = vcvt.f32.s32 %v1413_v28  ;;  %1612 = vmin.xlane.f32.xlu0 %v4659_v29  ;;  %v4665_v60 = vadd.f32 %v1522_v48, %v4494_v37  ;;  %v4668_v55 = vsel %vm1571_vm15, inf, %v5487_v12 }
 0x484   : > { %vm1445_vm2 = vcmp.eq.s32.totalorder %v5462_v34, %v1403_v27  ;;  %v1428_v50 = vcvt.f32.s32 %v1427_v21  ;;  %1614 = vmin.xlane.f32.xlu1 %v4668_v55  ;;  %v4673_v1 = vadd.f32 %v1523_v57, %v4498_v49  ;;  %v2940_v39 = vsel %vm1444_vm1, 1.0, %v5463_v52 }
 0x485   : > { %5486 = vst [vmem:[#allocation37_spill] sm:$0xff] %v4665_v60  ;;  %v1417_v14 = vadd.s32 %v1416_v32, %v1414_v44  ;;  %vm1572_vm3 = vcmp.gt.f32.partialorder %v2940_v39, 0.0  ;;  %v1524_v38 = vmul.f32 %v4540_v25, %v2940_v39  ;;  %v2941_v37 = vsel %vm1445_vm2, 1.0, %v5463_v52  ;;  %v5491_v32 = vld [vmem:[#allocation39_spill] sm:$0xff]  ;;  %v5493_v44 = vld [vmem:[#allocation40_spill] sm:$0xff] }
 0x486   : > { %5488 = vst [vmem:[#allocation5_spill] sm:$0xff] %v4673_v1  ;;  %v1431_v48 = vadd.s32 %v1430_v15, %v1428_v50  ;;  %v4679_v28 = vsel %vm1572_vm3, inf, %v5489_v17  ;;  %vm1573_vm4 = vcmp.gt.f32.partialorder %v2941_v37, 0.0  ;;  %v1525_v27 = vmul.f32 %v4547_v46, %v2941_v37  ;;  %v5494_v50 = vld [vmem:[#allocation41_spill] sm:$0xff] }
 0x487   : > { %vm1446_vm5 = vcmp.eq.s32.totalorder %v5462_v34, %v1417_v14  ;;  %1616 = vmin.xlane.f32.xlu0 %v4679_v28  ;;  %v4685_v49 = vadd.f32 %v1524_v38, %v4505_v58  ;;  %v4688_v30 = vsel %vm1573_vm4, inf, %v5491_v32  ;;  %v1078_v21 = vmul.f32 %v4441_v59, %v5493_v44  ;;  %v5495_v14 = vld [vmem:[#allocation42_spill] sm:$0xff] }
 0x488   : > { %vm1447_vm6 = vcmp.eq.s32.totalorder %v5462_v34, %v1431_v48  ;;  %1618 = vmin.xlane.f32.xlu1 %v4688_v30  ;;  %v4693_v15 = vadd.f32 %v1525_v27, %v4509_v18  ;;  %v2942_v57 = vsel %vm1446_vm5, 1.0, %v5463_v52  ;;  %v1079_v39 = vmul.f32 %v4452_v61, %v5494_v50  ;;  %v5497_v48 = vld [vmem:[#allocation43_spill] sm:$0xff] }
 0x489   : > { %5490 = vst [vmem:[#allocation17_spill] sm:$0xff] %v4685_v49  ;;  %vm1574_vm7 = vcmp.gt.f32.partialorder %v2942_v57, 0.0  ;;  %v1526_v12 = vmul.f32 %v4552_v47, %v2942_v57  ;;  %v2943_v58 = vsel %vm1447_vm6, 1.0, %v5463_v52  ;;  %v5500_v49 = vld [vmem:[#allocation6_spill] sm:$0xff] }
 0x48a   : > { %5492 = vst [vmem:[#allocation18_spill] sm:$0xff] %v4693_v15  ;;  %v4703_v38 = vsel %vm1574_vm7, inf, %v5495_v14  ;;  %vm1575_vm8 = vcmp.gt.f32.partialorder %v2943_v58, 0.0  ;;  %v1527_v18 = vmul.f32 %v4560_v8, %v2943_v58  ;;  %v1547_v1 = vadd.f32 %v4487_v53, %v5500_v49 }
 0x48b   : > { %1620 = vmin.xlane.f32.xlu0 %v4703_v38  ;;  %v4707_v37 = vadd.f32 %v1526_v12, %v1078_v21  ;;  %v4710_v17 = vsel %vm1575_vm8, inf, %v5497_v48 }
 0x48c   : > { %1622 = vmin.xlane.f32.xlu1 %v4710_v17  ;;  %v4713_v27 = vadd.f32 %v1527_v18, %v1079_v39 }
 0x48d   : > { %5496 = vst [vmem:[#allocation19_spill] sm:$0xff] %v4707_v37 }
 0x48e   : > { %5498 = vst [vmem:[#allocation20_spill] sm:$0xff] %v4713_v27 }
 0x4f7   : > { %v1593_v32 = vpop.xlane.xlu0 %1592 }
 0x4f8   : > { %vm1624_vm9 = vcmp.eq.f32.partialorder %v4531_v11, %v1593_v32  ;;  %v1928_v57 = vadd.f32 1e-08, %v1593_v32 }
 0x4f9   : > { %v4717_v44 = vsel %vm1624_vm9, %v5462_v34, 128 }
 0x4fa   : > { %v1657_v58 = vshra.s32 %v4717_v44, 16  ;;  %3346 = vrcp.f32 %v1928_v57 }
 0x4fb   : > { %v1595_v50 = vpop.xlane.xlu1 %1594 }
 0x4fc   : > { %vm1625_vm10 = vcmp.eq.f32.partialorder %v4558_v13, %v1595_v50  ;;  %v1929_v21 = vadd.f32 1e-08, %v1595_v50  ;;  %v4721_v12 = vcvt.s32.f32 %v1657_v58 }
 0x4fd   : > { %v4724_v14 = vsel %vm1625_vm10, %v5462_v34, 128 }
 0x4fe   : > { %v1671_v39 = vshra.s32 %v4724_v14, 16  ;;  %3348 = vrcp.f32 %v1929_v21  ;;  %1660 = vmin.xlane.f32.xlu0 %v4721_v12  ;;  %v1597_v11 = vpop.xlane.xlu0 %1596 }
 0x4ff   : > { %vm1626_vm11 = vcmp.eq.f32.partialorder %v4571_v6, %v1597_v11  ;;  %v1930_v18 = vadd.f32 1e-08, %v1597_v11  ;;  %v1599_v48 = vpop.xlane.xlu1 %1598  ;;  %v1544_v11 = vadd.f32 %v4460_v23, %v4387_v33  ;;  %v1545_v33 = vadd.f32 %v4471_v56, %v4393_v4 }
 0x500   : > { %v4730_v32 = vsel %vm1626_vm11, %v5462_v34, 128  ;;  %vm1627_vm12 = vcmp.eq.f32.partialorder %v4580_v62, %v1599_v48  ;;  %v1931_v13 = vadd.f32 1e-08, %v1599_v48  ;;  %v4733_v57 = vcvt.s32.f32 %v1671_v39 }
 0x501   : > { %v1685_v58 = vshra.s32 %v4730_v32, 16  ;;  %3350 = vrcp.f32 %v1930_v18  ;;  %v4737_v50 = vsel %vm1627_vm12, %v5462_v34, 128 }
 0x502   : > { %v1699_v21 = vshra.s32 %v4737_v50, 16  ;;  %3352 = vrcp.f32 %v1931_v13  ;;  %1674 = vmin.xlane.f32.xlu1 %v4733_v57  ;;  %v1601_v6 = vpop.xlane.xlu0 %1600 }
 0x503   : > { %vm1628_vm13 = vcmp.eq.f32.partialorder %v4593_v19, %v1601_v6  ;;  %v1932_v62 = vadd.f32 1e-08, %v1601_v6  ;;  %v4744_v39 = vcvt.s32.f32 %v1685_v58 }
 0x504   : > { %v4746_v48 = vpop.eup %3346  ;;  %v4749_v18 = vsel %vm1628_vm13, %v5462_v34, 128  ;;  %v1603_v27 = vpop.xlane.xlu1 %1602  ;;  %v4751_v37 = vcvt.s32.f32 %v1699_v21 }
 0x505   : > { %v4754_v13 = vadd.f32 %v4746_v48, %v1544_v11  ;;  %v1713_v15 = vshra.s32 %v4749_v18, 16  ;;  %3354 = vrcp.f32 %v1932_v62  ;;  %1688 = vmin.xlane.f32.xlu0 %v4744_v39  ;;  %vm1629_vm14 = vcmp.eq.f32.partialorder %v4603_v10, %v1603_v27 }
 0x506   : > { %v1933_v23 = vadd.f32 1e-08, %v1603_v27  ;;  %1702 = vmin.xlane.f32.xlu1 %v4751_v37  ;;  %v1605_v19 = vpop.xlane.xlu0 %1604  ;;  %v4763_v58 = vsel %vm1629_vm14, %v5462_v34, 128 }
 0x507   : > { %vm1630_vm15 = vcmp.eq.f32.partialorder %v4614_v22, %v1605_v19  ;;  %v1934_v21 = vadd.f32 1e-08, %v1605_v19  ;;  %v4766_v6 = vcvt.s32.f32 %v1713_v15  ;;  %v1727_v62 = vshra.s32 %v4763_v58, 16 }
 0x508   : > { %v4768_v11 = vpop.eup %3348  ;;  %3356 = vrcp.f32 %v1933_v23  ;;  %v4772_v4 = vsel %vm1630_vm15, %v5462_v34, 128  ;;  %v1607_v56 = vpop.xlane.xlu1 %1606  ;;  %v1546_v22 = vadd.f32 %v4482_v0, %v4396_v3 }
 0x509   : > { %v4775_v10 = vadd.f32 %v4768_v11, %v1545_v33  ;;  %v1741_v27 = vshra.s32 %v4772_v4, 16  ;;  %3358 = vrcp.f32 %v1934_v21  ;;  %1716 = vmin.xlane.f32.xlu0 %v4766_v6  ;;  %vm1631_vm1 = vcmp.eq.f32.partialorder %v4625_v40, %v1607_v56 }
 0x50a   : > { %v1935_v15 = vadd.f32 1e-08, %v1607_v56  ;;  %v4782_v19 = vcvt.s32.f32 %v1727_v62  ;;  %v4789_v33 = vsel %vm1631_vm1, %v5462_v34, 128  ;;  %v5502_v62 = vld [vmem:[#allocation7_spill] sm:$0xff] }
 0x50b   : > { %v4784_v23 = vpop.eup %3350  ;;  %v4791_v60 = vcvt.s32.f32 %v1741_v27  ;;  %v1755_v40 = vshra.s32 %v4789_v33, 16  ;;  %v1548_v56 = vadd.f32 %v4490_v43, %v5502_v62 }
 0x50c   : > { %5499 = vst [vmem:[#allocation22_spill] sm:$0xff] %v4784_v23  ;;  %v4793_v21 = vpop.eup %3352  ;;  %v4796_v16 = vadd.f32 %v4784_v23, %v1546_v22  ;;  %3360 = vrcp.f32 %v1935_v15  ;;  %1730 = vmin.xlane.f32.xlu1 %v4782_v19  ;;  %v1609_v3 = vpop.xlane.xlu0 %1608 }
 0x50d   : > { %5501 = vst [vmem:[#allocation23_spill] sm:$0xff] %v4793_v21  ;;  %v4800_v0 = vadd.f32 %v4793_v21, %v1547_v1  ;;  %vm1632_vm2 = vcmp.eq.f32.partialorder %v4639_v45, %v1609_v3  ;;  %v1936_v53 = vadd.f32 1e-08, %v1609_v3  ;;  %v1611_v49 = vpop.xlane.xlu1 %1610  ;;  %1744 = vmin.xlane.f32.xlu0 %v4791_v60  ;;  %v5504_v1 = vld [vmem:[#allocation8_spill] sm:$0xff] }
 0x50e   : > { %v4808_v27 = vsel %vm1632_vm2, %v5462_v34, 128  ;;  %vm1633_vm3 = vcmp.eq.f32.partialorder %v4648_v5, %v1611_v49  ;;  %v1937_v22 = vadd.f32 1e-08, %v1611_v49  ;;  %v1549_v36 = vadd.f32 %v4501_v31, %v5504_v1  ;;  %v5506_v1 = vld [vmem:[#allocation9_spill] sm:$0xff] }
 0x50f   : > { %v4811_v15 = vpop.eup %3354  ;;  %v4816_v45 = vsel %vm1633_vm3, %v5462_v34, 128  ;;  %v1769_v20 = vshra.s32 %v4808_v27, 16  ;;  %3362 = vrcp.f32 %v1936_v53  ;;  %v4823_v5 = vcvt.s32.f32 %v1755_v40 }
 0x510   : > { %5503 = vst [vmem:[#allocation26_spill] sm:$0xff] %v4811_v15  ;;  %v4819_v3 = vadd.f32 %v4811_v15, %v1548_v56  ;;  %v1783_v43 = vshra.s32 %v4816_v45, 16  ;;  %v1613_v62 = vpop.xlane.xlu0 %1612  ;;  %3364 = vrcp.f32 %v1937_v22  ;;  %v1550_v7 = vadd.f32 %v4511_v35, %v5506_v1 }
 0x511   : > { %vm1634_vm4 = vcmp.eq.f32.partialorder %v4659_v29, %v1613_v62  ;;  %v1938_v49 = vadd.f32 1e-08, %v1613_v62  ;;  %v1615_v41 = vpop.xlane.xlu1 %1614  ;;  %1758 = vmin.xlane.f32.xlu1 %v4823_v5  ;;  %v4846_v35 = vcvt.s32.f32 %v1769_v20 }
 0x512   : > { %v4826_v31 = vpop.eup %3356  ;;  %v4831_v56 = vsel %vm1634_vm4, %v5462_v34, 128  ;;  %vm1635_vm5 = vcmp.eq.f32.partialorder %v4668_v55, %v1615_v41  ;;  %v1939_v53 = vadd.f32 1e-08, %v1615_v41  ;;  %v5508_v55 = vld [vmem:[#allocation10_spill] sm:$0xff] }
 0x513   : > { %5505 = vst [vmem:[#allocation27_spill] sm:$0xff] %v4826_v31  ;;  %v4834_v8 = vpop.eup %3358  ;;  %v4837_v40 = vadd.f32 %v4826_v31, %v1549_v36  ;;  %3366 = vrcp.f32 %v1938_v49  ;;  %v4844_v22 = vsel %vm1635_vm5, %v5462_v34, 128  ;;  %v1551_v41 = vadd.f32 %v4514_v63, %v5508_v55  ;;  %1772 = vmin.xlane.f32.xlu0 %v4846_v35  ;;  %v5510_v55 = vld [vmem:[#allocation11_spill] sm:$0xff] }
 0x514   : > { %5507 = vst [vmem:[#allocation30_spill] sm:$0xff] %v4834_v8  ;;  %v4841_v29 = vadd.f32 %v4834_v8, %v1550_v7  ;;  %3368 = vrcp.f32 %v1939_v53  ;;  %v1617_v62 = vpop.xlane.xlu0 %1616  ;;  %v1797_v1 = vshra.s32 %v4831_v56, 16  ;;  %v1811_v36 = vshra.s32 %v4844_v22, 16 }
 0x515   : > { %v4852_v31 = vcvt.s32.f32 %v1783_v43  ;;  %v1619_v49 = vpop.xlane.xlu1 %1618  ;;  %vm1636_vm6 = vcmp.eq.f32.partialorder %v4679_v28, %v1617_v62  ;;  %v1940_v7 = vadd.f32 1e-08, %v1617_v62  ;;  %v1552_v8 = vadd.f32 %v4518_v26, %v5510_v55  ;;  %v5511_v62 = vld [vmem:[#allocation12_spill] sm:$0xff]  ;;  %v5516_v55 = vld [vmem:[#allocation14_spill] sm:$0xff] }
 0x516   : > { %v4854_v61 = vpop.eup %3360  ;;  %vm1637_vm7 = vcmp.eq.f32.partialorder %v4688_v30, %v1619_v49  ;;  %v4864_v63 = vsel %vm1636_vm6, %v5462_v34, 128  ;;  %v1941_v53 = vadd.f32 1e-08, %v1619_v49  ;;  %v1553_v30 = vadd.f32 %v4523_v42, %v5511_v62 }
 0x517   : > { %5509 = vst [vmem:[#allocation31_spill] sm:$0xff] %v4854_v61  ;;  %v4860_v20 = vadd.f32 %v4854_v61, %v1551_v41  ;;  %1786 = vmin.xlane.f32.xlu1 %v4852_v31  ;;  %v4867_v43 = vsel %vm1637_vm7, %v5462_v34, 128  ;;  %3370 = vrcp.f32 %v1940_v7  ;;  %v1825_v41 = vshra.s32 %v4864_v63, 16  ;;  %v5514_v7 = vld [vmem:[#allocation13_spill] sm:$0xff] }
 0x518   : > { %v4871_v28 = vpop.xlane.xlu0 %1620  ;;  %v4876_v61 = vcvt.s32.f32 %v1797_v1  ;;  %v4878_v15 = vcvt.s32.f32 %v1811_v36  ;;  %v1839_v49 = vshra.s32 %v4867_v43, 16  ;;  %3372 = vrcp.f32 %v1941_v53 }
 0x519   : > { %v4880_v24 = vpop.xlane.xlu1 %1622  ;;  %v4882_v51 = vpop.eup %3362  ;;  %vm1638_vm8 = vcmp.eq.f32.partialorder %v4703_v38, %v4871_v28  ;;  %v1554_v38 = vadd.f32 %v4527_v9, %v5514_v7  ;;  %v1555_v62 = vadd.f32 %v4533_v2, %v5516_v55  ;;  %v4913_v21 = vcvt.s32.f32 %v1825_v41  ;;  %v5518_v41 = vld [vmem:[#allocation15_spill] sm:$0xff] }
 0x51a   : > { %5512 = vst [vmem:[#allocation34_spill] sm:$0xff] %v4882_v51  ;;  %vm1639_vm9 = vcmp.eq.f32.partialorder %v4710_v17, %v4880_v24  ;;  %v4889_v26 = vpop.eup %3364  ;;  %v4892_v42 = vadd.f32 %v4882_v51, %v1552_v8  ;;  %1800 = vmin.xlane.f32.xlu0 %v4876_v61  ;;  %v4897_v1 = vsel %vm1638_vm8, %v5462_v34, 128  ;;  %v4920_v9 = vcvt.s32.f32 %v1839_v49 }
 0x51b   : > { %5513 = vst [vmem:[#allocation35_spill] sm:$0xff] %v4889_v26  ;;  %1814 = vmin.xlane.f32.xlu1 %v4878_v15  ;;  %v4900_v36 = vsel %vm1639_vm9, %v5462_v34, 128  ;;  %v4905_v17 = vadd.f32 %v4889_v26, %v1553_v30  ;;  %v1853_v53 = vshra.s32 %v4897_v1, 16  ;;  %v1556_v55 = vadd.f32 %v4540_v25, %v5518_v41  ;;  %v3265_v26 = vld [vmem:[%s3617_s26 + $0x8] sm:$0xff]   ;;  %v3266_v25 = vld [vmem:[%s3617_s26 + $0x10] sm:$0xff]  }
 0x51c   : > { %v1867_v51 = vshra.s32 %v4900_v36, 16  ;;  %3374 = vrcp.f32 %v4754_v13 }
 0x51d   : > { %v4908_v8 = vpop.eup %3366  ;;  %v4926_v7 = vcvt.s32.f32 %v1853_v53  ;;  %3376 = vrcp.f32 %v4796_v16 }
 0x51e   : > { %5515 = vst [vmem:[#allocation38_spill] sm:$0xff] %v4908_v8  ;;  %v4915_v23 = vpop.eup %3368  ;;  %v4918_v54 = vadd.f32 %v4908_v8, %v1554_v38  ;;  %1828 = vmin.xlane.f32.xlu0 %v4913_v21  ;;  %v4929_v2 = vcvt.s32.f32 %v1867_v51  ;;  %v5520_v8 = vld [vmem:[#allocation16_spill] sm:$0xff]  ;;  %3378 = vrcp.f32 %v4800_v0 }
 0x51f   : > { %5517 = vst [vmem:[#allocation39_spill] sm:$0xff] %v4915_v23  ;;  %v4923_v30 = vadd.f32 %v4915_v23, %v1555_v62  ;;  %1842 = vmin.xlane.f32.xlu1 %v4920_v9  ;;  %v1557_v49 = vadd.f32 %v4547_v46, %v5520_v8  ;;  %v3264_v23 = vld [vmem:[%s3617_s26] sm:$0xff]   ;;  %v1656_v46 = vand.u32 65535, %v4717_v44  ;;  %v1670_v8 = vand.u32 65535, %v4724_v14 }
 0x520   : > { %3100 = vmatprep.subr.bf16.mxu1 %v3264_v23  ;;  %v1712_v14 = vand.u32 65535, %v4749_v18  ;;  %v1740_v18 = vand.u32 65535, %v4772_v4  ;;  %3380 = vrcp.f32 %v4819_v3 }
 0x521   : > { %v4933_v38 = vpop.eup %3370  ;;  %3101 = vmatpush3.bf16.msra.mxu1 %v3264_v23  ;;  %v1698_v23 = vand.u32 65535, %v4737_v50  ;;  %3382 = vrcp.f32 %v4837_v40  ;;  %v1943_v40 = vadd.f32 1e-08, %v4880_v24 }
 0x522   : > { %5519 = vst [vmem:[#allocation40_spill] sm:$0xff] %v4933_v38  ;;  %v4938_v62 = vadd.f32 %v4933_v38, %v1556_v55  ;;  %1856 = vmin.xlane.f32.xlu0 %v4926_v7  ;;  %v4941_v53 = vpop.eup %3372  ;;  %3102 = vmatprep.subr.bf16.mxu1 %v3265_v26  ;;  %v1658_v55 = vcvt.s32.f32 %v1656_v46  ;;  %3384 = vrcp.f32 %v4841_v29 }
 0x523   : > { %5521 = vst [vmem:[#allocation41_spill] sm:$0xff] %v4941_v53  ;;  %1870 = vmin.xlane.f32.xlu1 %v4929_v2  ;;  %v4945_v51 = vadd.f32 %v4941_v53, %v1557_v49  ;;  %v1684_v53 = vand.u32 65535, %v4730_v32  ;;  %v1700_v32 = vcvt.s32.f32 %v1698_v23  ;;  %v1742_v23 = vcvt.s32.f32 %v1740_v18  ;;  %v3268_v18 = vld [vmem:[%s3617_s26 + $0x20] sm:$0xff]  }
 0x524   : > { %3386 = vrcp.f32 %v4775_v10 }
 0x525   : > { %3103 = vmatpush3.bf16.msra.mxu1 %v3265_v26  ;;  %v1672_v26 = vcvt.s32.f32 %v1670_v8  ;;  %v1686_v46 = vcvt.s32.f32 %v1684_v53  ;;  %v1726_v8 = vand.u32 65535, %v4763_v58  ;;  %v1714_v53 = vcvt.s32.f32 %v1712_v14 }
 0x526   : > { %3104 = vmatprep.subr.bf16.mxu1 %v3266_v25  ;;  %v1782_v14 = vand.u32 65535, %v4816_v45  ;;  %3388 = vrcp.f32 %v4860_v20 }
 0x529   : > { %3105 = vmatpush3.bf16.msra.mxu1 %v3266_v25 }
 0x58b   : > { %v4952_v41 = vpop.xlane.xlu0 %1660 }
 0x58c   : > { %vm1662_vm10 = vcmp.eq.f32.partialorder %v4721_v12, %v4952_v41 }
 0x58d   : > { %v1663_v49 = vsel %vm1662_vm10, %v1658_v55, inf }
 0x58e   : > { %1664 = vmin.xlane.f32.xlu0 %v1663_v49 }
 0x58f   : > { %v4958_v38 = vpop.xlane.xlu1 %1674 }
 0x590   : > { %vm1676_vm11 = vcmp.eq.f32.partialorder %v4733_v57, %v4958_v38 }
 0x591   : > { %v1677_v44 = vsel %vm1676_vm11, %v1672_v26, inf  ;;  %v1754_v26 = vand.u32 65535, %v4789_v33  ;;  %vm2227_vm11 = vcmask 1043456  }
 0x592   : > { %1678 = vmin.xlane.f32.xlu1 %v1677_v44  ;;  %v4963_v25 = vpop.xlane.xlu0 %1688  ;;  %v1768_v44 = vand.u32 65535, %v4808_v27  ;;  %v1810_v27 = vand.u32 65535, %v4844_v22 }
 0x593   : > { %vm1690_vm12 = vcmp.eq.f32.partialorder %v4744_v39, %v4963_v25  ;;  %v4967_v12 = vpop.xlane.xlu1 %1702  ;;  %v1695_v13 = vcvt.f32.s32 %v4963_v25 }
 0x594   : > { %vm1704_vm13 = vcmp.eq.f32.partialorder %v4751_v37, %v4967_v12  ;;  %v1691_v50 = vsel %vm1690_vm12, %v1686_v46, inf  ;;  %v1728_v37 = vcvt.s32.f32 %v1726_v8  ;;  %v1770_v33 = vcvt.s32.f32 %v1768_v44 }
 0x595   : > { %1692 = vmin.xlane.f32.xlu0 %v1691_v50  ;;  %v1705_v57 = vsel %vm1704_vm13, %v1700_v32, inf  ;;  %v1756_v32 = vcvt.s32.f32 %v1754_v26  ;;  %v1796_v8 = vand.u32 65535, %v4831_v56  ;;  %v1824_v56 = vand.u32 65535, %v4864_v63  ;;  %v3269_v26 = vld [vmem:[%s3617_s26 + $0x28] sm:$0xff]  }
 0x596   : > { %1706 = vmin.xlane.f32.xlu1 %v1705_v57  ;;  %v4973_v55 = vpop.xlane.xlu0 %1716  ;;  %v1784_v57 = vcvt.s32.f32 %v1782_v14  ;;  %v1852_v63 = vand.u32 65535, %v4897_v1  ;;  %v1709_v0 = vcvt.f32.s32 %v4967_v12  ;;  %v1696_v12 = vshll.u32 %v1695_v13, 16 }
 0x597   : > { %vm1718_vm14 = vcmp.eq.f32.partialorder %v4766_v6, %v4973_v55  ;;  %v1826_v44 = vcvt.s32.f32 %v1824_v56  ;;  %v1942_v56 = vadd.f32 1e-08, %v4871_v28  ;;  %v5058_v28 = vadd.f32 %v4552_v47, %v4441_v59  ;;  %v5522_v59 = vld [vmem:[#allocation21_spill] sm:$0xff] }
 0x598   : > { %v1719_v39 = vsel %vm1718_vm14, %v1714_v53, inf }
 0x599   : > { %v4977_v49 = vpop.xlane.xlu1 %1730  ;;  %1720 = vmin.xlane.f32.xlu0 %v1719_v39  ;;  %3390 = vrcp.f32 %v1942_v56 }
 0x59a   : > { %vm1732_vm15 = vcmp.eq.f32.partialorder %v4782_v19, %v4977_v49  ;;  %v4981_v58 = vpop.xlane.xlu0 %1744  ;;  %v3267_v19 = vld [vmem:[%s3617_s26 + $0x18] sm:$0xff]   ;;  %3392 = vrcp.f32 %v4892_v42 }
 0x59b   : > { %v1733_v4 = vsel %vm1732_vm15, %v1728_v37, inf  ;;  %vm1746_vm1 = vcmp.eq.f32.partialorder %v4791_v60, %v4981_v58  ;;  %3106 = vmatprep.subr.bf16.mxu1 %v3267_v19  ;;  %v1812_v37 = vcvt.s32.f32 %v1810_v27  ;;  %v2202_v27 = vld [vmem:[%s5305_s5] sm:$0xf]  ;;  %3394 = vrcp.f32 %v1943_v40 }
 0x59c   : > { %1734 = vmin.xlane.f32.xlu1 %v1733_v4  ;;  %v1747_v6 = vsel %vm1746_vm1, %v1742_v23, inf  ;;  %3107 = vmatpush3.bf16.msra.mxu1 %v3267_v19  ;;  %v1838_v23 = vand.u32 65535, %v4867_v43  ;;  %v1866_v43 = vand.u32 65535, %v4900_v36  ;;  %v1854_v19 = vcvt.s32.f32 %v1852_v63 }
 0x59d   : > { %1748 = vmin.xlane.f32.xlu0 %v1747_v6  ;;  %3108 = vmatprep.subr.bf16.mxu1 %v3268_v18  ;;  %3396 = vrcp.f32 %v4905_v17 }
 0x59e   : > { %v4988_v46 = vpop.xlane.xlu1 %1758  ;;  %v1868_v36 = vcvt.s32.f32 %v1866_v43  ;;  %3204 = vmatprep.subr.msk.bf16.mxu0 %vm2227_vm11, %v2202_v27  ;;  %3398 = vrcp.f32 %v4918_v54 }
 0x59f   : > { %vm1760_vm2 = vcmp.eq.f32.partialorder %v4823_v5, %v4988_v46  ;;  %3400 = vrcp.f32 %v4923_v30  ;;  %v5531_v30 = vld [vmem:[#allocation28_spill] sm:$0xff] }
 0x5a0   : > { %v1761_v50 = vsel %vm1760_vm2, %v1756_v32, inf  ;;  %v4993_v60 = vpop.xlane.xlu0 %1772  ;;  %3109 = vmatpush3.bf16.msra.mxu1 %v3268_v18  ;;  %v1681_v18 = vcvt.f32.s32 %v4958_v38  ;;  %3402 = vrcp.f32 %v4938_v62 }
 0x5a1   : > { %1762 = vmin.xlane.f32.xlu1 %v1761_v50  ;;  %vm1774_vm3 = vcmp.eq.f32.partialorder %v4846_v35, %v4993_v60  ;;  %v1798_v35 = vcvt.s32.f32 %v1796_v8  ;;  %3110 = vmatprep.subr.bf16.mxu1 %v3269_v26  ;;  %v3270_v50 = vld [vmem:[%s3617_s26 + $0x30] sm:$0xff]   ;;  %v3271_v8 = vld [vmem:[%s3617_s26 + $0x38] sm:$0xff]   ;;  %3404 = vrcp.f32 %v4945_v51 }
 0x5a2   : > { %v1775_v5 = vsel %vm1774_vm3, %v1770_v33, inf  ;;  %v1682_v16 = vshll.u32 %v1681_v18, 16 }
 0x5a3   : > { %1776 = vmin.xlane.f32.xlu0 %v1775_v5 }
 0x5a4   : > { %v4999_v45 = vpop.xlane.xlu1 %1786  ;;  %3111 = vmatpush3.bf16.msra.mxu1 %v3269_v26 }
 0x5a5   : > { %vm1788_vm4 = vcmp.eq.f32.partialorder %v4852_v31, %v4999_v45  ;;  %3112 = vmatprep.subr.bf16.mxu1 %v3270_v50 }
 0x5a6   : > { %v1789_v53 = vsel %vm1788_vm4, %v1784_v57, inf }
 0x5a7   : > { %1790 = vmin.xlane.f32.xlu1 %v1789_v53  ;;  %v5005_v22 = vpop.xlane.xlu0 %1800 }
 0x5a8   : > { %v5007_v39 = vpop.xlane.xlu1 %1814  ;;  %vm1802_vm5 = vcmp.eq.f32.partialorder %v4876_v61, %v5005_v22  ;;  %3113 = vmatpush3.bf16.msra.mxu1 %v3270_v50 }
 0x5a9   : > { %vm1816_vm6 = vcmp.eq.f32.partialorder %v4878_v15, %v5007_v39  ;;  %v1803_v31 = vsel %vm1802_vm5, %v1798_v35, inf  ;;  %v1840_v15 = vcvt.s32.f32 %v1838_v23  ;;  %3114 = vmatprep.subr.bf16.mxu1 %v3271_v8  ;;  %v1723_v23 = vcvt.f32.s32 %v4973_v55 }
 0x5aa   : > { %v1817_v4 = vsel %vm1816_vm6, %v1812_v37, inf  ;;  %1804 = vmin.xlane.f32.xlu0 %v1803_v31  ;;  %v3375_v37 = vpop.eup %3374 }
 0x5ab   : > { %1818 = vmin.xlane.f32.xlu1 %v1817_v4  ;;  %v5016_v6 = vpop.xlane.xlu0 %1828  ;;  %v3377_v24 = vpop.eup %3376  ;;  %v1710_v4 = vshll.u32 %v1709_v0, 16 }
 0x5ac   : > { %vm1830_vm7 = vcmp.eq.f32.partialorder %v4913_v21, %v5016_v6  ;;  %v5021_v61 = vpop.xlane.xlu1 %1842  ;;  %3115 = vmatpush3.bf16.msra.mxu1 %v3271_v8  ;;  %v3379_v63 = vpop.eup %3378 }
 0x5ad   : > { %vm1844_vm8 = vcmp.eq.f32.partialorder %v4920_v9, %v5021_v61  ;;  %v1831_v14 = vsel %vm1830_vm7, %v1826_v44, inf  ;;  %v1737_v44 = vcvt.f32.s32 %v4977_v49  ;;  %v3381_v42 = vpop.eup %3380 }
 0x5ae   : > { %1832 = vmin.xlane.f32.xlu0 %v1831_v14  ;;  %v1845_v1 = vsel %vm1844_vm8, %v1840_v15, inf  ;;  %v1751_v15 = vcvt.f32.s32 %v4981_v58  ;;  %v5069_v50 = vpop.eup %3382  ;;  %v5523_v58 = vld [vmem:[#allocation24_spill] sm:$0xff] }
 0x5af   : > { %1846 = vmin.xlane.f32.xlu1 %v1845_v1  ;;  %v5025_v32 = vpop.xlane.xlu0 %1856  ;;  %v5073_v49 = vpop.eup %3384 }
 0x5b0   : > { %vm1858_vm9 = vcmp.eq.f32.partialorder %v4926_v7, %v5025_v32  ;;  %v5030_v21 = vpop.xlane.xlu1 %1870  ;;  %v2229_v7 = vsel %vm2227_vm11, %v2202_v27, 0  ;;  %v1738_v27 = vshll.u32 %v1737_v44, 16  ;;  %v1752_v18 = vshll.u32 %v1751_v15, 16 }
 0x5b1   : > { %vm1872_vm10 = vcmp.eq.f32.partialorder %v4929_v2, %v5030_v21  ;;  %v1859_v33 = vsel %vm1858_vm9, %v1854_v19, inf  ;;  %3133 = vmatpush3.bf16.msra.mxu0 %v2229_v7  ;;  %v1667_v2 = vcvt.f32.s32 %v4952_v41  ;;  %v5524_v7 = vld [vmem:[#allocation22_spill] sm:$0xff] }
 0x5b2   : > { %1860 = vmin.xlane.f32.xlu0 %v1859_v33  ;;  %v1873_v9 = vsel %vm1872_vm10, %v1868_v36, inf  ;;  %v1724_v36 = vshll.u32 %v1723_v23, 16 }
 0x5b3   : > { %1874 = vmin.xlane.f32.xlu1 %v1873_v9  ;;  %v1668_v5 = vshll.u32 %v1667_v2, 16 }
 0x61b   : > { %v1665_v57 = vpop.xlane.xlu0 %1664 }
 0x61c   : > { %v1666_v53 = vcvt.f32.s32 %v1665_v57 }
 0x61e   : > { %v1669_v41 = vadd.s32 %v1668_v5, %v1666_v53  ;;  %v5525_v53 = vld [vmem:[#allocation23_spill] sm:$0xff] }
 0x61f   : > { %v1679_v35 = vpop.xlane.xlu1 %1678 }
 0x620   : > { %vm1880_vm12 = vcmp.eq.s32.totalorder %v5462_v34, %v1669_v41  ;;  %v1680_v3 = vcvt.f32.s32 %v1679_v35 }
 0x621   : > { %v2944_v29 = vsel %vm1880_vm12, 1.0, %v5463_v52 }
 0x622   : > { %v1683_v38 = vadd.s32 %v1682_v16, %v1680_v3  ;;  %v1693_v25 = vpop.xlane.xlu0 %1692  ;;  %v1960_v10 = vmul.f32 %v4746_v48, %v2944_v29  ;;  %v1765_v16 = vcvt.f32.s32 %v4988_v46  ;;  %v5526_v3 = vld [vmem:[#allocation25_spill] sm:$0xff] }
 0x623   : > { %v1694_v20 = vcvt.f32.s32 %v1693_v25  ;;  %v1707_v31 = vpop.xlane.xlu1 %1706 }
 0x624   : > { %vm1881_vm13 = vcmp.eq.s32.totalorder %v5462_v34, %v1683_v38  ;;  %v1708_v26 = vcvt.f32.s32 %v1707_v31  ;;  %v1976_v47 = vadd.f32 %v1960_v10, %v5522_v59  ;;  %v5530_v59 = vld [vmem:[#allocation45_spill] sm:$0xff] }
 0x625   : > { %v2945_v48 = vsel %vm1881_vm13, 1.0, %v5463_v52  ;;  %v1697_v43 = vadd.s32 %v1696_v12, %v1694_v20  ;;  %v5528_v20 = vld [vmem:[#allocation26_spill] sm:$0xff] }
 0x626   : > { %v1711_v55 = vadd.s32 %v1710_v4, %v1708_v26  ;;  %v1721_v14 = vpop.xlane.xlu0 %1720  ;;  %v1961_v1 = vmul.f32 %v4768_v11, %v2945_v48  ;;  %v2024_v19 = vmul.f32 %v3375_v37, %v1976_v47  ;;  %v3387_v11 = vpop.eup %3386  ;;  %v5527_v37 = vld [vmem:[#allocation46_spill] sm:$0xff]  ;;  %v5529_v26 = vld [vmem:[#allocation44_spill] sm:$0xff] }
 0x627   : > { %vm1882_vm14 = vcmp.eq.s32.totalorder %v5462_v34, %v1697_v43  ;;  %v1722_v33 = vcvt.f32.s32 %v1721_v14  ;;  %v5082_v35 = vpop.eup %3388  ;;  %v1559_v47 = vadd.f32 %v5530_v59, %v5529_v26  ;;  %v1779_v43 = vcvt.f32.s32 %v4993_v60  ;;  %v5532_v14 = vld [vmem:[#allocation27_spill] sm:$0xff]  ;;  %v5537_v26 = vld [vmem:[#allocation34_spill] sm:$0xff] }
 0x628   : > { %v2946_v9 = vsel %vm1882_vm14, 1.0, %v5463_v52  ;;  %vm1883_vm15 = vcmp.eq.s32.totalorder %v5462_v34, %v1711_v55  ;;  %v1977_v8 = vadd.f32 %v1961_v1, %v5523_v58  ;;  %v5087_v29 = vpop.eup %3390 }
 0x629   : > { %v1962_v2 = vmul.f32 %v5524_v7, %v2946_v9  ;;  %v2947_v17 = vsel %vm1883_vm15, 1.0, %v5463_v52  ;;  %v1725_v57 = vadd.s32 %v1724_v36, %v1722_v33  ;;  %v1735_v5 = vpop.xlane.xlu1 %1734  ;;  %v5091_v23 = vpop.eup %3392  ;;  %v5533_v9 = vld [vmem:[#allocation30_spill] sm:$0xff]  ;;  %v5534_v7 = vld [vmem:[#allocation29_spill] sm:$0xff] }
 0x62a   : > { %v1963_v56 = vmul.f32 %v5525_v53, %v2947_v17  ;;  %v1736_v41 = vcvt.f32.s32 %v1735_v5  ;;  %v1749_v13 = vpop.xlane.xlu0 %1748  ;;  %v2025_v54 = vmul.f32 %v3387_v11, %v1977_v8  ;;  %v5099_v48 = vpop.eup %3394 }
 0x62b   : > { %vm1884_vm1 = vcmp.eq.s32.totalorder %v5462_v34, %v1725_v57  ;;  %v1750_v0 = vcvt.f32.s32 %v1749_v13  ;;  %v1978_v40 = vadd.f32 %v1962_v2, %v5526_v3  ;;  %v5107_v33 = vpop.eup %3396  ;;  %v2007_v17 = vadd.f32 %v5099_v48, %v1559_v47 }
 0x62c   : > { %v2948_v38 = vsel %vm1884_vm1, 1.0, %v5463_v52  ;;  %v1739_v25 = vadd.s32 %v1738_v27, %v1736_v41  ;;  %v2040_v10 = vpack.c.bf16 %v2025_v54, %v2024_v19  ;;  %v1979_v12 = vadd.f32 %v1963_v56, %v5527_v37  ;;  %v5111_v11 = vpop.eup %3398 }
 0x62d   : > { %v1964_v31 = vmul.f32 %v5528_v20, %v2948_v38  ;;  %v1753_v46 = vadd.s32 %v1752_v18, %v1750_v0  ;;  %v2026_v4 = vmul.f32 %v3377_v24, %v1978_v40  ;;  %v1766_v24 = vshll.u32 %v1765_v16, 16 }
 0x62e   : > { %vm1885_vm2 = vcmp.eq.s32.totalorder %v5462_v34, %v1739_v25  ;;  %3116 = vmatprep.mubr.bf16.mxu1 %v2040_v10  ;;  %v2027_v44 = vmul.f32 %v3379_v63, %v1979_v12  ;;  %v1763_v62 = vpop.xlane.xlu1 %1762  ;;  %v1793_v63 = vcvt.f32.s32 %v4999_v45  ;;  %v2006_v27 = vadd.f32 %v5087_v29, %v5058_v28  ;;  %v5535_v45 = vld [vmem:[#allocation47_spill] sm:$0xff]  ;;  %v5126_v25 = vpop.eup %3400 }
 0x62f   : > { %v2949_v15 = vsel %vm1885_vm2, 1.0, %v5463_v52  ;;  %vm1886_vm3 = vcmp.eq.s32.totalorder %v5462_v34, %v1753_v46  ;;  %v1980_v55 = vadd.f32 %v1964_v31, %v5531_v30  ;;  %v1764_v60 = vcvt.f32.s32 %v1763_v62  ;;  %v5130_v37 = vpop.eup %3402  ;;  %v5539_v30 = vld [vmem:[#allocation35_spill] sm:$0xff] }
 0x630   : > { %v1965_v1 = vmul.f32 %v5532_v14, %v2949_v15  ;;  %v2950_v19 = vsel %vm1886_vm3, 1.0, %v5463_v52  ;;  %v2041_v36 = vpack.c.bf16 %v2027_v44, %v2026_v4  ;;  %v1780_v57 = vshll.u32 %v1779_v43, 16  ;;  %v1777_v18 = vpop.xlane.xlu0 %1776  ;;  %v5538_v44 = vld [vmem:[#allocation32_spill] sm:$0xff] }
 0x631   : > { %v1966_v58 = vmul.f32 %v5533_v9, %v2950_v19  ;;  %v2028_v8 = vmul.f32 %v3381_v42, %v1980_v55  ;;  %v1767_v5 = vadd.s32 %v1766_v24, %v1764_v60  ;;  %v1807_v56 = vcvt.f32.s32 %v5005_v22  ;;  %v5540_v9 = vld [vmem:[#allocation33_spill] sm:$0xff] }
 0x632   : > { %3117 = vmatmul.mubr.bf16.vlgmr.msra.gmra.mrb[0].mxu1 %v2041_v36  ;;  %v1981_v2 = vadd.f32 %v1965_v1, %v5534_v7  ;;  %v1821_v42 = vcvt.f32.s32 %v5007_v39  ;;  %v1778_v41 = vcvt.f32.s32 %v1777_v18  ;;  %v1794_v54 = vshll.u32 %v1793_v63, 16  ;;  %v5536_v39 = vld [vmem:[#allocation31_spill] sm:$0xff]  ;;  %v3405_v1 = vpop.eup %3404 }
 0x633   : > { %v1982_v53 = vadd.f32 %v1966_v58, %v5535_v45  ;;  %vm1887_vm4 = vcmp.eq.s32.totalorder %v5462_v34, %v1767_v5  ;;  %v1835_v0 = vcvt.f32.s32 %v5016_v6  ;;  %3406 = vrcp.f32 %v2006_v27  ;;  %v5541_v27 = vld [vmem:[#allocation36_spill] sm:$0xff]  ;;  %v5543_v18 = vld [vmem:[#allocation39_spill] sm:$0xff] }
 0x634   : > { %v1791_v13 = vpop.xlane.xlu1 %1790  ;;  %v2029_v51 = vmul.f32 %v5069_v50, %v1981_v2  ;;  %v2951_v3 = vsel %vm1887_vm4, 1.0, %v5463_v52  ;;  %v1781_v40 = vadd.s32 %v1780_v57, %v1778_v41  ;;  %v1849_v22 = vcvt.f32.s32 %v5021_v61 }
 0x635   : > { %v1792_v28 = vcvt.f32.s32 %v1791_v13  ;;  %v2030_v16 = vmul.f32 %v5073_v49, %v1982_v53  ;;  %v1967_v10 = vmul.f32 %v5536_v39, %v2951_v3  ;;  %3408 = vrcp.f32 %v2007_v17 }
 0x636   : > { %v2042_v38 = vpack.c.bf16 %v2029_v51, %v2028_v8  ;;  %v1808_v12 = vshll.u32 %v1807_v56, 16  ;;  %v1822_v20 = vshll.u32 %v1821_v42, 16  ;;  %vm1888_vm5 = vcmp.eq.s32.totalorder %v5462_v34, %v1781_v40  ;;  %v5545_v40 = vld [vmem:[#allocation5_spill] sm:$0xff] }
 0x637   : > { %v1795_v50 = vadd.s32 %v1794_v54, %v1792_v28  ;;  %v1805_v6 = vpop.xlane.xlu0 %1804  ;;  %v2952_v31 = vsel %vm1888_vm5, 1.0, %v5463_v52  ;;  %v1836_v61 = vshll.u32 %v1835_v0, 16  ;;  %v1983_v43 = vadd.f32 %v1967_v10, %v5538_v44  ;;  %v5549_v44 = vld [vmem:[#allocation18_spill] sm:$0xff] }
 0x638   : > { %v1819_v49 = vpop.xlane.xlu1 %1818  ;;  %3120 = vmatprep.mubr.bf16.mxu1 %v2042_v38  ;;  %v1806_v46 = vcvt.f32.s32 %v1805_v6  ;;  %v1968_v59 = vmul.f32 %v5537_v26, %v2952_v31  ;;  %v1850_v15 = vshll.u32 %v1849_v22, 16  ;;  %v1863_v19 = vcvt.f32.s32 %v5025_v32 }
 0x639   : > { %vm1889_vm6 = vcmp.eq.s32.totalorder %v5462_v34, %v1795_v50  ;;  %v1820_v4 = vcvt.f32.s32 %v1819_v49  ;;  %v1877_v62 = vcvt.f32.s32 %v5030_v21  ;;  %v2031_v63 = vmul.f32 %v5082_v35, %v1983_v43  ;;  %v5542_v21 = vld [vmem:[#allocation38_spill] sm:$0xff]  ;;  %v5546_v50 = vld [vmem:[#allocation40_spill] sm:$0xff]  ;;  %v5547_v49 = vld [vmem:[#allocation41_spill] sm:$0xff] }
 0x63a   : > { %v2953_v47 = vsel %vm1889_vm6, 1.0, %v5463_v52  ;;  %v1809_v24 = vadd.s32 %v1808_v12, %v1806_v46  ;;  %v1984_v58 = vadd.f32 %v1968_v59, %v5540_v9  ;;  %v1864_v56 = vshll.u32 %v1863_v19, 16  ;;  %v5551_v19 = vld [vmem:[#allocation20_spill] sm:$0xff] }
 0x63b   : > { %v1969_v55 = vmul.f32 %v5539_v30, %v2953_v47  ;;  %v1823_v14 = vadd.s32 %v1822_v20, %v1820_v4  ;;  %v1833_v36 = vpop.xlane.xlu0 %1832  ;;  %v2043_v57 = vpack.c.bf16 %v2031_v63, %v2030_v16  ;;  %v1878_v42 = vshll.u32 %v1877_v62, 16  ;;  %v5544_v16 = vld [vmem:[#allocation37_spill] sm:$0xff] }
 0x63c   : > { %vm1890_vm7 = vcmp.eq.s32.totalorder %v5462_v34, %v1809_v24  ;;  %v1834_v60 = vcvt.f32.s32 %v1833_v36  ;;  %v1847_v8 = vpop.xlane.xlu1 %1846  ;;  %v2032_v53 = vmul.f32 %v5091_v23, %v1984_v58  ;;  %v5550_v24 = vld [vmem:[#allocation19_spill] sm:$0xff] }
 0x63d   : > { %vm1891_vm8 = vcmp.eq.s32.totalorder %v5462_v34, %v1823_v14  ;;  %v1985_v7 = vadd.f32 %v1969_v55, %v5541_v27  ;;  %v2954_v2 = vsel %vm1890_vm7, 1.0, %v5463_v52  ;;  %v1848_v32 = vcvt.f32.s32 %v1847_v8  ;;  %3121 = vmatmul.mubr.bf16.gmra.mrb[4].mxu1 %v2043_v57  ;;  %v3407_v54 = vpop.eup %3406 }
 0x63e   : > { %v2955_v17 = vsel %vm1891_vm8, 1.0, %v5463_v52  ;;  %v1970_v5 = vmul.f32 %v5542_v21, %v2954_v2  ;;  %v1837_v45 = vadd.s32 %v1836_v61, %v1834_v60  ;;  %v5548_v61 = vld [vmem:[#allocation17_spill] sm:$0xff] }
 0x63f   : > { %v1971_v35 = vmul.f32 %v5543_v18, %v2955_v17  ;;  %v1851_v41 = vadd.s32 %v1850_v15, %v1848_v32  ;;  %v1861_v13 = vpop.xlane.xlu0 %1860  ;;  %v2033_v51 = vmul.f32 %v5107_v33, %v1985_v7  ;;  %v3409_v22 = vpop.eup %3408 }
 0x640   : > { %vm1892_vm9 = vcmp.eq.s32.totalorder %v5462_v34, %v1837_v45  ;;  %v1862_v28 = vcvt.f32.s32 %v1861_v13  ;;  %v1875_v0 = vpop.xlane.xlu1 %1874  ;;  %v1986_v3 = vadd.f32 %v1970_v5, %v5544_v16  ;;  %v3272_v16 = vld [vmem:[%s3629_s27] sm:$0xff]  }
 0x641   : > { %v1987_v38 = vadd.f32 %v1971_v35, %v5545_v40  ;;  %v2956_v39 = vsel %vm1892_vm9, 1.0, %v5463_v52  ;;  %vm1893_vm10 = vcmp.eq.s32.totalorder %v5462_v34, %v1851_v41  ;;  %v1876_v23 = vcvt.f32.s32 %v1875_v0  ;;  %v3274_v40 = vld [vmem:[%s3629_s27 + $0x10] sm:$0xff]  }
 0x642   : > { %v2044_v10 = vpack.c.bf16 %v2033_v51, %v2032_v53  ;;  %v1972_v12 = vmul.f32 %v5546_v50, %v2956_v39  ;;  %v2957_v33 = vsel %vm1893_vm10, 1.0, %v5463_v52  ;;  %v1865_v20 = vadd.s32 %v1864_v56, %v1862_v28  ;;  %v3277_v39 = vld [vmem:[%s3629_s27 + $0x28] sm:$0xff]   ;;  %v2992_v50 = vld [vmem:[%s5306_s6] ss:$0 sm:$0xff] }
 0x643   : > { %v2034_v6 = vmul.f32 %v5111_v11, %v1986_v3  ;;  %v1973_v31 = vmul.f32 %v5547_v49, %v2957_v33  ;;  %v1879_v46 = vadd.s32 %v1878_v42, %v1876_v23  ;;  %v2035_v4 = vmul.f32 %v5126_v25, %v1987_v38  ;;  %v3273_v3 = vld [vmem:[%s3629_s27 + $0x8] sm:$0xff]   ;;  %v3275_v38 = vld [vmem:[%s3629_s27 + $0x18] sm:$0xff]   ;;  %v3278_v23 = vld [vmem:[%s3629_s27 + $0x30] sm:$0xff]  }
 0x644   : > { %3124 = vmatprep.mubr.bf16.mxu1 %v2044_v10  ;;  %vm1894_vm12 = vcmp.eq.s32.totalorder %v5462_v34, %v1865_v20  ;;  %v1988_v26 = vadd.f32 %v1972_v12, %v5548_v61  ;;  %v3279_v10 = vld [vmem:[%s3629_s27 + $0x38] sm:$0xff]  }
 0x645   : > { %v2958_v59 = vsel %vm1894_vm12, 1.0, %v5463_v52  ;;  %vm1895_vm13 = vcmp.eq.s32.totalorder %v5462_v34, %v1879_v46  ;;  %v2045_v47 = vpack.c.bf16 %v2035_v4, %v2034_v6  ;;  %v1989_v43 = vadd.f32 %v1973_v31, %v5549_v44 }
 0x646   : > { %v1974_v15 = vmul.f32 %v5087_v29, %v2958_v59  ;;  %v2959_v11 = vsel %vm1895_vm13, 1.0, %v5463_v52  ;;  %v2036_v30 = vmul.f32 %v5130_v37, %v1988_v26  ;;  %v2193_v52 = vld [vmem:[%s5304_s4] sm:$0xf] }
 0x647   : > { %v1975_v55 = vmul.f32 %v5099_v48, %v2959_v11  ;;  %3125 = vmatmul.mubr.bf16.gmra.mrb[8].mxu1 %v2045_v47  ;;  %v2037_v25 = vmul.f32 %v3405_v1, %v1989_v43  ;;  %3205 = vmatprep.subr.msk.bf16.mxu0 %vm2227_vm11, %v2193_v52  ;;  %v3280_v29 = vld [vmem:[%s5307_s7] sm:$0xff]   ;;  %v3281_v48 = vld [vmem:[%s5307_s7 + $0x8] sm:$0xff]   ;;  %v2393_v7 = vsel %vm2227_vm11, %v2193_v52, 0  ;;  %vm2562_vm11 = vcmask 261120  }
 0x648   : > { %v1990_v14 = vadd.f32 %v1974_v15, %v5550_v24  ;;  %3168 = vmatprep.subr.bf16.mxu1 %v3280_v29 }
 0x649   : > { %v1991_v62 = vadd.f32 %v1975_v55, %v5551_v19  ;;  %v2046_v36 = vpack.c.bf16 %v2037_v25, %v2036_v30  ;;  %3169 = vmatpush3.bf16.msra.mxu1 %v3280_v29 }
 0x64a   : > { %v2038_v63 = vmul.f32 %v3407_v54, %v1990_v14  ;;  %3170 = vmatprep.subr.bf16.mxu1 %v3281_v48 }
 0x64b   : > { %3128 = vmatprep.mubr.bf16.mxu1 %v2046_v36  ;;  %v2039_v34 = vmul.f32 %v3409_v22, %v1991_v62  ;;  %v3276_v22 = vld [vmem:[%s3629_s27 + $0x20] sm:$0xff]   ;;  %s3410_s27 = scalar_lea.vmem %s5249_s20, 2048 }
 0x64c   : > { %p3411_p12 = scmp.ne.s32.totalorder %s5249_s20, %s3410_s27  ;;  %p3418_p2 = scmp.lt.s32.totalorder %s3416_s15, %s3410_s27 }
 0x64d   : > { %v2047_v9 = vpack.c.bf16 %v2039_v34, %v2038_v63  ;;  %3171 = vmatpush3.bf16.msra.mxu1 %v3281_v48 }
 0x64e   : > { %p3412_p13 = pnand %p3411_p12, %p3584_p4  ;;  %p3419_p3 = por %p3418_p2, %p3417_p1 }
 0x64f   : > { %3129 = vmatmul.mubr.bf16.gmra.mrb[12].mxu1 %v2047_v9 }
 0x650   : > { %p3413_p0 = pneg %p3412_p13 }
 0x652   : > { %p3420_p5 = pnand %p3419_p3, %p3413_p0 }
 0x705   : > { %v3118_v37 = vpop.f32.mrb[0].mxu1 }
 0x706   : > { %v2130_v1 = vpop.f32.mrb[1].mxu1 }
 0x707   : > { %v3119_v58 = vpop.f32.mrb[2].mxu1 }
 0x708   : > { %v2195_v60 = vpack.c.bf16 %v3119_v58, %v3118_v37  ;;  %v2133_v8 = vpop.f32.mrb[3].mxu1 }
 0x709   : > { %v2194_v27 = vpack.c.bf16 %v2133_v8, %v2130_v1 }
 0x70b   : > { %3134 = vmatprep.mubr.msk.bf16.mxu0 %vm484_vm0, %v2194_v27 }
 0x70c   : > { %3135 = vmatmul.mubr.msk.bf16.vlgmr.msra.gmra.mrb[16].mxu0 %vm484_vm0, %v2195_v60 }
 0x70d   : > { %3151 = vmatpush3.bf16.msra.mxu0 %v2393_v7 }
 0x710   : > { %v3122_v2 = vpop.f32.mrb[4].mxu1 }
 0x711   : > { %v2146_v17 = vpop.f32.mrb[5].mxu1 }
 0x712   : > { %v3123_v32 = vpop.f32.mrb[6].mxu1 }
 0x713   : > { %v2197_v57 = vpack.c.bf16 %v3123_v32, %v3122_v2  ;;  %v2149_v21 = vpop.f32.mrb[7].mxu1 }
 0x714   : > { %v2196_v5 = vpack.c.bf16 %v2149_v21, %v2146_v17 }
 0x716   : > { %3138 = vmatprep.mubr.msk.bf16.mxu0 %vm484_vm0, %v2196_v5 }
 0x717   : > { %3139 = vmatmul.mubr.msk.bf16.gmra.mrb[20].mxu0 %vm484_vm0, %v2197_v57 }
 0x71a   : > { %v3126_v18 = vpop.f32.mrb[8].mxu1 }
 0x71b   : > { %v2162_v35 = vpop.f32.mrb[9].mxu1 }
 0x71c   : > { %v3127_v45 = vpop.f32.mrb[10].mxu1 }
 0x71d   : > { %v2199_v53 = vpack.c.bf16 %v3127_v45, %v3126_v18  ;;  %v2165_v56 = vpop.f32.mrb[11].mxu1 }
 0x71e   : > { %v2198_v42 = vpack.c.bf16 %v2165_v56, %v2162_v35 }
 0x720   : > { %3142 = vmatprep.mubr.msk.bf16.mxu0 %vm484_vm0, %v2198_v42 }
 0x721   : > { %3143 = vmatmul.mubr.msk.bf16.gmra.mrb[24].mxu0 %vm484_vm0, %v2199_v53 }
 0x722   : > { %v3130_v41 = vpop.f32.mrb[12].mxu1 }
 0x723   : > { %v2178_v13 = vpop.f32.mrb[13].mxu1 }
 0x724   : > { %v3131_v51 = vpop.f32.mrb[14].mxu1 }
 0x725   : > { %v2201_v54 = vpack.c.bf16 %v3131_v51, %v3130_v41  ;;  %v2181_v28 = vpop.f32.mrb[15].mxu1 }
 0x726   : > { %v2200_v0 = vpack.c.bf16 %v2181_v28, %v2178_v13 }
 0x728   : > { %3146 = vmatprep.mubr.msk.bf16.mxu0 %vm484_vm0, %v2200_v0 }
 0x729   : > { %3147 = vmatmul.mubr.msk.bf16.gmra.mrb[28].mxu0 %vm484_vm0, %v2201_v54 }
 0x72a   : > { %3152 = vmatprep.mubr.msk.bf16.mxu0 %vm484_vm0, %v3272_v16 }
 0x731   : > { %3153 = vmatmul.mubr.msk.bf16.vlgmr.msra.gmra.mrb[16].mxu0 %vm484_vm0, %v3273_v3  ;;  %v2993_v3 = vld [vmem:[%s5308_s8] ss:$0 sm:$0xff] }
 0x732   : > { %3156 = vmatprep.mubr.msk.bf16.mxu0 %vm484_vm0, %v3274_v40 }
 0x739   : > { %3157 = vmatmul.mubr.msk.bf16.gmra.mrb[20].mxu0 %vm484_vm0, %v3275_v38 }
 0x73a   : > { %3160 = vmatprep.mubr.msk.bf16.mxu0 %vm484_vm0, %v3276_v22 }
 0x741   : > { %3161 = vmatmul.mubr.msk.bf16.gmra.mrb[24].mxu0 %vm484_vm0, %v3277_v39 }
 0x742   : > { %3164 = vmatprep.mubr.msk.bf16.mxu0 %vm484_vm0, %v3278_v23 }
 0x749   : > { %3165 = vmatmul.mubr.msk.bf16.gmra.mrb[28].mxu0 %vm484_vm0, %v3279_v10 }
 0x804   : > { %v3154_v12 = vpop.f32.mrb[16].mxu0 }
 0x805   : > { %v2501_v33 = vadd.f32 %v3154_v12, %v2992_v50  ;;  %v2429_v20 = vpop.f32.mrb[17].mxu0 }
 0x806   : > { %v2499_v6 = vadd.f32 %v2992_v50, %v2429_v20  ;;  %v3155_v49 = vpop.f32.mrb[18].mxu0 }
 0x807   : > { %v2502_v31 = vadd.f32 %v3155_v49, %v2992_v50  ;;  %v2432_v46 = vpop.f32.mrb[19].mxu0  ;;  %v2517_v61 = vmax.f32 %v2501_v33, 0.0 }
 0x808   : > { %v2500_v4 = vadd.f32 %v2992_v50, %v2432_v46  ;;  %v2515_v59 = vmax.f32 %v2499_v6, 0.0 }
 0x809   : > { %v2518_v26 = vmax.f32 %v2502_v31, 0.0 }
 0x80a   : > { %v2516_v47 = vmax.f32 %v2500_v4, 0.0 }
 0x80b   : > { %v2537_v44 = vpack.c.bf16 %v2518_v26, %v2517_v61 }
 0x80c   : > { %v2536_v43 = vpack.c.bf16 %v2516_v47, %v2515_v59  ;;  %v3158_v15 = vpop.f32.mrb[20].mxu0 }
 0x80d   : > { %v2505_v11 = vadd.f32 %v3158_v15, %v2992_v50  ;;  %v2445_v30 = vpop.f32.mrb[21].mxu0 }
 0x80e   : > { %v2503_v55 = vadd.f32 %v2992_v50, %v2445_v30  ;;  %v3159_v25 = vpop.f32.mrb[22].mxu0  ;;  %3172 = vmatprep.mubr.msk.bf16.mxu1 %vm2562_vm11, %v2536_v43 }
 0x80f   : > { %v2506_v24 = vadd.f32 %v3159_v25, %v2992_v50  ;;  %v2448_v14 = vpop.f32.mrb[23].mxu0  ;;  %3173 = vmatmul.mubr.msk.bf16.vlgmr.msra.gmra.mrb[16].mxu1 %vm2562_vm11, %v2537_v44  ;;  %v2521_v62 = vmax.f32 %v2505_v11, 0.0 }
 0x810   : > { %v2504_v19 = vadd.f32 %v2992_v50, %v2448_v14  ;;  %v2519_v63 = vmax.f32 %v2503_v55, 0.0 }
 0x811   : > { %v2522_v36 = vmax.f32 %v2506_v24, 0.0 }
 0x812   : > { %v2520_v34 = vmax.f32 %v2504_v19, 0.0 }
 0x813   : > { %v2539_v9 = vpack.c.bf16 %v2522_v36, %v2521_v62 }
 0x814   : > { %v2538_v52 = vpack.c.bf16 %v2520_v34, %v2519_v63  ;;  %v3162_v29 = vpop.f32.mrb[24].mxu0 }
 0x815   : > { %v2509_v48 = vadd.f32 %v3162_v29, %v2992_v50  ;;  %v2461_v37 = vpop.f32.mrb[25].mxu0 }
 0x816   : > { %v2507_v1 = vadd.f32 %v2992_v50, %v2461_v37  ;;  %v3163_v58 = vpop.f32.mrb[26].mxu0  ;;  %3176 = vmatprep.mubr.msk.bf16.mxu1 %vm2562_vm11, %v2538_v52 }
 0x817   : > { %v2510_v60 = vadd.f32 %v3163_v58, %v2992_v50  ;;  %v2464_v8 = vpop.f32.mrb[27].mxu0  ;;  %3177 = vmatmul.mubr.msk.bf16.gmra.mrb[20].mxu1 %vm2562_vm11, %v2539_v9  ;;  %v2525_v7 = vmax.f32 %v2509_v48, 0.0 }
 0x818   : > { %v2508_v27 = vadd.f32 %v2992_v50, %v2464_v8  ;;  %v2523_v17 = vmax.f32 %v2507_v1, 0.0 }
 0x819   : > { %v2526_v2 = vmax.f32 %v2510_v60, 0.0 }
 0x81a   : > { %v2524_v32 = vmax.f32 %v2508_v27, 0.0 }
 0x81b   : > { %v2541_v57 = vpack.c.bf16 %v2526_v2, %v2525_v7 }
 0x81c   : > { %v2540_v21 = vpack.c.bf16 %v2524_v32, %v2523_v17  ;;  %v3166_v5 = vpop.f32.mrb[28].mxu0 }
 0x81d   : > { %v2513_v18 = vadd.f32 %v3166_v5, %v2992_v50  ;;  %v2477_v35 = vpop.f32.mrb[29].mxu0 }
 0x81e   : > { %v2511_v45 = vadd.f32 %v2992_v50, %v2477_v35  ;;  %v3167_v53 = vpop.f32.mrb[30].mxu0  ;;  %3180 = vmatprep.mubr.msk.bf16.mxu1 %vm2562_vm11, %v2540_v21 }
 0x81f   : > { %v2514_v56 = vadd.f32 %v3167_v53, %v2992_v50  ;;  %v2480_v42 = vpop.f32.mrb[31].mxu0  ;;  %3181 = vmatmul.mubr.msk.bf16.gmra.mrb[24].mxu1 %vm2562_vm11, %v2541_v57  ;;  %v2529_v13 = vmax.f32 %v2513_v18, 0.0 }
 0x820   : > { %v2512_v41 = vadd.f32 %v2992_v50, %v2480_v42  ;;  %v2527_v54 = vmax.f32 %v2511_v45, 0.0 }
 0x821   : > { %v2530_v51 = vmax.f32 %v2514_v56, 0.0 }
 0x822   : > { %v2528_v28 = vmax.f32 %v2512_v41, 0.0 }
 0x823   : > { %v2543_v0 = vpack.c.bf16 %v2530_v51, %v2529_v13 }
 0x824   : > { %v2542_v16 = vpack.c.bf16 %v2528_v28, %v2527_v54 }
 0x826   : > { %3184 = vmatprep.mubr.msk.bf16.mxu1 %vm2562_vm11, %v2542_v16 }
 0x827   : > { %3185 = vmatmul.mubr.msk.bf16.gmra.mrb[28].mxu1 %vm2562_vm11, %v2543_v0 }
 0x8e2   : > { %v3174_v40 = vpop.f32.mrb[16].mxu1 }
 0x8e3   : > { %v2621_v38 = vpop.f32.mrb[17].mxu1  ;;  %v2630_v12 = vadd.f32 %v3174_v40, %v2993_v3 }
 0x8e4   : > { %v2622_v22 = vadd.f32 %v2993_v3, %v2621_v38  ;;  %v3175_v39 = vpop.f32.mrb[18].mxu1 }
 0x8e5   : > { %v2624_v23 = vpop.f32.mrb[19].mxu1  ;;  %v2686_v46 = vmax.f32 %v2630_v12, 0.0  ;;  %v2633_v4 = vadd.f32 %v3175_v39, %v2993_v3 }
 0x8e6   : > { %v2684_v10 = vmax.f32 %v2622_v22, 0.0  ;;  %v2625_v50 = vadd.f32 %v2993_v3, %v2624_v23 }
 0x8e7   : > { %v2687_v61 = vmax.f32 %v2633_v4, 0.0 }
 0x8e8   : > { %2700 = vxpose.xlu0.b32.start [1/16] %v2684_v10, 128  ;;  %v2685_v33 = vmax.f32 %v2625_v50, 0.0 }
 0x8ea   : > { %v3178_v20 = vpop.f32.mrb[20].mxu1 }
 0x8eb   : > { %v2637_v6 = vpop.f32.mrb[21].mxu1  ;;  %v2646_v30 = vadd.f32 %v3178_v20, %v2993_v3 }
 0x8ec   : > { %2701 = vxpose.xlu0.b32.cont [2/16] %v2685_v33, 128  ;;  %v3179_v49 = vpop.f32.mrb[22].mxu1  ;;  %v2638_v26 = vadd.f32 %v2993_v3, %v2637_v6 }
 0x8ed   : > { %v2640_v31 = vpop.f32.mrb[23].mxu1  ;;  %v2690_v62 = vmax.f32 %v2646_v30, 0.0  ;;  %v2649_v36 = vadd.f32 %v3179_v49, %v2993_v3 }
 0x8ee   : > { %v2688_v15 = vmax.f32 %v2638_v26, 0.0  ;;  %v2641_v11 = vadd.f32 %v2993_v3, %v2640_v31 }
 0x8ef   : > { %v2691_v63 = vmax.f32 %v2649_v36, 0.0 }
 0x8f0   : > { %2702 = vxpose.xlu0.b32.cont [3/16] %v2686_v46, 128  ;;  %v2689_v55 = vmax.f32 %v2641_v11, 0.0 }
 0x8f2   : > { %v3182_v59 = vpop.f32.mrb[24].mxu1 }
 0x8f3   : > { %v2653_v47 = vpop.f32.mrb[25].mxu1  ;;  %v2662_v29 = vadd.f32 %v3182_v59, %v2993_v3 }
 0x8f4   : > { %2703 = vxpose.xlu0.b32.cont [4/16] %v2687_v61, 128  ;;  %v3183_v44 = vpop.f32.mrb[26].mxu1  ;;  %v2654_v34 = vadd.f32 %v2993_v3, %v2653_v47 }
 0x8f5   : > { %v2656_v43 = vpop.f32.mrb[27].mxu1  ;;  %v2694_v37 = vmax.f32 %v2662_v29, 0.0  ;;  %v2665_v1 = vadd.f32 %v3183_v44, %v2993_v3 }
 0x8f6   : > { %v2692_v9 = vmax.f32 %v2654_v34, 0.0  ;;  %v2657_v52 = vadd.f32 %v2993_v3, %v2656_v43 }
 0x8f7   : > { %v2695_v58 = vmax.f32 %v2665_v1, 0.0 }
 0x8f8   : > { %2704 = vxpose.xlu0.b32.cont [5/16] %v2688_v15, 128  ;;  %v2693_v48 = vmax.f32 %v2657_v52, 0.0 }
 0x8fa   : > { %v3186_v25 = vpop.f32.mrb[28].mxu1 }
 0x8fb   : > { %v2669_v24 = vpop.f32.mrb[29].mxu1  ;;  %v2678_v7 = vadd.f32 %v3186_v25, %v2993_v3 }
 0x8fc   : > { %2705 = vxpose.xlu0.b32.cont [6/16] %v2689_v55, 128  ;;  %v3187_v14 = vpop.f32.mrb[30].mxu1  ;;  %v2670_v60 = vadd.f32 %v2993_v3, %v2669_v24 }
 0x8fd   : > { %v2672_v19 = vpop.f32.mrb[31].mxu1  ;;  %v2698_v17 = vmax.f32 %v2678_v7, 0.0  ;;  %v2681_v32 = vadd.f32 %v3187_v14, %v2993_v3 }
 0x8fe   : > { %v2696_v8 = vmax.f32 %v2670_v60, 0.0  ;;  %v2673_v27 = vadd.f32 %v2993_v3, %v2672_v19 }
 0x8ff   : > { %v2699_v57 = vmax.f32 %v2681_v32, 0.0 }
 0x900   : > { %2706 = vxpose.xlu0.b32.cont [7/16] %v2690_v62, 128  ;;  %v2697_v2 = vmax.f32 %v2673_v27, 0.0 }
 0x904   : > { %2707 = vxpose.xlu0.b32.cont [8/16] %v2691_v63, 128 }
 0x908   : > { %2708 = vxpose.xlu0.b32.cont [9/16] %v2692_v9, 128 }
 0x90c   : > { %2709 = vxpose.xlu0.b32.cont [10/16] %v2693_v48, 128 }
 0x910   : > { %2710 = vxpose.xlu0.b32.cont [11/16] %v2694_v37, 128 }
 0x914   : > { %2711 = vxpose.xlu0.b32.cont [12/16] %v2695_v58, 128 }
 0x918   : > { %2712 = vxpose.xlu0.b32.cont [13/16] %v2696_v8, 128 }
 0x91c   : > { %2713 = vxpose.xlu0.b32.cont [14/16] %v2697_v2, 128 }
 0x920   : > { %2714 = vxpose.xlu0.b32.cont [15/16] %v2698_v17, 128 }
 0x924   : > { %2715 = vxpose.xlu0.b32.end [16/16] %v2699_v57, 128 }
 0x968   : > { %v2716_v21 = vpop.trf.xlu0 }
 0x969   : > { %2732 = vst [vmem:[%s5225_s16] sm:$0xff] %v2716_v21 }
 0x96c   : > { %v2717_v5 = vpop.trf.xlu0 }
 0x96d   : > { %2733 = vst [vmem:[%s5225_s16 + $0x8] sm:$0xff] %v2717_v5 }
 0x970   : > { %v2718_v18 = vpop.trf.xlu0 }
 0x971   : > { %2734 = vst [vmem:[%s5225_s16 + $0x10] sm:$0xff] %v2718_v18 }
 0x974   : > { %v2719_v35 = vpop.trf.xlu0 }
 0x975   : > { %2735 = vst [vmem:[%s5225_s16 + $0x18] sm:$0xff] %v2719_v35 }
 0x978   : > { %v2720_v45 = vpop.trf.xlu0 }
 0x979   : > { %2736 = vst [vmem:[%s5225_s16 + $0x20] sm:$0xff] %v2720_v45 }
 0x97c   : > { %v2721_v53 = vpop.trf.xlu0 }
 0x97d   : > { %2737 = vst [vmem:[%s5225_s16 + $0x28] sm:$0xff] %v2721_v53 }
 0x980   : > { %v2722_v56 = vpop.trf.xlu0 }
 0x981   : > { %2738 = vst [vmem:[%s5225_s16 + $0x30] sm:$0xff] %v2722_v56 }
 0x984   : > { %v2723_v42 = vpop.trf.xlu0 }
 0x985   : > { %2739 = vst [vmem:[%s5225_s16 + $0x38] sm:$0xff] %v2723_v42 }
 0x988   : > { %v2724_v41 = vpop.trf.xlu0 }
 0x989   : > { %2740 = vst [vmem:[%s5225_s16 + $0x40] sm:$0xff] %v2724_v41 }
 0x98c   : > { %v2725_v13 = vpop.trf.xlu0 }
 0x98d   : > { %2741 = vst [vmem:[%s5225_s16 + $0x48] sm:$0xff] %v2725_v13 }
 0x990   : > { %v2726_v51 = vpop.trf.xlu0 }
 0x991   : > { %2742 = vst [vmem:[%s5225_s16 + $0x50] sm:$0xff] %v2726_v51 }
 0x994   : > { %v2727_v54 = vpop.trf.xlu0 }
 0x995   : > { %2743 = vst [vmem:[%s5225_s16 + $0x58] sm:$0xff] %v2727_v54 }
 0x998   : > { %v2728_v28 = vpop.trf.xlu0 }
 0x999   : > { %2744 = vst [vmem:[%s5225_s16 + $0x60] sm:$0xff] %v2728_v28 }
 0x99c   : > { %v2729_v0 = vpop.trf.xlu0 }
 0x99d   : > { %2745 = vst [vmem:[%s5225_s16 + $0x68] sm:$0xff] %v2729_v0 }
 0x9a0   : > { %v2730_v16 = vpop.trf.xlu0 }
 0x9a1   : > { %2746 = vst [vmem:[%s5225_s16 + $0x70] sm:$0xff] %v2730_v16 }
 0x9a4   : > { %v2731_v3 = vpop.trf.xlu0 }
 0x9a5   : > { %2747 = vst [vmem:[%s5225_s16 + $0x78] sm:$0xff] %v2731_v3 }
 0x9a6   : > { %3423 = shalt.err (!%p3420_p5)
}
 0x9a7   : > { %s3424_s29 = scalar_lea.hbm %s5247_s23, 2048  ;;  %s3428_s24 = scalar_lea.hbm %s5309_s9, 4096 }
 0x9a8   : > { %p3425_p6 = scmp.ne.s32.totalorder %s5247_s23, %s3424_s29  ;;  %p3429_p10 = scmp.lt.u32.totalorder %s5247_s23, %s5309_s9 }
 0x9a9   : > { %p3430_p11 = scmp.lt.u32.totalorder %s3428_s24, %s3424_s29  ;;  %p3432_p13 = scmp.lt.u32.totalorder %s3424_s29, %s5247_s23 }
 0x9aa   : > { %p3426_p7 = pnand %p3425_p6, %p3584_p4 }
 0x9ab   : > { %p3431_p12 = por %p3430_p11, %p3429_p10 }
 0x9ac   : > { %p3427_p9 = pneg %p3426_p7 }
 0x9ad   : > { %p3433_p0 = por %p3432_p13, %p3431_p12 }
 0x9af   : > { %p3434_p1 = pnand %p3433_p0, %p3427_p9 }
 0x9b1   : > { %3437 = shalt.err (!%p3434_p1)
}
 0x9b2   : > { %s3492_s27 = smov 128   ;;  %s3493_s28 = smov 8  }
 0x9b3   : > { %3206 = dma.vmem_to_hbm [thread:$0]  (%p3584_p4), %s5249_s20, 2048, %s5247_s23, %s5254_s25, %s3492_s27, %s3492_s27, %s3493_s28  }
 0x9b4 PF: > { %p3212_p2 = scmp.ge.s32.totalorder %s3488_s14, 2  ;;  %s2778_s15 = sand.u32 1, %s3468_s30  }
 0x9b5   : > { %s2779_s29 = scalar_lea.sflag [#allocation3], %s2778_s15 }
 0x9b6   : > { %p3209_p3 = pnand %p3212_p2, %p3591_p8 }
 0x9b8   : > { %3463 = dma.done.wait (!%p3209_p3), %s2779_s29, 2048  }
 0x9b9   : > { %3465 = vsyncadd (!%p3209_p3), %s2779_s29, 4294965248  ;;  %s22_s14 = sadd.s32 1, %s3488_s14   ;;  %s5552_s30 = smov %s3472_s10 }
 0x9ba   : > { %p19_p5 = scmp.ge.s32.totalorder %s22_s14, 4   ;;  %s5553_s10 = smov %s3476_s11 }
 0x9bb   : > { %s5554_s11 = smov %s3597_s22  ;;  %s5555_s12 = smov %s3484_s13 }
 0x9bc   : > { %s5556_s13 = smov %s5558_s17  ;;  %21 = sbr.rel (!%p19_p5) target bundleno = 4 (0x4), region = 100 }
 0x9c3   :  { %2784 = vsyncpa [#allocation3], 1 }
 0x9c4   :  { %2786 = vsyncpa [#allocation3 + $0x1], 1 }

</bundles_post_ra>
